<compile_context>
chip_gen: v7x
topology: tpu7x:2x2x1
jax: 0.10.0
libtpu: 0.0.40
codegen_flags: <defaults>
</compile_context>

<pallas_src>
import jax
import jax.numpy as jnp
from jax.experimental import pallas as pl
from jax.experimental.pallas import tpu as pltpu


def _round_up(x, m):
    return (x + m - 1) // m * m


def _pick_tile_rows(H, W, cap=8):
    """Largest divisor of H that is <= cap, preferring sublane-friendly tiles
    (TH*W a multiple of 8); falls back to the whole plane."""
    divs = [d for d in range(2, min(H, cap) + 1) if H % d == 0]
    good = [d for d in divs if (d * W) % 8 == 0]
    if good:
        return max(good)
    if divs:
        return max(divs)
    return H


# ----------------------------------------------------------------------------
# Pallas kernel: one (batch, row-tile) per grid step.
#   x_hi :  (TH, W, Cp)  rows [r0-1, r0+TH-1) of the 1-row-padded x
#   x_lo1:  (1,  W, Cp)  row  r0+TH-1
#   x_lo2:  (1,  W, Cp)  row  r0+TH            (bottom halo)
# Together they form the (TH+2)-row window needed by conv2's 3x3 stencil.
# ----------------------------------------------------------------------------
def bottleneck_kernel(x_hi_ref, x_lo1_ref, x_lo2_ref,
                      w1_ref, w2_ref, w3_ref,
                      s1_ref, b1_ref, s2_ref, b2_ref, s3_ref, b3_ref,
                      out_ref, xwin_ref, pad_ref, im_ref):
    t = pl.program_id(1)
    nt = pl.num_programs(1)
    TH, W, Cp = x_hi_ref.shape            # batch dim squeezed by the BlockSpec
    Wd = pad_ref.shape[2]                 # padded bottleneck width
    Coutp = out_ref.shape[2]
    THW = TH * W

    # --- assemble the (TH+2)-row x window (halo rows are recomputed) ---------
    xwin_ref[pl.ds(0, TH), :, :] = x_hi_ref[...]
    xwin_ref[pl.ds(TH, 1), :, :] = x_lo1_ref[...]
    xwin_ref[pl.ds(TH + 1, 1), :, :] = x_lo2_ref[...]

    # --- conv1 (1x1) + bn1 + relu on all TH+2 rows (bf16 MXU, f32 acc) -------
    xw2d = xwin_ref[...].reshape((TH + 2) * W, Cp)
    h1 = jnp.dot(xw2d, w1_ref[...], preferred_element_type=jnp.float32)
    h1 = jnp.maximum(h1 * s1_ref[...] + b1_ref[...], 0.0)

    # --- build the zero-padded conv2 input plane -----------------------------
    pad_ref[:, pl.ds(1, W), :] = h1.reshape(TH + 2, W, Wd).astype(pad_ref.dtype)
    zcol = jnp.zeros((TH + 2, 1, Wd), pad_ref.dtype)
    pad_ref[:, pl.ds(0, 1), :] = zcol          # left column halo
    pad_ref[:, pl.ds(W + 1, 1), :] = zcol      # right column halo

    # conv2's zero padding applies to h1 (not x): at the image border the halo
    # row must be zero, not relu(bn1(conv1(0))).  Done every step via pl.when,
    # so it is correct under any megacore grid partitioning.
    zrow = jnp.zeros((1, W + 2, Wd), pad_ref.dtype)

    @pl.when(t == 0)
    def _():
        pad_ref[pl.ds(0, 1), :, :] = zrow

    @pl.when(t == nt - 1)
    def _():
        pad_ref[pl.ds(TH + 1, 1), :, :] = zrow

    # --- conv2 (3x3, stride=1, groups=1): taps fused along dx ----------------
    # im[r, x, dx*Wd:(dx+1)*Wd] = pad[r, x+dx, :]  -> per-dy operand is a
    # contiguous (TH, W, 3*Wd) slice, giving 3 matmuls with K = 3*Wd.
    for dx in range(3):
        im_ref[:, :, pl.ds(dx * Wd, Wd)] = pad_ref[:, pl.ds(dx, W), :]

    acc = jnp.dot(im_ref[pl.ds(0, TH), :, :].reshape(THW, 3 * Wd), w2_ref[0],
                  preferred_element_type=jnp.float32)
    acc = acc + jnp.dot(im_ref[pl.ds(1, TH), :, :].reshape(THW, 3 * Wd), w2_ref[1],
                        preferred_element_type=jnp.float32)
    acc = acc + jnp.dot(im_ref[pl.ds(2, TH), :, :].reshape(THW, 3 * Wd), w2_ref[2],
                        preferred_element_type=jnp.float32)
    h2 = jnp.maximum(acc * s2_ref[...] + b2_ref[...], 0.0)

    # --- conv3 (1x1) + bn3 ----------------------------------------------------
    h3 = jnp.dot(h2.astype(jnp.bfloat16), w3_ref[...],
                 preferred_element_type=jnp.float32)
    h3 = h3 * s3_ref[...] + b3_ref[...]

    # --- residual add (f32) + relu, bf16 output store -------------------------
    # xwin rows 1..TH are exactly this tile's x rows (downsample=None).
    res = xwin_ref[pl.ds(1, TH), :, :].reshape(THW, Cp).astype(jnp.float32)
    out = jnp.maximum(h3 + res, 0.0)
    out_ref[...] = out.reshape(TH, W, Coutp).astype(out_ref.dtype)


# ----------------------------------------------------------------------------
# Wrapper: NCHW in / NCHW out, BN folding, lane-dense channel padding.
# ----------------------------------------------------------------------------
@jax.jit
def bottleneck_forward(x_nchw, conv1_w, conv2_w, conv3_w, bn1, bn2, bn3):
    N, Cin, H, W = x_nchw.shape
    width = conv1_w.shape[0]
    Cout = conv3_w.shape[0]
    # downsample=None -> the residual add requires Cin == Cout.
    assert Cin == Cout, "downsample=None requires inplanes == planes*expansion"
    assert H >= 2

    LANE = 128
    Cp = _round_up(Cin, LANE)       # lane-dense input / residual / output
    Wd = _round_up(width, LANE)     # lane-dense bottleneck width
    Coutp = Cp

    TH = _pick_tile_rows(H, W)      # row tile (divides H)
    nt = H // TH

    def fold_bn(gamma, beta, mean, var, eps=1e-5):
        s = gamma / jnp.sqrt(var + eps)
        return s, beta - mean * s

    def pad_to(a, shape):
        return jnp.pad(a, [(0, t - s) for s, t in zip(a.shape, shape)])

    s1, b1 = fold_bn(*bn1)
    s2, b2 = fold_bn(*bn2)
    s3, b3 = fold_bn(*bn3)

    # Repack weights into matmul layout, zero-pad channels, cast to bf16.
    w1 = pad_to(jnp.transpose(conv1_w[:, :, 0, 0], (1, 0)),
                (Cp, Wd)).astype(jnp.bfloat16)                        # (Cp, Wd)
    w2_taps = jnp.transpose(conv2_w, (2, 3, 1, 0)).reshape(9, width, width)
    w2_taps = pad_to(w2_taps, (9, Wd, Wd))
    w2s = w2_taps.reshape(3, 3 * Wd, Wd).astype(jnp.bfloat16)         # dy slabs
    w3 = pad_to(jnp.transpose(conv3_w[:, :, 0, 0], (1, 0)),
                (Wd, Coutp)).astype(jnp.bfloat16)                     # (Wd, Coutp)
    s1p = pad_to(s1[None, :], (1, Wd))
    b1p = pad_to(b1[None, :], (1, Wd))
    s2p = pad_to(s2[None, :], (1, Wd))
    b2p = pad_to(b2[None, :], (1, Wd))
    s3p = pad_to(s3[None, :], (1, Coutp))
    b3p = pad_to(b3[None, :], (1, Coutp))

    # NCHW -> NHWC, zero-pad channels, bf16, plus a 1-row zero halo top+bottom
    # so halo row blocks are always in-bounds.
    x_nhwc = jnp.transpose(x_nchw, (0, 2, 3, 1))
    x_p = pad_to(x_nhwc, (N, H, W, Cp)).astype(jnp.bfloat16)
    x_halo = jnp.pad(x_p, ((0, 0), (1, 1), (0, 0), (0, 0)))           # (N,H+2,W,Cp)

    def const_spec(a):
        nd = a.ndim
        return pl.BlockSpec(a.shape, lambda n, t, _nd=nd: (0,) * _nd)

    in_specs = [
        # TH-row window starting at padded row t*TH (= image row t*TH - 1)
        pl.BlockSpec((pl.Squeezed(), TH, W, Cp), lambda n, t: (n, t, 0, 0)),
        # two 1-row bottom halo blocks (1-row blocks -> any offset reachable)
        pl.BlockSpec((pl.Squeezed(), 1, W, Cp),
                     lambda n, t: (n, (t + 1) * TH, 0, 0)),
        pl.BlockSpec((pl.Squeezed(), 1, W, Cp),
                     lambda n, t: (n, (t + 1) * TH + 1, 0, 0)),
        const_spec(w1), const_spec(w2s), const_spec(w3),
        const_spec(s1p), const_spec(b1p),
        const_spec(s2p), const_spec(b2p),
        const_spec(s3p), const_spec(b3p),
    ]

    out_p = pl.pallas_call(
        bottleneck_kernel,
        out_shape=jax.ShapeDtypeStruct((N, H, W, Coutp), jnp.bfloat16),
        grid_spec=pltpu.PrefetchScalarGridSpec(
            num_scalar_prefetch=0,
            grid=(N, nt),
            in_specs=in_specs,
            out_specs=pl.BlockSpec((pl.Squeezed(), TH, W, Coutp),
                                   lambda n, t: (n, t, 0, 0)),
            scratch_shapes=[
                pltpu.VMEM((TH + 2, W, Cp), jnp.bfloat16),        # x window
                pltpu.VMEM((TH + 2, W + 2, Wd), jnp.bfloat16),    # padded h1
                pltpu.VMEM((TH + 2, W, 3 * Wd), jnp.bfloat16),    # fused taps
            ],
        ),
        compiler_params=pltpu.CompilerParams(
            dimension_semantics=("parallel", "parallel"),
            # Well above the per-step footprint; below v7x's 64 MiB physical
            # and above the v5e/v6e scoped defaults.
            vmem_limit_bytes=48 * 1024 * 1024,
        ),
    )(x_halo, x_halo, x_halo, w1, w2s, w3,
      s1p, b1p, s2p, b2p, s3p, b3p)

    # Strip channel padding, back to NCHW (f32 for the reference check).
    return jnp.transpose(out_p[..., :Cout].astype(jnp.float32), (0, 3, 1, 2))


# ----------------------------------------------------------------------------
# Pure-JAX reference (NCHW, like PyTorch) for correctness check
# ----------------------------------------------------------------------------
def _conv2d_nchw(x, w, stride=1, padding=0):
    return jax.lax.conv_general_dilated(
        x, w, (stride, stride),
        [(padding, padding), (padding, padding)],
        dimension_numbers=("NCHW", "OIHW", "NCHW"))


def _bn_inference(x, gamma, beta, mean, var, eps=1e-5):
    inv = gamma / jnp.sqrt(var + eps)
    return (x - mean[None, :, None, None]) * inv[None, :, None, None] \
        + beta[None, :, None, None]


def ref_bottleneck(x_nchw, conv1_w, conv2_w, conv3_w, bn1, bn2, bn3):
    out = _conv2d_nchw(x_nchw, conv1_w)
    out = jnp.maximum(_bn_inference(out, *bn1), 0.0)
    out = _conv2d_nchw(out, conv2_w, stride=1, padding=1)
    out = jnp.maximum(_bn_inference(out, *bn2), 0.0)
    out = _conv2d_nchw(out, conv3_w)
    out = _bn_inference(out, *bn3)
    return jnp.maximum(out + x_nchw, 0.0)


# ----------------------------------------------------------------------------
# Deterministic parameter construction
# ----------------------------------------------------------------------------
def make_params(key, inplanes, planes, base_width=64, groups=1):
    expansion = 4
    width = int(planes * (base_width / 64.0)) * groups
    cout = planes * expansion
    keys = jax.random.split(key, 12)

    conv1_w = 0.1 * jax.random.normal(keys[0], (width, inplanes, 1, 1), jnp.float32)
    conv2_w = 0.1 * jax.random.normal(keys[1], (width, width, 3, 3), jnp.float32)
    conv3_w = 0.1 * jax.random.normal(keys[2], (cout, width, 1, 1), jnp.float32)

    def bn(kg, kb, km, kv, c):
        gamma = jax.random.uniform(kg, (c,), jnp.float32, 0.5, 1.5)
        beta = 0.1 * jax.random.normal(kb, (c,), jnp.float32)
        mean = 0.1 * jax.random.normal(km, (c,), jnp.float32)
        var = jax.random.uniform(kv, (c,), jnp.float32, 0.5, 1.5)
        return gamma, beta, mean, var

    bn1 = bn(keys[3], keys[4], keys[5], keys[6], width)
    bn2 = bn(keys[7], keys[8], keys[9], keys[10], width)
    bn3 = bn(keys[11], keys[3], keys[5], keys[7], cout)   # deterministic reuse
    return conv1_w, conv2_w, conv3_w, bn1, bn2, bn3


# ----------------------------------------------------------------------------
if __name__ == "__main__":
    key = jax.random.PRNGKey(0)
    k_x, k_p = jax.random.split(key)

    # Small shapes consistent with the module (inplanes = planes * expansion).
    # H=W=24 with TH=8 gives 3 row tiles per image, exercising top-boundary,
    # interior and bottom-boundary halo paths.
    N, inplanes, planes, H, W = 2, 16, 4, 24, 24
    x_nchw = jax.random.normal(k_x, (N, inplanes, H, W), jnp.float32)

    conv1_w, conv2_w, conv3_w, bn1, bn2, bn3 = make_params(k_p, inplanes, planes)

    out_nchw = bottleneck_forward(x_nchw, conv1_w, conv2_w, conv3_w,
                                  bn1, bn2, bn3)
    out_nchw = jax.block_until_ready(out_nchw)

    # correctness check against pure-JAX NCHW reference (f32).
    # Note: the kernel computes with bf16 operands / bf16 output (the residual
    # add is f32), so the comparison uses a loose tolerance.
    ref = ref_bottleneck(x_nchw, conv1_w, conv2_w, conv3_w, bn1, bn2, bn3)
    max_err = float(jnp.max(jnp.abs(out_nchw - ref)))
    assert jnp.allclose(out_nchw, ref, atol=5e-2, rtol=5e-2), max_err

    print("KERNEL_OK")
</pallas_src>

<mosaic_0001>
module attributes {stable_mosaic.version = 11 : i64} {
  func.func @bottleneck_kernel(%arg0: i32, %arg1: i32, %arg2: memref<1x8x24x128xbf16, #tpu.memory_space<vmem>>, %arg3: memref<1x1x24x128xbf16, #tpu.memory_space<vmem>>, %arg4: memref<1x1x24x128xbf16, #tpu.memory_space<vmem>>, %arg5: memref<128x128xbf16, #tpu.memory_space<vmem>>, %arg6: memref<3x384x128xbf16, #tpu.memory_space<vmem>>, %arg7: memref<128x128xbf16, #tpu.memory_space<vmem>>, %arg8: memref<1x128xf32, #tpu.memory_space<vmem>>, %arg9: memref<1x128xf32, #tpu.memory_space<vmem>>, %arg10: memref<1x128xf32, #tpu.memory_space<vmem>>, %arg11: memref<1x128xf32, #tpu.memory_space<vmem>>, %arg12: memref<1x128xf32, #tpu.memory_space<vmem>>, %arg13: memref<1x128xf32, #tpu.memory_space<vmem>>, %arg14: memref<1x8x24x128xbf16, #tpu.memory_space<vmem>>, %arg15: memref<10x24x128xbf16, #tpu.memory_space<vmem>>, %arg16: memref<10x26x128xbf16, #tpu.memory_space<vmem>>, %arg17: memref<10x24x384xbf16, #tpu.memory_space<vmem>>) attributes {dimension_semantics = [#tpu.dimension_semantics<parallel>, #tpu.dimension_semantics<parallel>], iteration_bounds = array<i64: 2, 3>, scalar_prefetch = 0 : i64, scratch_operands = 3 : i64, tpu.core_type = #tpu.core_type<tc>, window_params = [{transform_indices = @transform_0, window_bounds = array<i64: 1, 8, 24, 128>}, {transform_indices = @transform_1, window_bounds = array<i64: 1, 1, 24, 128>}, {transform_indices = @transform_2, window_bounds = array<i64: 1, 1, 24, 128>}, {pipeline_mode = #tpu.pipeline_mode<synchronous>, transform_indices = @transform_3, window_bounds = array<i64: 128, 128>}, {pipeline_mode = #tpu.pipeline_mode<synchronous>, transform_indices = @transform_4, window_bounds = array<i64: 3, 384, 128>}, {pipeline_mode = #tpu.pipeline_mode<synchronous>, transform_indices = @transform_5, window_bounds = array<i64: 128, 128>}, {pipeline_mode = #tpu.pipeline_mode<synchronous>, transform_indices = @transform_6, window_bounds = array<i64: 1, 128>}, {pipeline_mode = #tpu.pipeline_mode<synchronous>, transform_indices = @transform_7, window_bounds = array<i64: 1, 128>}, {pipeline_mode = #tpu.pipeline_mode<synchronous>, transform_indices = @transform_8, window_bounds = array<i64: 1, 128>}, {pipeline_mode = #tpu.pipeline_mode<synchronous>, transform_indices = @transform_9, window_bounds = array<i64: 1, 128>}, {pipeline_mode = #tpu.pipeline_mode<synchronous>, transform_indices = @transform_10, window_bounds = array<i64: 1, 128>}, {pipeline_mode = #tpu.pipeline_mode<synchronous>, transform_indices = @transform_11, window_bounds = array<i64: 1, 128>}, {transform_indices = @transform_12, window_bounds = array<i64: 1, 8, 24, 128>}]} {
    %c0 = arith.constant 0 : index
    %c0_0 = arith.constant 0 : index
    %c0_1 = arith.constant 0 : index
    %c0_2 = arith.constant 0 : index
    %0 = vector.load %arg2[%c0, %c0_0, %c0_1, %c0_2] : memref<1x8x24x128xbf16, #tpu.memory_space<vmem>>, vector<1x8x24x128xbf16>
    %1 = vector.shape_cast %0 : vector<1x8x24x128xbf16> to vector<8x24x128xbf16>
    %c0_3 = arith.constant 0 : index
    %c0_4 = arith.constant 0 : index
    %c0_5 = arith.constant 0 : index
    %2 = vector.load %arg15[%c0_3, %c0_4, %c0_5] : memref<10x24x128xbf16, #tpu.memory_space<vmem>>, vector<8x24x128xbf16>
    tpu.vector_store %arg15[%c0_3, %c0_4, %c0_5], %1 {strides = array<i32>} : memref<10x24x128xbf16, #tpu.memory_space<vmem>>, vector<8x24x128xbf16>,
    %c0_6 = arith.constant 0 : index
    %c0_7 = arith.constant 0 : index
    %c0_8 = arith.constant 0 : index
    %c0_9 = arith.constant 0 : index
    %3 = vector.load %arg3[%c0_6, %c0_7, %c0_8, %c0_9] : memref<1x1x24x128xbf16, #tpu.memory_space<vmem>>, vector<1x1x24x128xbf16>
    %4 = vector.shape_cast %3 : vector<1x1x24x128xbf16> to vector<1x24x128xbf16>
    %c8 = arith.constant 8 : index
    %c0_10 = arith.constant 0 : index
    %c0_11 = arith.constant 0 : index
    %5 = vector.load %arg15[%c8, %c0_10, %c0_11] : memref<10x24x128xbf16, #tpu.memory_space<vmem>>, vector<1x24x128xbf16>
    tpu.vector_store %arg15[%c8, %c0_10, %c0_11], %4 {strides = array<i32>} : memref<10x24x128xbf16, #tpu.memory_space<vmem>>, vector<1x24x128xbf16>,
    %c0_12 = arith.constant 0 : index
    %c0_13 = arith.constant 0 : index
    %c0_14 = arith.constant 0 : index
    %c0_15 = arith.constant 0 : index
    %6 = vector.load %arg4[%c0_12, %c0_13, %c0_14, %c0_15] : memref<1x1x24x128xbf16, #tpu.memory_space<vmem>>, vector<1x1x24x128xbf16>
    %7 = vector.shape_cast %6 : vector<1x1x24x128xbf16> to vector<1x24x128xbf16>
    %c9 = arith.constant 9 : index
    %c0_16 = arith.constant 0 : index
    %c0_17 = arith.constant 0 : index
    %8 = vector.load %arg15[%c9, %c0_16, %c0_17] : memref<10x24x128xbf16, #tpu.memory_space<vmem>>, vector<1x24x128xbf16>
    tpu.vector_store %arg15[%c9, %c0_16, %c0_17], %7 {strides = array<i32>} : memref<10x24x128xbf16, #tpu.memory_space<vmem>>, vector<1x24x128xbf16>,
    %c0_18 = arith.constant 0 : index
    %c0_19 = arith.constant 0 : index
    %c0_20 = arith.constant 0 : index
    %9 = vector.load %arg15[%c0_18, %c0_19, %c0_20] : memref<10x24x128xbf16, #tpu.memory_space<vmem>>, vector<10x24x128xbf16>
    %10 = vector.shape_cast %9 : vector<10x24x128xbf16> to vector<240x128xbf16>
    %c0_21 = arith.constant 0 : index
    %c0_22 = arith.constant 0 : index
    %11 = vector.load %arg5[%c0_21, %c0_22] : memref<128x128xbf16, #tpu.memory_space<vmem>>, vector<128x128xbf16>
    %cst = arith.constant dense<0.000000e+00> : vector<240x128xf32>
    %12 = tpu.matmul %10, %11, %cst {dimension_numbers = #tpu.dot_dimension_numbers<[1], [0], [0], [1], [0, 0, 1, 1], [], []>} : vector<240x128xbf16>, vector<128x128xbf16>, vector<240x128xf32> -> vector<240x128xf32>
    %c0_23 = arith.constant 0 : index
    %c0_24 = arith.constant 0 : index
    %13 = vector.load %arg8[%c0_23, %c0_24] : memref<1x128xf32, #tpu.memory_space<vmem>>, vector<1x128xf32>
    %14 = vector.broadcast %13 : vector<1x128xf32> to vector<240x128xf32>
    %15 = arith.mulf %12, %14 : vector<240x128xf32>
    %c0_25 = arith.constant 0 : index
    %c0_26 = arith.constant 0 : index
    %16 = vector.load %arg9[%c0_25, %c0_26] : memref<1x128xf32, #tpu.memory_space<vmem>>, vector<1x128xf32>
    %17 = vector.broadcast %16 : vector<1x128xf32> to vector<240x128xf32>
    %18 = arith.addf %15, %17 : vector<240x128xf32>
    %cst_27 = arith.constant 0.000000e+00 : f32
    %19 = vector.broadcast %cst_27 : f32 to vector<240x128xf32>
    %20 = arith.maximumf %18, %19 : vector<240x128xf32>
    %21 = vector.shape_cast %20 : vector<240x128xf32> to vector<10x24x128xf32>
    %22 = arith.truncf %21 : vector<10x24x128xf32> to vector<10x24x128xbf16>
    %c0_28 = arith.constant 0 : index
    %c1 = arith.constant 1 : index
    %c0_29 = arith.constant 0 : index
    %23 = vector.load %arg16[%c0_28, %c1, %c0_29] : memref<10x26x128xbf16, #tpu.memory_space<vmem>>, vector<10x24x128xbf16>
    tpu.vector_store %arg16[%c0_28, %c1, %c0_29], %22 {strides = array<i32>} : memref<10x26x128xbf16, #tpu.memory_space<vmem>>, vector<10x24x128xbf16>,
    %cst_30 = arith.constant 0.000000e+00 : bf16
    %24 = vector.broadcast %cst_30 : bf16 to vector<10x1x128xbf16>
    %c0_31 = arith.constant 0 : index
    %c0_32 = arith.constant 0 : index
    %c0_33 = arith.constant 0 : index
    %25 = vector.load %arg16[%c0_31, %c0_32, %c0_33] : memref<10x26x128xbf16, #tpu.memory_space<vmem>>, vector<10x1x128xbf16>
    tpu.vector_store %arg16[%c0_31, %c0_32, %c0_33], %24 {strides = array<i32>} : memref<10x26x128xbf16, #tpu.memory_space<vmem>>, vector<10x1x128xbf16>,
    %c0_34 = arith.constant 0 : index
    %c25 = arith.constant 25 : index
    %c0_35 = arith.constant 0 : index
    %26 = vector.load %arg16[%c0_34, %c25, %c0_35] : memref<10x26x128xbf16, #tpu.memory_space<vmem>>, vector<10x1x128xbf16>
    tpu.vector_store %arg16[%c0_34, %c25, %c0_35], %24 {strides = array<i32>} : memref<10x26x128xbf16, #tpu.memory_space<vmem>>, vector<10x1x128xbf16>,
    %cst_36 = arith.constant 0.000000e+00 : bf16
    %27 = vector.broadcast %cst_36 : bf16 to vector<1x26x128xbf16>
    %c0_i32 = arith.constant 0 : i32
    %28 = arith.cmpi eq, %arg1, %c0_i32 : i32
    %29 = arith.extui %28 : i1 to i32
    %c0_i32_37 = arith.constant 0 : i32
    %30 = arith.cmpi ne, %29, %c0_i32_37 : i32
    scf.if %30 {
      %c0_95 = arith.constant 0 : index
      %c0_96 = arith.constant 0 : index
      %c0_97 = arith.constant 0 : index
      %85 = vector.load %arg16[%c0_95, %c0_96, %c0_97] : memref<10x26x128xbf16, #tpu.memory_space<vmem>>, vector<1x26x128xbf16>
      tpu.vector_store %arg16[%c0_95, %c0_96, %c0_97], %27 {strides = array<i32>} : memref<10x26x128xbf16, #tpu.memory_space<vmem>>, vector<1x26x128xbf16>,
    } else {
    }
    %c2_i32 = arith.constant 2 : i32
    %31 = arith.cmpi eq, %arg1, %c2_i32 : i32
    %32 = arith.extui %31 : i1 to i32
    %c0_i32_38 = arith.constant 0 : i32
    %33 = arith.cmpi ne, %32, %c0_i32_38 : i32
    scf.if %33 {
      %c9_95 = arith.constant 9 : index
      %c0_96 = arith.constant 0 : index
      %c0_97 = arith.constant 0 : index
      %85 = vector.load %arg16[%c9_95, %c0_96, %c0_97] : memref<10x26x128xbf16, #tpu.memory_space<vmem>>, vector<1x26x128xbf16>
      tpu.vector_store %arg16[%c9_95, %c0_96, %c0_97], %27 {strides = array<i32>} : memref<10x26x128xbf16, #tpu.memory_space<vmem>>, vector<1x26x128xbf16>,
    } else {
    }
    %c0_39 = arith.constant 0 : index
    %c0_40 = arith.constant 0 : index
    %c0_41 = arith.constant 0 : index
    %34 = vector.load %arg16[%c0_39, %c0_40, %c0_41] : memref<10x26x128xbf16, #tpu.memory_space<vmem>>, vector<10x24x128xbf16>
    %c0_42 = arith.constant 0 : index
    %c0_43 = arith.constant 0 : index
    %c0_44 = arith.constant 0 : index
    %35 = vector.load %arg17[%c0_42, %c0_43, %c0_44] : memref<10x24x384xbf16, #tpu.memory_space<vmem>>, vector<10x24x128xbf16>
    tpu.vector_store %arg17[%c0_42, %c0_43, %c0_44], %34 {strides = array<i32>} : memref<10x24x384xbf16, #tpu.memory_space<vmem>>, vector<10x24x128xbf16>,
    %c0_45 = arith.constant 0 : index
    %c1_46 = arith.constant 1 : index
    %c0_47 = arith.constant 0 : index
    %36 = vector.load %arg16[%c0_45, %c1_46, %c0_47] : memref<10x26x128xbf16, #tpu.memory_space<vmem>>, vector<10x24x128xbf16>
    %c0_48 = arith.constant 0 : index
    %c0_49 = arith.constant 0 : index
    %c128 = arith.constant 128 : index
    %37 = vector.load %arg17[%c0_48, %c0_49, %c128] : memref<10x24x384xbf16, #tpu.memory_space<vmem>>, vector<10x24x128xbf16>
    tpu.vector_store %arg17[%c0_48, %c0_49, %c128], %36 {strides = array<i32>} : memref<10x24x384xbf16, #tpu.memory_space<vmem>>, vector<10x24x128xbf16>,
    %c0_50 = arith.constant 0 : index
    %c2 = arith.constant 2 : index
    %c0_51 = arith.constant 0 : index
    %38 = vector.load %arg16[%c0_50, %c2, %c0_51] : memref<10x26x128xbf16, #tpu.memory_space<vmem>>, vector<10x24x128xbf16>
    %c0_52 = arith.constant 0 : index
    %c0_53 = arith.constant 0 : index
    %c256 = arith.constant 256 : index
    %39 = vector.load %arg17[%c0_52, %c0_53, %c256] : memref<10x24x384xbf16, #tpu.memory_space<vmem>>, vector<10x24x128xbf16>
    tpu.vector_store %arg17[%c0_52, %c0_53, %c256], %38 {strides = array<i32>} : memref<10x24x384xbf16, #tpu.memory_space<vmem>>, vector<10x24x128xbf16>,
    %c0_54 = arith.constant 0 : index
    %c0_55 = arith.constant 0 : index
    %c0_56 = arith.constant 0 : index
    %40 = vector.load %arg17[%c0_54, %c0_55, %c0_56] : memref<10x24x384xbf16, #tpu.memory_space<vmem>>, vector<8x24x384xbf16>
    %41 = vector.shape_cast %40 : vector<8x24x384xbf16> to vector<192x384xbf16>
    %c0_57 = arith.constant 0 : index
    %c0_58 = arith.constant 0 : index
    %c0_59 = arith.constant 0 : index
    %42 = vector.load %arg6[%c0_57, %c0_58, %c0_59] : memref<3x384x128xbf16, #tpu.memory_space<vmem>>, vector<1x384x128xbf16>
    %43 = vector.shape_cast %42 : vector<1x384x128xbf16> to vector<384x128xbf16>
    %cst_60 = arith.constant dense<0.000000e+00> : vector<192x128xf32>
    %44 = tpu.matmul %41, %43, %cst_60 {dimension_numbers = #tpu.dot_dimension_numbers<[1], [0], [0], [1], [0, 0, 1, 1], [], []>} : vector<192x384xbf16>, vector<384x128xbf16>, vector<192x128xf32> -> vector<192x128xf32>
    %c1_61 = arith.constant 1 : index
    %c0_62 = arith.constant 0 : index
    %c0_63 = arith.constant 0 : index
    %45 = vector.load %arg17[%c1_61, %c0_62, %c0_63] : memref<10x24x384xbf16, #tpu.memory_space<vmem>>, vector<8x24x384xbf16>
    %46 = vector.shape_cast %45 : vector<8x24x384xbf16> to vector<192x384xbf16>
    %c1_64 = arith.constant 1 : index
    %c0_65 = arith.constant 0 : index
    %c0_66 = arith.constant 0 : index
    %47 = vector.load %arg6[%c1_64, %c0_65, %c0_66] : memref<3x384x128xbf16, #tpu.memory_space<vmem>>, vector<1x384x128xbf16>
    %48 = vector.shape_cast %47 : vector<1x384x128xbf16> to vector<384x128xbf16>
    %cst_67 = arith.constant dense<0.000000e+00> : vector<192x128xf32>
    %49 = tpu.matmul %46, %48, %cst_67 {dimension_numbers = #tpu.dot_dimension_numbers<[1], [0], [0], [1], [0, 0, 1, 1], [], []>} : vector<192x384xbf16>, vector<384x128xbf16>, vector<192x128xf32> -> vector<192x128xf32>
    %50 = arith.addf %44, %49 : vector<192x128xf32>
    %c2_68 = arith.constant 2 : index
    %c0_69 = arith.constant 0 : index
    %c0_70 = arith.constant 0 : index
    %51 = vector.load %arg17[%c2_68, %c0_69, %c0_70] : memref<10x24x384xbf16, #tpu.memory_space<vmem>>, vector<8x24x384xbf16>
    %52 = vector.shape_cast %51 : vector<8x24x384xbf16> to vector<192x384xbf16>
    %c2_71 = arith.constant 2 : index
    %c0_72 = arith.constant 0 : index
    %c0_73 = arith.constant 0 : index
    %53 = vector.load %arg6[%c2_71, %c0_72, %c0_73] : memref<3x384x128xbf16, #tpu.memory_space<vmem>>, vector<1x384x128xbf16>
    %54 = vector.shape_cast %53 : vector<1x384x128xbf16> to vector<384x128xbf16>
    %cst_74 = arith.constant dense<0.000000e+00> : vector<192x128xf32>
    %55 = tpu.matmul %52, %54, %cst_74 {dimension_numbers = #tpu.dot_dimension_numbers<[1], [0], [0], [1], [0, 0, 1, 1], [], []>} : vector<192x384xbf16>, vector<384x128xbf16>, vector<192x128xf32> -> vector<192x128xf32>
    %56 = arith.addf %50, %55 : vector<192x128xf32>
    %c0_75 = arith.constant 0 : index
    %c0_76 = arith.constant 0 : index
    %57 = vector.load %arg10[%c0_75, %c0_76] : memref<1x128xf32, #tpu.memory_space<vmem>>, vector<1x128xf32>
    %58 = vector.broadcast %57 : vector<1x128xf32> to vector<192x128xf32>
    %59 = arith.mulf %56, %58 : vector<192x128xf32>
    %c0_77 = arith.constant 0 : index
    %c0_78 = arith.constant 0 : index
    %60 = vector.load %arg11[%c0_77, %c0_78] : memref<1x128xf32, #tpu.memory_space<vmem>>, vector<1x128xf32>
    %61 = vector.broadcast %60 : vector<1x128xf32> to vector<192x128xf32>
    %62 = arith.addf %59, %61 : vector<192x128xf32>
    %cst_79 = arith.constant 0.000000e+00 : f32
    %63 = vector.broadcast %cst_79 : f32 to vector<192x128xf32>
    %64 = arith.maximumf %62, %63 : vector<192x128xf32>
    %65 = arith.truncf %64 : vector<192x128xf32> to vector<192x128xbf16>
    %c0_80 = arith.constant 0 : index
    %c0_81 = arith.constant 0 : index
    %66 = vector.load %arg7[%c0_80, %c0_81] : memref<128x128xbf16, #tpu.memory_space<vmem>>, vector<128x128xbf16>
    %cst_82 = arith.constant dense<0.000000e+00> : vector<192x128xf32>
    %67 = tpu.matmul %65, %66, %cst_82 {dimension_numbers = #tpu.dot_dimension_numbers<[1], [0], [0], [1], [0, 0, 1, 1], [], []>} : vector<192x128xbf16>, vector<128x128xbf16>, vector<192x128xf32> -> vector<192x128xf32>
    %c0_83 = arith.constant 0 : index
    %c0_84 = arith.constant 0 : index
    %68 = vector.load %arg12[%c0_83, %c0_84] : memref<1x128xf32, #tpu.memory_space<vmem>>, vector<1x128xf32>
    %69 = vector.broadcast %68 : vector<1x128xf32> to vector<192x128xf32>
    %70 = arith.mulf %67, %69 : vector<192x128xf32>
    %c0_85 = arith.constant 0 : index
    %c0_86 = arith.constant 0 : index
    %71 = vector.load %arg13[%c0_85, %c0_86] : memref<1x128xf32, #tpu.memory_space<vmem>>, vector<1x128xf32>
    %72 = vector.broadcast %71 : vector<1x128xf32> to vector<192x128xf32>
    %73 = arith.addf %70, %72 : vector<192x128xf32>
    %c1_87 = arith.constant 1 : index
    %c0_88 = arith.constant 0 : index
    %c0_89 = arith.constant 0 : index
    %74 = vector.load %arg15[%c1_87, %c0_88, %c0_89] : memref<10x24x128xbf16, #tpu.memory_space<vmem>>, vector<8x24x128xbf16>
    %75 = vector.shape_cast %74 : vector<8x24x128xbf16> to vector<192x128xbf16>
    %76 = arith.extf %75 : vector<192x128xbf16> to vector<192x128xf32>
    %77 = arith.addf %73, %76 : vector<192x128xf32>
    %cst_90 = arith.constant 0.000000e+00 : f32
    %78 = vector.broadcast %cst_90 : f32 to vector<192x128xf32>
    %79 = arith.maximumf %77, %78 : vector<192x128xf32>
    %80 = vector.shape_cast %79 : vector<192x128xf32> to vector<8x24x128xf32>
    %81 = arith.truncf %80 : vector<8x24x128xf32> to vector<8x24x128xbf16>
    %c0_91 = arith.constant 0 : index
    %c0_92 = arith.constant 0 : index
    %c0_93 = arith.constant 0 : index
    %c0_94 = arith.constant 0 : index
    %82 = vector.load %arg14[%c0_91, %c0_92, %c0_93, %c0_94] : memref<1x8x24x128xbf16, #tpu.memory_space<vmem>>, vector<1x8x24x128xbf16>
    %83 = vector.shape_cast %82 : vector<1x8x24x128xbf16> to vector<8x24x128xbf16>
    %84 = vector.shape_cast %81 : vector<8x24x128xbf16> to vector<1x8x24x128xbf16>
    tpu.vector_store %arg14[%c0_91, %c0_92, %c0_93, %c0_94], %84 {strides = array<i32>} : memref<1x8x24x128xbf16, #tpu.memory_space<vmem>>, vector<1x8x24x128xbf16>,
    return
  }
  func.func @transform_0(%arg0: i32, %arg1: i32) -> (i32, i32, i32, i32) {
    %c0_i32 = arith.constant 0 : i32
    %c0_i32_0 = arith.constant 0 : i32
    %c0_i32_1 = arith.constant 0 : i32
    return %arg0, %arg1, %c0_i32, %c0_i32_0 : i32, i32, i32, i32
  }
  func.func @transform_1(%arg0: i32, %arg1: i32) -> (i32, i32, i32, i32) {
    %c1_i32 = arith.constant 1 : i32
    %0 = arith.addi %arg1, %c1_i32 : i32
    %c8_i32 = arith.constant 8 : i32
    %1 = arith.muli %0, %c8_i32 : i32
    %c0_i32 = arith.constant 0 : i32
    %c0_i32_0 = arith.constant 0 : i32
    %c0_i32_1 = arith.constant 0 : i32
    return %arg0, %1, %c0_i32, %c0_i32_0 : i32, i32, i32, i32
  }
  func.func @transform_2(%arg0: i32, %arg1: i32) -> (i32, i32, i32, i32) {
    %c1_i32 = arith.constant 1 : i32
    %0 = arith.addi %arg1, %c1_i32 : i32
    %c8_i32 = arith.constant 8 : i32
    %1 = arith.muli %0, %c8_i32 : i32
    %c1_i32_0 = arith.constant 1 : i32
    %2 = arith.addi %1, %c1_i32_0 : i32
    %c0_i32 = arith.constant 0 : i32
    %c0_i32_1 = arith.constant 0 : i32
    %c0_i32_2 = arith.constant 0 : i32
    return %arg0, %2, %c0_i32, %c0_i32_1 : i32, i32, i32, i32
  }
  func.func @transform_3(%arg0: i32, %arg1: i32) -> (i32, i32) {
    %c0_i32 = arith.constant 0 : i32
    %c0_i32_0 = arith.constant 0 : i32
    %c0_i32_1 = arith.constant 0 : i32
    return %c0_i32, %c0_i32_0 : i32, i32
  }
  func.func @transform_4(%arg0: i32, %arg1: i32) -> (i32, i32, i32) {
    %c0_i32 = arith.constant 0 : i32
    %c0_i32_0 = arith.constant 0 : i32
    %c0_i32_1 = arith.constant 0 : i32
    %c0_i32_2 = arith.constant 0 : i32
    return %c0_i32, %c0_i32_0, %c0_i32_1 : i32, i32, i32
  }
  func.func @transform_5(%arg0: i32, %arg1: i32) -> (i32, i32) {
    %c0_i32 = arith.constant 0 : i32
    %c0_i32_0 = arith.constant 0 : i32
    %c0_i32_1 = arith.constant 0 : i32
    return %c0_i32, %c0_i32_0 : i32, i32
  }
  func.func @transform_6(%arg0: i32, %arg1: i32) -> (i32, i32) {
    %c0_i32 = arith.constant 0 : i32
    %c0_i32_0 = arith.constant 0 : i32
    %c0_i32_1 = arith.constant 0 : i32
    return %c0_i32, %c0_i32_0 : i32, i32
  }
  func.func @transform_7(%arg0: i32, %arg1: i32) -> (i32, i32) {
    %c0_i32 = arith.constant 0 : i32
    %c0_i32_0 = arith.constant 0 : i32
    %c0_i32_1 = arith.constant 0 : i32
    return %c0_i32, %c0_i32_0 : i32, i32
  }
  func.func @transform_8(%arg0: i32, %arg1: i32) -> (i32, i32) {
    %c0_i32 = arith.constant 0 : i32
    %c0_i32_0 = arith.constant 0 : i32
    %c0_i32_1 = arith.constant 0 : i32
    return %c0_i32, %c0_i32_0 : i32, i32
  }
  func.func @transform_9(%arg0: i32, %arg1: i32) -> (i32, i32) {
    %c0_i32 = arith.constant 0 : i32
    %c0_i32_0 = arith.constant 0 : i32
    %c0_i32_1 = arith.constant 0 : i32
    return %c0_i32, %c0_i32_0 : i32, i32
  }
  func.func @transform_10(%arg0: i32, %arg1: i32) -> (i32, i32) {
    %c0_i32 = arith.constant 0 : i32
    %c0_i32_0 = arith.constant 0 : i32
    %c0_i32_1 = arith.constant 0 : i32
    return %c0_i32, %c0_i32_0 : i32, i32
  }
  func.func @transform_11(%arg0: i32, %arg1: i32) -> (i32, i32) {
    %c0_i32 = arith.constant 0 : i32
    %c0_i32_0 = arith.constant 0 : i32
    %c0_i32_1 = arith.constant 0 : i32
    return %c0_i32, %c0_i32_0 : i32, i32
  }
  func.func @transform_12(%arg0: i32, %arg1: i32) -> (i32, i32, i32, i32) {
    %c0_i32 = arith.constant 0 : i32
    %c0_i32_0 = arith.constant 0 : i32
    %c0_i32_1 = arith.constant 0 : i32
    return %arg0, %arg1, %c0_i32, %c0_i32_0 : i32, i32, i32, i32
  }
}

</mosaic_0001>

<bundles_post_ra>
// kernel: bottleneck_forward.1
= control target key start
LH: loop header
LB: loop body
LE: loop exit
PB: predicated region body
PF: predicated region fallthrough
CT: control target
= control target key end

     0   :  { %s6906_s21 = smov 0   ;;  %s6908_s22 = smov 0   ;;  %s8147_s0 = inlined_call_operand.vmem [shape: bf16[2,26,24,128], index: 0, kind: input, shape index: {}, may-alias: {0,1,2}]   ;;  %s8148_s1 = inlined_call_operand.vmem [shape: bf16[2,26,24,128], index: 1, kind: input, shape index: {}, may-alias: {0,1,2}]   ;;  %s8149_s2 = inlined_call_operand.vmem [shape: bf16[2,26,24,128], index: 2, kind: input, shape index: {}, may-alias: {0,1,2}]   ;;  %s8150_s3 = inlined_call_operand.vmem [shape: bf16[128,128], index: 3, kind: input, shape index: {}]   ;;  %s8151_s4 = inlined_call_operand.vmem [shape: bf16[3,384,128], index: 4, kind: input, shape index: {}]   ;;  %s8152_s5 = inlined_call_operand.vmem [shape: bf16[128,128], index: 5, kind: input, shape index: {}]   ;;  %s8153_s6 = inlined_call_operand.vmem [shape: f32[1,128], index: 6, kind: input, shape index: {}]   ;;  %s8154_s7 = inlined_call_operand.vmem [shape: f32[1,128], index: 7, kind: input, shape index: {}]   ;;  %s8155_s8 = inlined_call_operand.vmem [shape: f32[1,128], index: 8, kind: input, shape index: {}]   ;;  %s8156_s9 = inlined_call_operand.vmem [shape: f32[1,128], index: 9, kind: input, shape index: {}]   ;;  %s8157_s10 = inlined_call_operand.vmem [shape: f32[1,128], index: 10, kind: input, shape index: {}]   ;;  %s8158_s11 = inlined_call_operand.vmem [shape: f32[1,128], index: 11, kind: input, shape index: {}]   ;;  %s8159_s12 = inlined_call_operand.vmem [shape: bf16[2,24,24,128], index: 12, kind: output, shape index: {}]  }
   0x1   :  { %8161 = sst [smem:[#allocation8_spill]] %s8147_s0  ;;  %s6910_s23 = smov 0  }
   0x2   :  { %s6912_s24 = smov 0   ;;  %s6914_s25 = smov 0  }
   0x3 LB: > { %8162 = sst [smem:[#allocation5_spill]] %s6831_s24  ;;  %s31_s26 = sadd.s32 1, %s6827_s23  ;;  %s6835_s25 = sphi %s6914_s25, %s22_s25   ;;  %s6831_s24 = sphi %s6912_s24, %s8183_s24   ;;  %s6827_s23 = sphi %s6910_s23, %s8182_s23   ;;  %s6823_s22 = sphi %s6908_s22, %s8178_s22   ;;  %s6819_s21 = sphi %s6906_s21, %s8181_s21  }
   0x4   : > { %s34_s27 = sadd.s32 1, %s6831_s24  ;;  %p32_p0 = scmp.ge.s32.totalorder %s31_s26, 3 }
   0x5   : > { %p5227_p1 = scmp.ge.s32.totalorder %s6835_s25, 1  ;;  %p446_p2 = scmp.lt.s32.totalorder %s6835_s25, 7 }
   0x6   : > { %s8185_s26 = smov (%p32_p0, %s31_s26), 0  ;;  %s8187_s27 = smov (!%p32_p0, %s34_s27), %s6831_s24 }
   0x7   : > { %8163 = sst [smem:[#allocation6_spill]] %s8185_s26  ;;  %p447_p3 = pnand %p5227_p1, %p446_p2 }
   0x8   : > { %p36_p4 = scmp.ge.s32.totalorder %s8187_s27, 2  ;;  %v6598_v0 = vld [vmem:[%s8150_s3] sm:$0xff] (!%p447_p3)   ;;  %v6837_v1 = vmov (!%p447_p3), 0.0   ;;  %v6599_v2 = vld [vmem:[%s8150_s3 + $0x8] sm:$0xff] (!%p447_p3)   ;;  %vm6838_vm0 = vmmov (!%p447_p3), 0   ;;  %s5228_s14 = sshll.u32 (!%p447_p3), %s6819_s21, 3 }
   0x9   : > { %450 = sbr.rel (%p447_p3) target bundleno = 1192 (0x4a8), region = 68  ;;  %6176 = vmatprep.subr.bf16.mxu0 (!%p447_p3), %v6837_v1  ;;  %6192 = vmatprep.mubr.msk.bf16.mxu0 (!%p447_p3), %vm6838_vm0, %v6837_v1  ;;  %p532_p5 = scmp.lt.s32.totalorder (!%p447_p3), %s6823_s22, 1  ;;  %v6600_v3 = vld [vmem:[%s8150_s3 + $0x10] sm:$0xff] (!%p447_p3)   ;;  %v6601_v4 = vld [vmem:[%s8150_s3 + $0x18] sm:$0xff] (!%p447_p3)   ;;  %v6602_v5 = vld [vmem:[%s8150_s3 + $0x20] sm:$0xff] (!%p447_p3)   ;;  %vm1493_vm1 = vcmask (!%p447_p3), 1043456  }
   0xa   : > { %s8189_s27 = smov (%p36_p4, %s8187_s27), 0  ;;  %6177 = vmatpush3.bf16.msra.mxu0 (!%p447_p3), %v6598_v0  ;;  %p534_p6 = scmp.lt.s32.totalorder (!%p447_p3), %s5228_s14, 25  ;;  %v6603_v18 = vld [vmem:[%s8150_s3 + $0x28] sm:$0xff] (!%p447_p3)   ;;  %v6604_v19 = vld [vmem:[%s8150_s3 + $0x30] sm:$0xff] (!%p447_p3)   ;;  %v6605_v20 = vld [vmem:[%s8150_s3 + $0x38] sm:$0xff] (!%p447_p3)   ;;  %vm1501_vm7 = vcmask (!%p447_p3), 1040384  }
   0xb   : > { %8164 = sst [smem:[#allocation7_spill]] %s8189_s27  ;;  %6178 = vmatprep.subr.bf16.mxu0 (!%p447_p3), %v6837_v1  ;;  %p578_p7 = scmp.lt.s32.totalorder (!%p447_p3), %s5228_s14, 23  ;;  %v7036_v40 = vld [vmem:[%s8153_s6] ss:$0 sm:$0xff] (!%p447_p3)  ;;  %vm1494_vm2 = vsmask.f32 (!%p447_p3), 7938 }
   0xc   : > { %s6958_s20 = sadd.s32 (!%p447_p3), 8, %s5228_s14  ;;  %s8165_s0 = sld [smem:[#allocation8_spill]] (!%p447_p3)  ;;  %v7041_v42 = vld [vmem:[%s8154_s7] ss:$0 sm:$0xff] (!%p447_p3)  ;;  %vm1190_vm3 = vsmask.f32 (!%p447_p3), 256  ;;  %vm7051_vm5 = vmand (!%p447_p3), %vm1493_vm1, %vm1494_vm2 }
   0xd   : > { %p551_p8 = scmp.lt.s32.totalorder (!%p447_p3), %s6958_s20, 25  ;;  %s562_s27 = sadd.s32 (!%p447_p3), 1, %s6958_s20  ;;  %vm1191_vm4 = vsmask.f32 (!%p447_p3), 4368  ;;  %vm7071_vm8 = vmand (!%p447_p3), %vm1501_vm7, %vm1190_vm3 }
   0xe   : > { %6179 = vmatpush3.bf16.msra.mxu0 (!%p447_p3), %v6599_v2  ;;  %p565_p9 = scmp.lt.s32.totalorder (!%p447_p3), %s562_s27, 25  ;;  %vm7057_vm6 = vmor (!%p447_p3), %vm1190_vm3, %vm1191_vm4  ;;  %p5291_p10 = scmp.ne.s32.totalorder (!%p447_p3), %s6819_s21, 0 }
   0xf   : > { %6180 = vmatprep.subr.bf16.mxu0 (!%p447_p3), %v6837_v1  ;;  %vm7089_vm9 = vmand (!%p447_p3), %vm1501_vm7, %vm1494_vm2 }
  0x10   : > { %s8191_s22 = smov (!%p532_p5, %s6823_s22), 1  ;;  %s8195_s20 = smov (!%p551_p8, %s6958_s20), 25 }
  0x11   : > { %s535_s17 = scalar_select %p534_p6, %s5228_s14, 25 }
  0x12   : > { %s6956_s18 = smul.u32 78, %s8191_s22  ;;  %6181 = vmatpush3.bf16.msra.mxu0 %v6600_v3  ;;  %s8193_s14 = smov (!%p578_p7, %s5228_s14), 23 }
  0x13   : > { %s6548_s19 = smul.u32 3, %s535_s17  ;;  %6182 = vmatprep.subr.bf16.mxu0 %v6837_v1  ;;  %s8197_s27 = smov (!%p565_p9, %s562_s27), 25 }
  0x14   : > { %s6553_s15 = smul.u32 72, %s8191_s22 }
  0x15   : > { %s538_s30 = sadd.s32 %s6956_s18, %s6548_s19  ;;  %s6552_s26 = smul.u32 3, %s8193_s14 }
  0x16   : > { %s5229_s13 = sshll.u32 %s538_s30, 2  ;;  %6183 = vmatpush3.bf16.msra.mxu0 %v6601_v4  ;;  %s6550_s22 = smul.u32 3, %s8195_s20 }
  0x17   : > { %s540_s24 = scalar_lea.vmem %s8165_s0, %s5229_s13  ;;  %6184 = vmatprep.subr.bf16.mxu0 %v6837_v1  ;;  %s582_s19 = sadd.s32 %s6553_s15, %s6552_s26 }
  0x18   : > { %v587_v6 = vld [vmem:[%s540_s24] sm:$0xff]   ;;  %v589_v7 = vld [vmem:[%s540_s24 + $0x8] sm:$0xff]   ;;  %v591_v8 = vld [vmem:[%s540_s24 + $0x10] sm:$0xff]   ;;  %s5235_s29 = sshll.u32 %s582_s19, 2  ;;  %s6551_s17 = smul.u32 3, %s8197_s27 }
  0x19   : > { %611 = vst [vmem:[#allocation2] sm:$0xff] %v587_v6   ;;  %613 = vst [vmem:[#allocation2 + $0x8] sm:$0xff] %v589_v7   ;;  %v593_v9 = vld [vmem:[%s540_s24 + $0x18] sm:$0xff]   ;;  %v595_v10 = vld [vmem:[%s540_s24 + $0x20] sm:$0xff]   ;;  %s6987_s13 = scalar_lea.vmem %s8159_s12, %s5235_s29  ;;  %s555_s26 = sadd.s32 %s6550_s22, %s6956_s18  ;;  %v6839_v7 = vmov (!%p5291_p10), 0  }
  0x1a   : > { %615 = vst [vmem:[#allocation2 + $0x10] sm:$0xff] %v591_v8   ;;  %v597_v11 = vld [vmem:[%s540_s24 + $0x28] sm:$0xff]   ;;  %617 = vst [vmem:[#allocation2 + $0x18] sm:$0xff] %v593_v9   ;;  %v599_v12 = vld [vmem:[%s540_s24 + $0x30] sm:$0xff]   ;;  %6185 = vmatpush3.bf16.msra.mxu0 %v6602_v5  ;;  %s569_s14 = sadd.s32 %s6551_s17, %s6956_s18  ;;  %s5231_s29 = sshll.u32 %s555_s26, 2 }
  0x1b   : > { %619 = vst [vmem:[#allocation2 + $0x20] sm:$0xff] %v595_v10   ;;  %621 = vst [vmem:[#allocation2 + $0x28] sm:$0xff] %v597_v11   ;;  %v601_v13 = vld [vmem:[%s540_s24 + $0x38] sm:$0xff]   ;;  %v603_v14 = vld [vmem:[%s540_s24 + $0x40] sm:$0xff]   ;;  %6186 = vmatprep.subr.bf16.mxu0 %v6837_v1  ;;  %s5233_s20 = sshll.u32 %s569_s14, 2  ;;  %s557_s15 = scalar_lea.vmem %s8148_s1, %s5231_s29 }
  0x1c   : > { %623 = vst [vmem:[#allocation2 + $0x30] sm:$0xff] %v599_v12   ;;  %625 = vst [vmem:[#allocation2 + $0x38] sm:$0xff] %v601_v13   ;;  %v605_v15 = vld [vmem:[%s540_s24 + $0x48] sm:$0xff]   ;;  %v607_v16 = vld [vmem:[%s540_s24 + $0x50] sm:$0xff]   ;;  %s571_s27 = scalar_lea.vmem %s8149_s2, %s5233_s20 }
  0x1d   : > { %627 = vst [vmem:[#allocation2 + $0x40] sm:$0xff] %v603_v14   ;;  %v609_v17 = vld [vmem:[%s540_s24 + $0x58] sm:$0xff]   ;;  %629 = vst [vmem:[#allocation2 + $0x48] sm:$0xff] %v605_v15   ;;  %v635_v22 = vld [vmem:[%s557_s15] sm:$0xff]  }
  0x1e   : > { %631 = vst [vmem:[#allocation2 + $0x50] sm:$0xff] %v607_v16   ;;  %633 = vst [vmem:[#allocation2 + $0x58] sm:$0xff] %v609_v17   ;;  %6187 = vmatpush3.bf16.msra.mxu0 %v6603_v18  ;;  %v637_v23 = vld [vmem:[%s557_s15 + $0x8] sm:$0xf]  ;;  %v642_v24 = vld [vmem:[%s571_s27] sm:$0xff]  }
  0x1f   : > { %6188 = vmatprep.subr.bf16.mxu0 %v6837_v1  ;;  %639 = vst [vmem:[#allocation2 + $0x60] sm:$0xff] %v635_v22   ;;  %641 = vst [vmem:[#allocation2 + $0x68] sm:$0xf] %v637_v23  ;;  %v644_v25 = vld [vmem:[%s571_s27 + $0x8] sm:$0xf] }
  0x20   : > { %v6606_v21 = vld [vmem:[#allocation2] sm:$0xff]   ;;  %646 = vst [vmem:[#allocation2 + $0x6c] sm:$0xff] %v642_v24   ;;  %648 = vst [vmem:[#allocation2 + $0x74] sm:$0xf] %v644_v25  ;;  %v6607_v26 = vld [vmem:[#allocation2 + $0x8] sm:$0xff]  }
  0x21   : > { %v6608_v27 = vld [vmem:[#allocation2 + $0x10] sm:$0xff]   ;;  %v6609_v28 = vld [vmem:[#allocation2 + $0x18] sm:$0xff]  }
  0x22   : > { %6189 = vmatpush3.bf16.msra.mxu0 %v6604_v19  ;;  %v6610_v29 = vld [vmem:[#allocation2 + $0x20] sm:$0xff]   ;;  %v6611_v30 = vld [vmem:[#allocation2 + $0x28] sm:$0xff]  }
  0x23   : > { %6190 = vmatprep.subr.bf16.mxu0 %v6837_v1  ;;  %v6612_v31 = vld [vmem:[#allocation2 + $0x30] sm:$0xff]   ;;  %v6613_v32 = vld [vmem:[#allocation2 + $0x38] sm:$0xff]  }
  0x24   : > { %v6614_v33 = vld [vmem:[#allocation2 + $0x40] sm:$0xff]   ;;  %v6615_v34 = vld [vmem:[#allocation2 + $0x48] sm:$0xff]  }
  0x25   : > { %v6616_v35 = vld [vmem:[#allocation2 + $0x50] sm:$0xff]   ;;  %v6617_v36 = vld [vmem:[#allocation2 + $0x58] sm:$0xff]  }
  0x26   : > { %6191 = vmatpush3.bf16.msra.mxu0 %v6605_v20  ;;  %v6618_v37 = vld [vmem:[#allocation2 + $0x60] sm:$0xff]  }
  0x27   : > { %v6619_v38 = vld [vmem:[#allocation2 + $0x68] sm:$0xff]   ;;  %v6620_v39 = vld [vmem:[#allocation2 + $0x70] sm:$0xff]  }
  0x29   : > { %6193 = vmatmul.mubr.bf16.vlgmr.msra.gmra.mrb[0].mxu0 %v6606_v21 }
  0x2a   : > { %6196 = vmatprep.mubr.msk.bf16.mxu0 %vm6838_vm0, %v6837_v1 }
  0x31   : > { %6197 = vmatmul.mubr.bf16.gmra.mrb[4].mxu0 %v6607_v26 }
  0x32   : > { %6200 = vmatprep.mubr.msk.bf16.mxu0 %vm6838_vm0, %v6837_v1 }
  0x39   : > { %6201 = vmatmul.mubr.bf16.gmra.mrb[8].mxu0 %v6608_v27 }
  0x3a   : > { %6204 = vmatprep.mubr.msk.bf16.mxu0 %vm6838_vm0, %v6837_v1 }
  0x41   : > { %6205 = vmatmul.mubr.bf16.gmra.mrb[12].mxu0 %v6609_v28  ;;  %v1503_v28 = vld [vmem:[#allocation3 + $0xc] sm:$0x1] }
  0x42   : > { %6208 = vmatprep.mubr.msk.bf16.mxu0 %vm6838_vm0, %v6837_v1 }
  0x49   : > { %6209 = vmatmul.mubr.bf16.gmra.mrb[16].mxu0 %v6610_v29 }
  0x4a   : > { %6212 = vmatprep.mubr.msk.bf16.mxu0 %vm6838_vm0, %v6837_v1 }
  0x51   : > { %6213 = vmatmul.mubr.bf16.gmra.mrb[20].mxu0 %v6611_v30 }
  0x52   : > { %6216 = vmatprep.mubr.msk.bf16.mxu0 %vm6838_vm0, %v6837_v1 }
  0x59   : > { %6217 = vmatmul.mubr.bf16.gmra.mrb[24].mxu0 %v6612_v31 }
  0x5a   : > { %6220 = vmatprep.mubr.msk.bf16.mxu0 %vm6838_vm0, %v6837_v1 }
  0x61   : > { %6221 = vmatmul.mubr.bf16.gmra.mrb[28].mxu0 %v6613_v32 }
  0x62   : > { %6224 = vmatprep.mubr.msk.bf16.mxu0 %vm6838_vm0, %v6837_v1 }
  0x69   : > { %6225 = vmatmul.mubr.bf16.gmra.mrb[32].mxu0 %v6614_v33 }
  0x6a   : > { %6228 = vmatprep.mubr.msk.bf16.mxu0 %vm6838_vm0, %v6837_v1 }
  0x71   : > { %6229 = vmatmul.mubr.bf16.gmra.mrb[36].mxu0 %v6615_v34 }
  0x72   : > { %6232 = vmatprep.mubr.msk.bf16.mxu0 %vm6838_vm0, %v6837_v1 }
  0x79   : > { %6233 = vmatmul.mubr.bf16.gmra.mrb[40].mxu0 %v6616_v35 }
  0x7a   : > { %6236 = vmatprep.mubr.msk.bf16.mxu0 %vm6838_vm0, %v6837_v1 }
  0x81   : > { %6237 = vmatmul.mubr.bf16.gmra.mrb[44].mxu0 %v6617_v36 }
  0x82   : > { %6240 = vmatprep.mubr.msk.bf16.mxu0 %vm6838_vm0, %v6837_v1 }
  0x89   : > { %6241 = vmatmul.mubr.bf16.gmra.mrb[48].mxu0 %v6618_v37 }
  0x8a   : > { %6244 = vmatprep.mubr.msk.bf16.mxu0 %vm6838_vm0, %v6837_v1 }
  0x91   : > { %6245 = vmatmul.mubr.bf16.gmra.mrb[52].mxu0 %v6619_v38 }
  0x92   : > { %6248 = vmatprep.mubr.msk.bf16.mxu0 %vm6838_vm0, %v6837_v1  ;;  %v1496_v1 = vld [vmem:[#allocation3] sm:$0xf] }
  0x99   : > { %6249 = vmatmul.mubr.bf16.gmra.mrb[56].mxu0 %v6620_v39  ;;  %v1506_v39 = vld [vmem:[#allocation3 + $0x10] sm:$0xf] }
  0xfc   : > { %v867_v41 = vpop.f32.mrb[0].mxu0 }
  0xfd   : > { %v993_v43 = vmul.f32 %v7036_v40, %v867_v41  ;;  %v6194_v44 = vpop.f32.mrb[1].mxu0 }
  0xfe   : > { %v870_v45 = vpop.f32.mrb[2].mxu0 }
  0xff   : > { %v1030_v46 = vadd.f32 %v7041_v42, %v993_v43  ;;  %v994_v47 = vmul.f32 %v7036_v40, %v870_v45  ;;  %v6195_v48 = vpop.f32.mrb[3].mxu0 }
 0x101   : > { %v1060_v49 = vmax.f32 %v1030_v46, 0.0  ;;  %v1031_v50 = vadd.f32 %v7041_v42, %v994_v47 }
 0x103   : > { %v5629_v51 = vpack.c.bf16 %v1060_v49, %v1060_v49  ;;  %v1061_v52 = vmax.f32 %v1031_v50, 0.0 }
 0x104   : > { %v875_v53 = vpop.f32.mrb[4].mxu0 }
 0x105   : > { %v1194_v54 = vshrl.u32 %v5629_v51, 16  ;;  %v5630_v55 = vpack.c.bf16 %v1061_v52, %v1061_v52  ;;  %v995_v56 = vmul.f32 %v7036_v40, %v875_v53  ;;  %v6198_v57 = vpop.f32.mrb[5].mxu0  ;;  %v1197_v60 = vshll.u32 %v5629_v51, 16 }
 0x106   : > { %v878_v58 = vpop.f32.mrb[6].mxu0 }
 0x107   : > { %v1196_v59 = vrot.slane %v1194_v54, 7  ;;  %v1202_v61 = vshrl.u32 %v5630_v55, 16  ;;  %v1032_v62 = vadd.f32 %v7041_v42, %v995_v56  ;;  %v6199_v63 = vpop.f32.mrb[7].mxu0  ;;  %v996_v2 = vmul.f32 %v7036_v40, %v878_v58 }
 0x108   : > { %v1205_v5 = vshll.u32 %v5630_v55, 16 }
 0x109   : > { %v1199_v3 = vor.u32 %v1197_v60, %v1196_v59  ;;  %v1204_v4 = vrot.slane %v1202_v61, 7  ;;  %v1062_v6 = vmax.f32 %v1032_v62, 0.0  ;;  %v1033_v8 = vadd.f32 %v7041_v42, %v996_v2 }
 0x10a   : > { %v1200_v9 = vrot.slane %v1196_v59, 4 }
 0x10b   : > { %v1497_v10 = vsel %vm7051_vm5, %v1199_v3, %v1496_v1  ;;  %v1207_v11 = vor.u32 %v1205_v5, %v1204_v4  ;;  %v5631_v12 = vpack.c.bf16 %v1062_v6, %v1062_v6  ;;  %v1063_v13 = vmax.f32 %v1033_v8, 0.0  ;;  %v1511_v3 = vld [vmem:[#allocation3 + $0x1c] sm:$0x1] }
 0x10c   : > { %1498 = vst [vmem:[#allocation3] sm:$0xf] %v1497_v10  ;;  %v883_v14 = vpop.f32.mrb[8].mxu0  ;;  %v1209_v27 = vrot.slane %v1204_v4, 4 }
 0x10d   : > { %v1208_v15 = vsel %vm7057_vm6, %v1200_v9, %v1207_v11  ;;  %v1211_v16 = vshrl.u32 %v5631_v12, 16  ;;  %v997_v17 = vmul.f32 %v7036_v40, %v883_v14  ;;  %v6202_v18 = vpop.f32.mrb[9].mxu0  ;;  %v5632_v19 = vpack.c.bf16 %v1063_v13, %v1063_v13 }
 0x10e   : > { %1499 = vst [vmem:[#allocation3 + $0x4] sm:$0xf] %v1208_v15  ;;  %v886_v20 = vpop.f32.mrb[10].mxu0  ;;  %v1214_v22 = vshll.u32 %v5631_v12, 16 }
 0x10f   : > { %v1213_v21 = vrot.slane %v1211_v16, 7  ;;  %v1034_v23 = vadd.f32 %v7041_v42, %v997_v17  ;;  %v998_v24 = vmul.f32 %v7036_v40, %v886_v20  ;;  %v6203_v25 = vpop.f32.mrb[11].mxu0  ;;  %v1220_v29 = vshrl.u32 %v5632_v19, 16  ;;  %1644 = vst [vmem:[#allocation3 + $0x4] sm:$0xf] (!%p5291_p10), %v6839_v7 }
 0x110   : > { %v1223_v35 = vshll.u32 %v5632_v19, 16 }
 0x111   : > { %v1216_v30 = vor.u32 %v1214_v22, %v1213_v21  ;;  %v1218_v31 = vrot.slane %v1213_v21, 4  ;;  %v1064_v32 = vmax.f32 %v1034_v23, 0.0  ;;  %v1035_v33 = vadd.f32 %v7041_v42, %v998_v24 }
 0x112   : > { %v1222_v34 = vrot.slane %v1220_v29, 7 }
 0x113   : > { %v1578_v36 = vld [vmem:[#allocation3] sm:$0x1]  ;;  %v1217_v37 = vsel %vm7057_vm6, %v1209_v27, %v1216_v30  ;;  %v1504_v38 = vsel %vm7071_vm8, %v1218_v31, %v1503_v28  ;;  %v5633_v41 = vpack.c.bf16 %v1064_v32, %v1064_v32  ;;  %v1065_v43 = vmax.f32 %v1035_v33, 0.0 }
 0x114   : > { %v1579_v44 = vsel %vm7071_vm8, 0, %v1578_v36  ;;  %1500 = vst [vmem:[#allocation3 + $0x8] sm:$0xf] %v1217_v37  ;;  %1505 = vst [vmem:[#allocation3 + $0xc] sm:$0x1] %v1504_v38  ;;  %v1225_v45 = vor.u32 %v1223_v35, %v1222_v34  ;;  %v891_v46 = vpop.f32.mrb[12].mxu0 }
 0x115   : > { %1580 = vst [vmem:[#allocation3] sm:$0x1] %v1579_v44  ;;  %v1228_v47 = vshrl.u32 %v5633_v41, 16  ;;  %v5634_v48 = vpack.c.bf16 %v1065_v43, %v1065_v43  ;;  %v999_v49 = vmul.f32 %v7036_v40, %v891_v46  ;;  %v6206_v50 = vpop.f32.mrb[13].mxu0  ;;  %v1231_v54 = vshll.u32 %v5633_v41, 16 }
 0x116   : > { %v1507_v51 = vsel %vm7051_vm5, %v1225_v45, %v1506_v39  ;;  %v894_v52 = vpop.f32.mrb[14].mxu0  ;;  %v1226_v58 = vrot.slane %v1222_v34, 4  ;;  %v1514_v28 = vld [vmem:[#allocation3 + $0x20] sm:$0xf]  ;;  %1643 = vst [vmem:[#allocation3] sm:$0xf] (!%p5291_p10), %v6839_v7 }
 0x117   : > { %1508 = vst [vmem:[#allocation3 + $0x10] sm:$0xf] %v1507_v51  ;;  %v1230_v53 = vrot.slane %v1228_v47, 7  ;;  %v1237_v55 = vshrl.u32 %v5634_v48, 16  ;;  %v1036_v56 = vadd.f32 %v7041_v42, %v999_v49  ;;  %v6207_v57 = vpop.f32.mrb[15].mxu0  ;;  %v1000_v59 = vmul.f32 %v7036_v40, %v894_v52 }
 0x118   : > { %v1240_v63 = vshll.u32 %v5634_v48, 16  ;;  %1645 = vst [vmem:[#allocation3 + $0x8] sm:$0xf] (!%p5291_p10), %v6839_v7 }
 0x119   : > { %v1233_v61 = vor.u32 %v1231_v54, %v1230_v53  ;;  %v1239_v62 = vrot.slane %v1237_v55, 7  ;;  %v1066_v1 = vmax.f32 %v1036_v56, 0.0  ;;  %v1235_v2 = vrot.slane %v1230_v53, 4 }
 0x11a   : > { %v1037_v4 = vadd.f32 %v7041_v42, %v1000_v59 }
 0x11b   : > { %v1609_v5 = vld [vmem:[#allocation3 + $0xc] sm:$0x1]  ;;  %v1234_v6 = vsel %vm7057_vm6, %v1226_v58, %v1233_v61  ;;  %v1242_v8 = vor.u32 %v1240_v63, %v1239_v62  ;;  %v1244_v9 = vrot.slane %v1239_v62, 4  ;;  %v5635_v10 = vpack.c.bf16 %v1066_v1, %v1066_v1 }
 0x11c   : > { %v1610_v11 = vsel %vm7089_vm9, 0, %v1609_v5  ;;  %1509 = vst [vmem:[#allocation3 + $0x14] sm:$0xf] %v1234_v6  ;;  %v1067_v12 = vmax.f32 %v1037_v4, 0.0  ;;  %v899_v13 = vpop.f32.mrb[16].mxu0 }
 0x11d   : > { %1611 = vst [vmem:[#allocation3 + $0xc] sm:$0x1] %v1610_v11  ;;  %v1243_v14 = vsel %vm7057_vm6, %v1235_v2, %v1242_v8  ;;  %v1512_v15 = vsel %vm7071_vm8, %v1244_v9, %v1511_v3  ;;  %v1246_v16 = vshrl.u32 %v5635_v10, 16  ;;  %v6210_v17 = vpop.f32.mrb[17].mxu0  ;;  %v1001_v20 = vmul.f32 %v7036_v40, %v899_v13  ;;  %v1519_v58 = vld [vmem:[#allocation3 + $0x2c] sm:$0x1] }
 0x11e   : > { %v1581_v18 = vld [vmem:[#allocation3 + $0x10] sm:$0x1]  ;;  %1510 = vst [vmem:[#allocation3 + $0x18] sm:$0xf] %v1243_v14  ;;  %1513 = vst [vmem:[#allocation3 + $0x1c] sm:$0x1] %v1512_v15  ;;  %v5636_v19 = vpack.c.bf16 %v1067_v12, %v1067_v12 }
 0x11f   : > { %v902_v21 = vpop.f32.mrb[18].mxu0  ;;  %v1582_v22 = vsel %vm7071_vm8, 0, %v1581_v18  ;;  %v1248_v23 = vrot.slane %v1246_v16, 7  ;;  %v1249_v24 = vshll.u32 %v5635_v10, 16  ;;  %v1038_v30 = vadd.f32 %v7041_v42, %v1001_v20  ;;  %v1522_v4 = vld [vmem:[#allocation3 + $0x30] sm:$0xf] }
 0x120   : > { %v1002_v25 = vmul.f32 %v7036_v40, %v902_v21  ;;  %v6211_v27 = vpop.f32.mrb[19].mxu0  ;;  %1583 = vst [vmem:[#allocation3 + $0x10] sm:$0x1] %v1582_v22  ;;  %v1254_v29 = vshrl.u32 %v5636_v19, 16  ;;  %v1257_v34 = vshll.u32 %v5636_v19, 16 }
 0x121   : > { %v1251_v31 = vor.u32 %v1249_v24, %v1248_v23  ;;  %v1068_v35 = vmax.f32 %v1038_v30, 0.0  ;;  %v1252_v38 = vrot.slane %v1248_v23, 4  ;;  %1646 = vst [vmem:[#allocation3 + $0xc] sm:$0x1] (!%p5291_p10), %v6839_v7 }
 0x122   : > { %v1039_v32 = vadd.f32 %v7041_v42, %v1002_v25  ;;  %v1256_v33 = vrot.slane %v1254_v29, 7 }
 0x123   : > { %v1515_v36 = vsel %vm7051_vm5, %v1251_v31, %v1514_v28  ;;  %v5637_v41 = vpack.c.bf16 %v1068_v35, %v1068_v35 }
 0x124   : > { %v1069_v37 = vmax.f32 %v1039_v32, 0.0  ;;  %1516 = vst [vmem:[#allocation3 + $0x20] sm:$0xf] %v1515_v36  ;;  %v1259_v39 = vor.u32 %v1257_v34, %v1256_v33  ;;  %v907_v43 = vpop.f32.mrb[20].mxu0  ;;  %v1261_v1 = vrot.slane %v1256_v33, 4 }
 0x125   : > { %v1612_v44 = vld [vmem:[#allocation3 + $0x1c] sm:$0x1]  ;;  %v1003_v46 = vmul.f32 %v7036_v40, %v907_v43  ;;  %v6214_v47 = vpop.f32.mrb[21].mxu0  ;;  %v1263_v50 = vshrl.u32 %v5637_v41, 16  ;;  %v1266_v57 = vshll.u32 %v5637_v41, 16 }
 0x126   : > { %v5638_v45 = vpack.c.bf16 %v1069_v37, %v1069_v37  ;;  %v1613_v48 = vsel %vm7089_vm9, 0, %v1612_v44  ;;  %v1260_v49 = vsel %vm7057_vm6, %v1252_v38, %v1259_v39  ;;  %v910_v51 = vpop.f32.mrb[22].mxu0  ;;  %v1527_v33 = vld [vmem:[#allocation3 + $0x3c] sm:$0x1] }
 0x127   : > { %1614 = vst [vmem:[#allocation3 + $0x1c] sm:$0x1] %v1613_v48  ;;  %1517 = vst [vmem:[#allocation3 + $0x24] sm:$0xf] %v1260_v49  ;;  %v1040_v53 = vadd.f32 %v7041_v42, %v1003_v46  ;;  %v1004_v54 = vmul.f32 %v7036_v40, %v910_v51  ;;  %v6215_v55 = vpop.f32.mrb[23].mxu0  ;;  %v1265_v56 = vrot.slane %v1263_v50, 7 }
 0x128   : > { %v1272_v52 = vshrl.u32 %v5638_v45, 16  ;;  %v1275_v61 = vshll.u32 %v5638_v45, 16 }
 0x129   : > { %v1070_v62 = vmax.f32 %v1040_v53, 0.0  ;;  %v1041_v63 = vadd.f32 %v7041_v42, %v1004_v54  ;;  %v1268_v2 = vor.u32 %v1266_v57, %v1265_v56  ;;  %v1270_v3 = vrot.slane %v1265_v56, 4 }
 0x12a   : > { %v1274_v59 = vrot.slane %v1272_v52, 7 }
 0x12b   : > { %v1584_v5 = vld [vmem:[#allocation3 + $0x20] sm:$0x1]  ;;  %v5639_v8 = vpack.c.bf16 %v1070_v62, %v1070_v62  ;;  %v1071_v9 = vmax.f32 %v1041_v63, 0.0  ;;  %v1269_v11 = vsel %vm7057_vm6, %v1261_v1, %v1268_v2  ;;  %v1520_v12 = vsel %vm7071_vm8, %v1270_v3, %v1519_v58 }
 0x12c   : > { %v1277_v6 = vor.u32 %v1275_v61, %v1274_v59  ;;  %v1585_v10 = vsel %vm7071_vm8, 0, %v1584_v5  ;;  %v915_v13 = vpop.f32.mrb[24].mxu0  ;;  %1518 = vst [vmem:[#allocation3 + $0x28] sm:$0xf] %v1269_v11  ;;  %1521 = vst [vmem:[#allocation3 + $0x2c] sm:$0x1] %v1520_v12 }
 0x12d   : > { %1586 = vst [vmem:[#allocation3 + $0x20] sm:$0x1] %v1585_v10  ;;  %v1280_v15 = vshrl.u32 %v5639_v8, 16  ;;  %v5640_v16 = vpack.c.bf16 %v1071_v9, %v1071_v9  ;;  %v6218_v17 = vpop.f32.mrb[25].mxu0  ;;  %v1005_v18 = vmul.f32 %v7036_v40, %v915_v13  ;;  %v1283_v21 = vshll.u32 %v5639_v8, 16 }
 0x12e   : > { %v1523_v14 = vsel %vm7051_vm5, %v1277_v6, %v1522_v4  ;;  %v918_v19 = vpop.f32.mrb[26].mxu0  ;;  %v1278_v25 = vrot.slane %v1274_v59, 4  ;;  %v1530_v61 = vld [vmem:[#allocation3 + $0x40] sm:$0xf] }
 0x12f   : > { %1524 = vst [vmem:[#allocation3 + $0x30] sm:$0xf] %v1523_v14  ;;  %v1282_v20 = vrot.slane %v1280_v15, 7  ;;  %v1289_v22 = vshrl.u32 %v5640_v16, 16  ;;  %v1006_v23 = vmul.f32 %v7036_v40, %v918_v19  ;;  %v6219_v24 = vpop.f32.mrb[27].mxu0  ;;  %v1042_v27 = vadd.f32 %v7041_v42, %v1005_v18 }
 0x130   : > { %v1292_v30 = vshll.u32 %v5640_v16, 16 }
 0x131   : > { %v1285_v28 = vor.u32 %v1283_v21, %v1282_v20  ;;  %v1291_v29 = vrot.slane %v1289_v22, 7  ;;  %v1043_v31 = vadd.f32 %v7041_v42, %v1006_v23  ;;  %v1287_v32 = vrot.slane %v1282_v20, 4 }
 0x132   : > { %v1072_v34 = vmax.f32 %v1042_v27, 0.0 }
 0x133   : > { %v1286_v35 = vsel %vm7057_vm6, %v1278_v25, %v1285_v28  ;;  %v1294_v36 = vor.u32 %v1292_v30, %v1291_v29  ;;  %v1296_v37 = vrot.slane %v1291_v29, 4  ;;  %v1073_v38 = vmax.f32 %v1043_v31, 0.0  ;;  %v1615_v39 = vld [vmem:[#allocation3 + $0x2c] sm:$0x1] }
 0x134   : > { %1525 = vst [vmem:[#allocation3 + $0x34] sm:$0xf] %v1286_v35  ;;  %v5641_v41 = vpack.c.bf16 %v1072_v34, %v1072_v34  ;;  %v923_v43 = vpop.f32.mrb[28].mxu0  ;;  %v1616_v44 = vsel %vm7089_vm9, 0, %v1615_v39  ;;  %v1535_v25 = vld [vmem:[#allocation3 + $0x4c] sm:$0x1] }
 0x135   : > { %v1295_v46 = vsel %vm7057_vm6, %v1287_v32, %v1294_v36  ;;  %v1528_v47 = vsel %vm7071_vm8, %v1296_v37, %v1527_v33  ;;  %v5642_v48 = vpack.c.bf16 %v1073_v38, %v1073_v38  ;;  %v6222_v49 = vpop.f32.mrb[29].mxu0  ;;  %1617 = vst [vmem:[#allocation3 + $0x2c] sm:$0x1] %v1616_v44  ;;  %v1007_v52 = vmul.f32 %v7036_v40, %v923_v43  ;;  %v1538_v34 = vld [vmem:[#allocation3 + $0x50] sm:$0xf] }
 0x136   : > { %v1587_v45 = vld [vmem:[#allocation3 + $0x30] sm:$0x1]  ;;  %1526 = vst [vmem:[#allocation3 + $0x38] sm:$0xf] %v1295_v46  ;;  %1529 = vst [vmem:[#allocation3 + $0x3c] sm:$0x1] %v1528_v47 }
 0x137   : > { %v1588_v50 = vsel %vm7071_vm8, 0, %v1587_v45  ;;  %v1298_v51 = vshrl.u32 %v5641_v41, 16  ;;  %v926_v53 = vpop.f32.mrb[30].mxu0  ;;  %v1306_v54 = vshrl.u32 %v5642_v48, 16  ;;  %v1301_v58 = vshll.u32 %v5641_v41, 16 }
 0x138   : > { %1589 = vst [vmem:[#allocation3 + $0x30] sm:$0x1] %v1588_v50  ;;  %v1008_v55 = vmul.f32 %v7036_v40, %v926_v53  ;;  %v6223_v56 = vpop.f32.mrb[31].mxu0  ;;  %v1044_v59 = vadd.f32 %v7041_v42, %v1007_v52  ;;  %v1309_v63 = vshll.u32 %v5642_v48, 16 }
 0x139   : > { %v1300_v57 = vrot.slane %v1298_v51, 7  ;;  %v1308_v62 = vrot.slane %v1306_v54, 7 }
 0x13a   : > { %v1045_v1 = vadd.f32 %v7041_v42, %v1008_v55  ;;  %v1074_v3 = vmax.f32 %v1044_v59, 0.0 }
 0x13b   : > { %v1303_v2 = vor.u32 %v1301_v58, %v1300_v57  ;;  %v1304_v4 = vrot.slane %v1300_v57, 4  ;;  %v1311_v5 = vor.u32 %v1309_v63, %v1308_v62  ;;  %v1313_v31 = vrot.slane %v1308_v62, 4 }
 0x13c   : > { %v1075_v6 = vmax.f32 %v1045_v1, 0.0  ;;  %v5643_v9 = vpack.c.bf16 %v1074_v3, %v1074_v3  ;;  %v931_v10 = vpop.f32.mrb[32].mxu0 }
 0x13d   : > { %v1531_v8 = vsel %vm7051_vm5, %v1303_v2, %v1530_v61  ;;  %v1618_v11 = vld [vmem:[#allocation3 + $0x3c] sm:$0x1]  ;;  %v1312_v12 = vsel %vm7057_vm6, %v1304_v4, %v1311_v5  ;;  %v1009_v14 = vmul.f32 %v7036_v40, %v931_v10  ;;  %v6226_v15 = vpop.f32.mrb[33].mxu0 }
 0x13e   : > { %1532 = vst [vmem:[#allocation3 + $0x40] sm:$0xf] %v1531_v8  ;;  %v5644_v13 = vpack.c.bf16 %v1075_v6, %v1075_v6  ;;  %v1619_v16 = vsel %vm7089_vm9, 0, %v1618_v11  ;;  %1533 = vst [vmem:[#allocation3 + $0x44] sm:$0xf] %v1312_v12  ;;  %v1315_v17 = vshrl.u32 %v5643_v9, 16 }
 0x13f   : > { %v934_v18 = vpop.f32.mrb[34].mxu0  ;;  %1620 = vst [vmem:[#allocation3 + $0x3c] sm:$0x1] %v1619_v16  ;;  %v1046_v20 = vadd.f32 %v7041_v42, %v1009_v14  ;;  %v1318_v24 = vshll.u32 %v5643_v9, 16  ;;  %v1543_v2 = vld [vmem:[#allocation3 + $0x5c] sm:$0x1] }
 0x140   : > { %v1324_v19 = vshrl.u32 %v5644_v13, 16  ;;  %v1010_v21 = vmul.f32 %v7036_v40, %v934_v18  ;;  %v6227_v22 = vpop.f32.mrb[35].mxu0  ;;  %v1317_v23 = vrot.slane %v1315_v17, 7  ;;  %v1327_v28 = vshll.u32 %v5644_v13, 16 }
 0x141   : > { %v1076_v29 = vmax.f32 %v1046_v20, 0.0 }
 0x142   : > { %v1326_v27 = vrot.slane %v1324_v19, 7  ;;  %v1047_v30 = vadd.f32 %v7041_v42, %v1010_v21  ;;  %v1320_v32 = vor.u32 %v1318_v24, %v1317_v23  ;;  %v1322_v33 = vrot.slane %v1317_v23, 4 }
 0x143   : > { %v5645_v36 = vpack.c.bf16 %v1076_v29, %v1076_v29 }
 0x144   : > { %v1329_v35 = vor.u32 %v1327_v28, %v1326_v27  ;;  %v1077_v37 = vmax.f32 %v1047_v30, 0.0  ;;  %v1321_v39 = vsel %vm7057_vm6, %v1313_v31, %v1320_v32  ;;  %v1536_v41 = vsel %vm7071_vm8, %v1322_v33, %v1535_v25  ;;  %v939_v43 = vpop.f32.mrb[36].mxu0  ;;  %v1546_v28 = vld [vmem:[#allocation3 + $0x60] sm:$0xf] }
 0x145   : > { %v1590_v38 = vld [vmem:[#allocation3 + $0x40] sm:$0x1]  ;;  %1534 = vst [vmem:[#allocation3 + $0x48] sm:$0xf] %v1321_v39  ;;  %1537 = vst [vmem:[#allocation3 + $0x4c] sm:$0x1] %v1536_v41  ;;  %v1011_v49 = vmul.f32 %v7036_v40, %v939_v43 }
 0x146   : > { %v1591_v44 = vsel %vm7071_vm8, 0, %v1590_v38  ;;  %v1539_v45 = vsel %vm7051_vm5, %v1329_v35, %v1538_v34  ;;  %v1332_v46 = vshrl.u32 %v5645_v36, 16  ;;  %v6230_v47 = vpop.f32.mrb[37].mxu0  ;;  %v5646_v48 = vpack.c.bf16 %v1077_v37, %v1077_v37 }
 0x147   : > { %1592 = vst [vmem:[#allocation3 + $0x40] sm:$0x1] %v1591_v44  ;;  %1540 = vst [vmem:[#allocation3 + $0x50] sm:$0xf] %v1539_v45  ;;  %v942_v50 = vpop.f32.mrb[38].mxu0  ;;  %v1335_v52 = vshll.u32 %v5645_v36, 16  ;;  %v1048_v56 = vadd.f32 %v7041_v42, %v1011_v49 }
 0x148   : > { %v1334_v51 = vrot.slane %v1332_v46, 7  ;;  %v1012_v53 = vmul.f32 %v7036_v40, %v942_v50  ;;  %v6231_v54 = vpop.f32.mrb[39].mxu0  ;;  %v1341_v55 = vshrl.u32 %v5646_v48, 16  ;;  %v1330_v57 = vrot.slane %v1326_v27, 4 }
 0x149   : > { %v1344_v62 = vshll.u32 %v5646_v48, 16  ;;  %v1078_v63 = vmax.f32 %v1048_v56, 0.0  ;;  %v1551_v56 = vld [vmem:[#allocation3 + $0x6c] sm:$0x1] }
 0x14a   : > { %v1337_v58 = vor.u32 %v1335_v52, %v1334_v51  ;;  %v1049_v59 = vadd.f32 %v7041_v42, %v1012_v53  ;;  %v1343_v61 = vrot.slane %v1341_v55, 7  ;;  %v1339_v5 = vrot.slane %v1334_v51, 4 }
 0x14b   : > { %v5647_v9 = vpack.c.bf16 %v1078_v63, %v1078_v63 }
 0x14c   : > { %v1338_v1 = vsel %vm7057_vm6, %v1330_v57, %v1337_v58  ;;  %v1079_v3 = vmax.f32 %v1049_v59, 0.0  ;;  %v1621_v4 = vld [vmem:[#allocation3 + $0x4c] sm:$0x1]  ;;  %v1346_v6 = vor.u32 %v1344_v62, %v1343_v61  ;;  %v1348_v8 = vrot.slane %v1343_v61, 4  ;;  %v947_v10 = vpop.f32.mrb[40].mxu0 }
 0x14d   : > { %1541 = vst [vmem:[#allocation3 + $0x54] sm:$0xf] %v1338_v1  ;;  %v1622_v11 = vsel %vm7089_vm9, 0, %v1621_v4  ;;  %v1013_v14 = vmul.f32 %v7036_v40, %v947_v10  ;;  %v6234_v15 = vpop.f32.mrb[41].mxu0  ;;  %v1350_v19 = vshrl.u32 %v5647_v9, 16  ;;  %v1353_v25 = vshll.u32 %v5647_v9, 16 }
 0x14e   : > { %v1593_v12 = vld [vmem:[#allocation3 + $0x50] sm:$0x1]  ;;  %v5648_v13 = vpack.c.bf16 %v1079_v3, %v1079_v3  ;;  %1623 = vst [vmem:[#allocation3 + $0x4c] sm:$0x1] %v1622_v11  ;;  %v1347_v17 = vsel %vm7057_vm6, %v1339_v5, %v1346_v6  ;;  %v1544_v18 = vsel %vm7071_vm8, %v1348_v8, %v1543_v2  ;;  %v950_v20 = vpop.f32.mrb[42].mxu0 }
 0x14f   : > { %v1594_v16 = vsel %vm7071_vm8, 0, %v1593_v12  ;;  %1542 = vst [vmem:[#allocation3 + $0x58] sm:$0xf] %v1347_v17  ;;  %1545 = vst [vmem:[#allocation3 + $0x5c] sm:$0x1] %v1544_v18  ;;  %v1050_v22 = vadd.f32 %v7041_v42, %v1013_v14  ;;  %v6235_v23 = vpop.f32.mrb[43].mxu0  ;;  %v1014_v27 = vmul.f32 %v7036_v40, %v950_v20 }
 0x150   : > { %1595 = vst [vmem:[#allocation3 + $0x50] sm:$0x1] %v1594_v16  ;;  %v1358_v21 = vshrl.u32 %v5648_v13, 16  ;;  %v1352_v24 = vrot.slane %v1350_v19, 7  ;;  %v1361_v30 = vshll.u32 %v5648_v13, 16 }
 0x151   : > { %v1080_v31 = vmax.f32 %v1050_v22, 0.0  ;;  %v1051_v33 = vadd.f32 %v7041_v42, %v1014_v27  ;;  %v1554_v4 = vld [vmem:[#allocation3 + $0x70] sm:$0xf] }
 0x152   : > { %v1360_v29 = vrot.slane %v1358_v21, 7  ;;  %v1355_v32 = vor.u32 %v1353_v25, %v1352_v24  ;;  %v1356_v34 = vrot.slane %v1352_v24, 4 }
 0x153   : > { %v5649_v36 = vpack.c.bf16 %v1080_v31, %v1080_v31  ;;  %v1081_v38 = vmax.f32 %v1051_v33, 0.0  ;;  %v1559_v31 = vld [vmem:[#allocation3 + $0x7c] sm:$0x1] }
 0x154   : > { %v1363_v35 = vor.u32 %v1361_v30, %v1360_v29  ;;  %v1547_v37 = vsel %vm7051_vm5, %v1355_v32, %v1546_v28  ;;  %v955_v39 = vpop.f32.mrb[44].mxu0  ;;  %v1365_v55 = vrot.slane %v1360_v29, 4 }
 0x155   : > { %1548 = vst [vmem:[#allocation3 + $0x60] sm:$0xf] %v1547_v37  ;;  %v1367_v43 = vshrl.u32 %v5649_v36, 16  ;;  %v1015_v44 = vmul.f32 %v7036_v40, %v955_v39  ;;  %v6238_v45 = vpop.f32.mrb[45].mxu0  ;;  %v1370_v47 = vshll.u32 %v5649_v36, 16  ;;  %v5650_v48 = vpack.c.bf16 %v1081_v38, %v1081_v38 }
 0x156   : > { %v1364_v41 = vsel %vm7057_vm6, %v1356_v34, %v1363_v35  ;;  %v1624_v46 = vld [vmem:[#allocation3 + $0x5c] sm:$0x1]  ;;  %v958_v49 = vpop.f32.mrb[46].mxu0 }
 0x157   : > { %1549 = vst [vmem:[#allocation3 + $0x64] sm:$0xf] %v1364_v41  ;;  %v1625_v50 = vsel %vm7089_vm9, 0, %v1624_v46  ;;  %v1369_v51 = vrot.slane %v1367_v43, 7  ;;  %v1052_v52 = vadd.f32 %v7041_v42, %v1015_v44  ;;  %v1016_v53 = vmul.f32 %v7036_v40, %v958_v49  ;;  %v6239_v54 = vpop.f32.mrb[47].mxu0 }
 0x158   : > { %1626 = vst [vmem:[#allocation3 + $0x5c] sm:$0x1] %v1625_v50  ;;  %v1376_v57 = vshrl.u32 %v5650_v48, 16  ;;  %v1379_v1 = vshll.u32 %v5650_v48, 16 }
 0x159   : > { %v1372_v58 = vor.u32 %v1370_v47, %v1369_v51  ;;  %v1374_v59 = vrot.slane %v1369_v51, 4  ;;  %v1082_v61 = vmax.f32 %v1052_v52, 0.0  ;;  %v1053_v62 = vadd.f32 %v7041_v42, %v1016_v53 }
 0x15a   : > { %v1378_v63 = vrot.slane %v1376_v57, 7 }
 0x15b   : > { %v1373_v2 = vsel %vm7057_vm6, %v1365_v55, %v1372_v58  ;;  %v1552_v3 = vsel %vm7071_vm8, %v1374_v59, %v1551_v56  ;;  %v5651_v5 = vpack.c.bf16 %v1082_v61, %v1082_v61  ;;  %v1083_v6 = vmax.f32 %v1053_v62, 0.0  ;;  %v1562_v58 = vld [vmem:[#allocation3 + $0x80] sm:$0xf] }
 0x15c   : > { %v1596_v8 = vld [vmem:[#allocation3 + $0x60] sm:$0x1]  ;;  %1550 = vst [vmem:[#allocation3 + $0x68] sm:$0xf] %v1373_v2  ;;  %1553 = vst [vmem:[#allocation3 + $0x6c] sm:$0x1] %v1552_v3  ;;  %v1381_v9 = vor.u32 %v1379_v1, %v1378_v63 }
 0x15d   : > { %v963_v10 = vpop.f32.mrb[48].mxu0  ;;  %v1597_v11 = vsel %vm7071_vm8, 0, %v1596_v8  ;;  %v1384_v12 = vshrl.u32 %v5651_v5, 16  ;;  %v5652_v13 = vpack.c.bf16 %v1083_v6, %v1083_v6  ;;  %v1387_v19 = vshll.u32 %v5651_v5, 16 }
 0x15e   : > { %v6242_v14 = vpop.f32.mrb[49].mxu0  ;;  %1598 = vst [vmem:[#allocation3 + $0x60] sm:$0x1] %v1597_v11  ;;  %v1555_v15 = vsel %vm7051_vm5, %v1381_v9, %v1554_v4  ;;  %v1017_v16 = vmul.f32 %v7036_v40, %v963_v10  ;;  %v1382_v23 = vrot.slane %v1378_v63, 4 }
 0x15f   : > { %v966_v17 = vpop.f32.mrb[50].mxu0  ;;  %1556 = vst [vmem:[#allocation3 + $0x70] sm:$0xf] %v1555_v15  ;;  %v1386_v18 = vrot.slane %v1384_v12, 7  ;;  %v1393_v20 = vshrl.u32 %v5652_v13, 16  ;;  %v1396_v28 = vshll.u32 %v5652_v13, 16 }
 0x160   : > { %v1018_v21 = vmul.f32 %v7036_v40, %v966_v17  ;;  %v6243_v22 = vpop.f32.mrb[51].mxu0  ;;  %v1054_v24 = vadd.f32 %v7041_v42, %v1017_v16 }
 0x161   : > { %v1389_v25 = vor.u32 %v1387_v19, %v1386_v18  ;;  %v1395_v27 = vrot.slane %v1393_v20, 7  ;;  %v1391_v30 = vrot.slane %v1386_v18, 4 }
 0x162   : > { %v1055_v29 = vadd.f32 %v7041_v42, %v1018_v21  ;;  %v1084_v32 = vmax.f32 %v1054_v24, 0.0 }
 0x163   : > { %v1627_v33 = vld [vmem:[#allocation3 + $0x6c] sm:$0x1]  ;;  %v1390_v34 = vsel %vm7057_vm6, %v1382_v23, %v1389_v25  ;;  %v1398_v35 = vor.u32 %v1396_v28, %v1395_v27  ;;  %v1400_v36 = vrot.slane %v1395_v27, 4 }
 0x164   : > { %v1085_v37 = vmax.f32 %v1055_v29, 0.0  ;;  %v1628_v38 = vsel %vm7089_vm9, 0, %v1627_v33  ;;  %1557 = vst [vmem:[#allocation3 + $0x74] sm:$0xf] %v1390_v34  ;;  %v5653_v39 = vpack.c.bf16 %v1084_v32, %v1084_v32  ;;  %v971_v41 = vpop.f32.mrb[52].mxu0 }
 0x165   : > { %1629 = vst [vmem:[#allocation3 + $0x6c] sm:$0x1] %v1628_v38  ;;  %v1399_v43 = vsel %vm7057_vm6, %v1391_v30, %v1398_v35  ;;  %v1560_v44 = vsel %vm7071_vm8, %v1400_v36, %v1559_v31  ;;  %v1019_v46 = vmul.f32 %v7036_v40, %v971_v41  ;;  %v6246_v47 = vpop.f32.mrb[53].mxu0  ;;  %v1567_v23 = vld [vmem:[#allocation3 + $0x8c] sm:$0x1] }
 0x166   : > { %v5654_v45 = vpack.c.bf16 %v1085_v37, %v1085_v37  ;;  %v1599_v48 = vld [vmem:[#allocation3 + $0x70] sm:$0x1]  ;;  %1558 = vst [vmem:[#allocation3 + $0x78] sm:$0xf] %v1399_v43  ;;  %1561 = vst [vmem:[#allocation3 + $0x7c] sm:$0x1] %v1560_v44 }
 0x167   : > { %v1402_v49 = vshrl.u32 %v5653_v39, 16  ;;  %v974_v50 = vpop.f32.mrb[54].mxu0  ;;  %v1600_v51 = vsel %vm7071_vm8, 0, %v1599_v48  ;;  %v1056_v53 = vadd.f32 %v7041_v42, %v1019_v46  ;;  %v1405_v56 = vshll.u32 %v5653_v39, 16  ;;  %v1570_v34 = vld [vmem:[#allocation3 + $0x90] sm:$0xf] }
 0x168   : > { %v1410_v52 = vshrl.u32 %v5654_v45, 16  ;;  %v6247_v54 = vpop.f32.mrb[55].mxu0  ;;  %1601 = vst [vmem:[#allocation3 + $0x70] sm:$0x1] %v1600_v51  ;;  %v1020_v57 = vmul.f32 %v7036_v40, %v974_v50  ;;  %v1413_v61 = vshll.u32 %v5654_v45, 16 }
 0x169   : > { %v1404_v55 = vrot.slane %v1402_v49, 7  ;;  %v1086_v62 = vmax.f32 %v1056_v53, 0.0  ;;  %v1575_v50 = vld [vmem:[#allocation3 + $0x9c] sm:$0x1] }
 0x16a   : > { %v1412_v59 = vrot.slane %v1410_v52, 7  ;;  %v1057_v1 = vadd.f32 %v7041_v42, %v1020_v57 }
 0x16b   : > { %v1407_v63 = vor.u32 %v1405_v56, %v1404_v55  ;;  %v1408_v2 = vrot.slane %v1404_v55, 4  ;;  %v5655_v4 = vpack.c.bf16 %v1086_v62, %v1086_v62 }
 0x16c   : > { %v1415_v3 = vor.u32 %v1413_v61, %v1412_v59  ;;  %v1087_v6 = vmax.f32 %v1057_v1, 0.0  ;;  %v979_v8 = vpop.f32.mrb[56].mxu0  ;;  %v1417_v22 = vrot.slane %v1412_v59, 4 }
 0x16d   : > { %v1563_v5 = vsel %vm7051_vm5, %v1407_v63, %v1562_v58  ;;  %v1630_v9 = vld [vmem:[#allocation3 + $0x7c] sm:$0x1]  ;;  %v1419_v11 = vshrl.u32 %v5655_v4, 16  ;;  %v1021_v12 = vmul.f32 %v7036_v40, %v979_v8  ;;  %v6250_v13 = vpop.f32.mrb[57].mxu0  ;;  %v1422_v18 = vshll.u32 %v5655_v4, 16 }
 0x16e   : > { %1564 = vst [vmem:[#allocation3 + $0x80] sm:$0xf] %v1563_v5  ;;  %v1416_v10 = vsel %vm7057_vm6, %v1408_v2, %v1415_v3  ;;  %v1631_v14 = vsel %vm7089_vm9, 0, %v1630_v9  ;;  %v5656_v15 = vpack.c.bf16 %v1087_v6, %v1087_v6  ;;  %v982_v16 = vpop.f32.mrb[58].mxu0 }
 0x16f   : > { %1565 = vst [vmem:[#allocation3 + $0x84] sm:$0xf] %v1416_v10  ;;  %1632 = vst [vmem:[#allocation3 + $0x7c] sm:$0x1] %v1631_v14  ;;  %v1421_v17 = vrot.slane %v1419_v11, 7  ;;  %v1058_v19 = vadd.f32 %v7041_v42, %v1021_v12  ;;  %v1022_v20 = vmul.f32 %v7036_v40, %v982_v16  ;;  %v6251_v21 = vpop.f32.mrb[59].mxu0 }
 0x170   : > { %v1428_v24 = vshrl.u32 %v5656_v15, 16  ;;  %v1431_v31 = vshll.u32 %v5656_v15, 16 }
 0x171   : > { %v1424_v25 = vor.u32 %v1422_v18, %v1421_v17  ;;  %v1426_v27 = vrot.slane %v1421_v17, 4  ;;  %v1088_v28 = vmax.f32 %v1058_v19, 0.0  ;;  %v1059_v29 = vadd.f32 %v7041_v42, %v1022_v20 }
 0x172   : > { %v1430_v30 = vrot.slane %v1428_v24, 7 }
 0x173   : > { %v1425_v32 = vsel %vm7057_vm6, %v1417_v22, %v1424_v25  ;;  %v1568_v33 = vsel %vm7071_vm8, %v1426_v27, %v1567_v23  ;;  %v5657_v35 = vpack.c.bf16 %v1088_v28, %v1088_v28  ;;  %v1089_v40 = vmax.f32 %v1059_v29, 0.0 }
 0x174   : > { %1566 = vst [vmem:[#allocation3 + $0x88] sm:$0xf] %v1425_v32  ;;  %1569 = vst [vmem:[#allocation3 + $0x8c] sm:$0x1] %v1568_v33  ;;  %v1433_v37 = vor.u32 %v1431_v31, %v1430_v30  ;;  %v1434_v46 = vrot.slane %v1430_v30, 4 }
 0x175   : > { %v1602_v36 = vld [vmem:[#allocation3 + $0x80] sm:$0x1]  ;;  %v1436_v39 = vshrl.u32 %v5657_v35, 16  ;;  %v5658_v42 = vpack.c.bf16 %v1089_v40, %v1089_v40  ;;  %v1439_v44 = vshll.u32 %v5657_v35, 16 }
 0x176   : > { %v1603_v38 = vsel %vm7071_vm8, 0, %v1602_v36  ;;  %v1571_v41 = vsel %vm7051_vm5, %v1433_v37, %v1570_v34 }
 0x177   : > { %1604 = vst [vmem:[#allocation3 + $0x80] sm:$0x1] %v1603_v38  ;;  %1572 = vst [vmem:[#allocation3 + $0x90] sm:$0xf] %v1571_v41  ;;  %v1438_v43 = vrot.slane %v1436_v39, 7  ;;  %v1445_v45 = vshrl.u32 %v5658_v42, 16 }
 0x178   : > { %v1448_v49 = vshll.u32 %v5658_v42, 16 }
 0x179   : > { %v1441_v47 = vor.u32 %v1439_v44, %v1438_v43  ;;  %v1447_v48 = vrot.slane %v1445_v45, 7  ;;  %v1443_v53 = vrot.slane %v1438_v43, 4 }
 0x17b   : > { %v1633_v51 = vld [vmem:[#allocation3 + $0x8c] sm:$0x1]  ;;  %v1442_v52 = vsel %vm7057_vm6, %v1434_v46, %v1441_v47  ;;  %v1450_v54 = vor.u32 %v1448_v49, %v1447_v48  ;;  %v1452_v55 = vrot.slane %v1447_v48, 4 }
 0x17c   : > { %v1634_v0 = vsel %vm7089_vm9, 0, %v1633_v51  ;;  %1573 = vst [vmem:[#allocation3 + $0x94] sm:$0xf] %v1442_v52 }
 0x17d   : > { %1635 = vst [vmem:[#allocation3 + $0x8c] sm:$0x1] %v1634_v0  ;;  %v1451_v56 = vsel %vm7057_vm6, %v1443_v53, %v1450_v54  ;;  %v1576_v57 = vsel %vm7071_vm8, %v1452_v55, %v1575_v50 }
 0x17e   : > { %v1605_v58 = vld [vmem:[#allocation3 + $0x90] sm:$0x1]  ;;  %1574 = vst [vmem:[#allocation3 + $0x98] sm:$0xf] %v1451_v56  ;;  %1577 = vst [vmem:[#allocation3 + $0x9c] sm:$0x1] %v1576_v57 }
 0x17f   : > { %v1606_v59 = vsel %vm7071_vm8, 0, %v1605_v58 }
 0x180   : > { %1607 = vst [vmem:[#allocation3 + $0x90] sm:$0x1] %v1606_v59 }
 0x181   : > { %1642 = sbr.rel (%p5291_p10) target bundleno = 392 (0x188), region = 72 }
 0x185   : > { %v1636_v61 = vld [vmem:[#allocation3 + $0x9c] sm:$0x1] }
 0x186   : > { %v1637_v62 = vsel %vm7089_vm9, 0, %v1636_v61 }
 0x187   : > { %1638 = vst [vmem:[#allocation3 + $0x9c] sm:$0x1] %v1637_v62 }
 0x188 PF: > { %p5292_p11 = scmp.ne.s32.totalorder %s6819_s21, 2 }
 0x189   : > { %v6840_v26 = vmov (!%p5292_p11), 0  }
 0x18a   : > { %1650 = sbr.rel (%p5292_p11) target bundleno = 401 (0x191), region = 76  ;;  %1652 = vst [vmem:[#allocation3 + $0x90] sm:$0xf] (!%p5292_p11), %v6840_v26  ;;  %1653 = vst [vmem:[#allocation3 + $0x94] sm:$0xf] (!%p5292_p11), %v6840_v26 }
 0x18b   : > { %1654 = vst [vmem:[#allocation3 + $0x98] sm:$0xf] (!%p5292_p11), %v6840_v26  ;;  %1655 = vst [vmem:[#allocation3 + $0x9c] sm:$0x1] (!%p5292_p11), %v6840_v26 }
 0x191 PF: > { %v6621_v60 = vld [vmem:[%s8151_s4 + $0x100] sm:$0xff]   ;;  %v6623_v1 = vld [vmem:[%s8151_s4 + $0x108] sm:$0xff]   ;;  %v6625_v3 = vld [vmem:[%s8151_s4 + $0x110] sm:$0xff]   ;;  %vm1756_vm10 = vsmask.f32 3328  ;;  %vm2239_vm13 = vcmask 1042432  }
 0x192   : > { %v6622_v63 = vld [vmem:[%s8151_s4 + $0xc0] sm:$0xff]   ;;  %5832 = vmatprep.subr.bf16.mxu0 %v6621_v60  ;;  %6412 = vmatprep.subr.bf16.mxu1 %v6621_v60  ;;  %v6624_v2 = vld [vmem:[%s8151_s4 + $0xc8] sm:$0xff]   ;;  %v6626_v4 = vld [vmem:[%s8151_s4 + $0xd0] sm:$0xff]   ;;  %vm1757_vm11 = vsmask.f32 7440  ;;  %vm2240_vm14 = vcmask 1046532  }
 0x193   : > { %5833 = vmatpush3.bf16.msra.mxu0 %v6622_v63  ;;  %6420 = vmatpush3.bf16.msra.mxu1 %v6622_v63  ;;  %v6627_v5 = vld [vmem:[%s8151_s4 + $0x118] sm:$0xff]   ;;  %v6629_v8 = vld [vmem:[%s8151_s4 + $0x120] sm:$0xff]   ;;  %v6631_v10 = vld [vmem:[%s8151_s4 + $0x128] sm:$0xff]  }
 0x194   : > { %5834 = vmatprep.subr.bf16.mxu0 %v6623_v1  ;;  %6413 = vmatprep.subr.bf16.mxu1 %v6623_v1  ;;  %v6628_v6 = vld [vmem:[%s8151_s4 + $0xd8] sm:$0xff]   ;;  %v6630_v9 = vld [vmem:[%s8151_s4 + $0xe0] sm:$0xff]   ;;  %v1659_v11 = vld [vmem:[#allocation3 + $0x10] sm:$0xf] }
 0x195   : > { %v1660_v12 = vld [vmem:[#allocation3 + $0x14] sm:$0xf]  ;;  %v1720_v13 = vld [vmem:[#allocation3 + $0x10] sm:$0xf]  ;;  %1689 = vst [vmem:[#allocation4 + $0x24] sm:$0xf] %v1659_v11  ;;  %vm7295_vm12 = vmor %vm1756_vm10, %vm1757_vm11 }
 0x196   : > { %1690 = vst [vmem:[#allocation4 + $0x30] sm:$0xf] %v1660_v12  ;;  %v1721_v14 = vld [vmem:[#allocation3 + $0x14] sm:$0xf]  ;;  %v1722_v15 = vld [vmem:[#allocation3 + $0x18] sm:$0xf]  ;;  %vm7504_vm15 = vmor %vm2239_vm13, %vm2240_vm14 }
 0x197   : > { %5835 = vmatpush3.bf16.msra.mxu0 %v6624_v2  ;;  %6421 = vmatpush3.bf16.msra.mxu1 %v6624_v2  ;;  %v1794_v16 = vshrl.u32 %v1720_v13, 16  ;;  %v1797_v17 = vshll.u32 %v1720_v13, 16  ;;  %v1803_v18 = vshll.u32 %v1721_v14, 16  ;;  %v6632_v19 = vld [vmem:[%s8151_s4 + $0xe8] sm:$0xff]   ;;  %v1807_v20 = vshrl.u32 %v1721_v14, 16  ;;  %v6633_v24 = vld [vmem:[%s8151_s4 + $0x130] sm:$0xff]  }
 0x198   : > { %5836 = vmatprep.subr.bf16.mxu0 %v6625_v3  ;;  %6414 = vmatprep.subr.bf16.mxu1 %v6625_v3  ;;  %v1813_v21 = vshll.u32 %v1722_v15, 16  ;;  %v1817_v22 = vshrl.u32 %v1722_v15, 16  ;;  %v1667_v23 = vld [vmem:[#allocation3 + $0x38] sm:$0xf]  ;;  %v1668_v29 = vld [vmem:[#allocation3 + $0x40] sm:$0xf] }
 0x199   : > { %v1796_v25 = vrot.slane %v1794_v16, 4  ;;  %v1799_v27 = vrot.slane %v1797_v17, 5  ;;  %v1805_v28 = vrot.slane %v1803_v18, 5  ;;  %1697 = vst [vmem:[#allocation4 + $0x84] sm:$0xf] %v1667_v23  ;;  %v6634_v30 = vld [vmem:[%s8151_s4 + $0xf0] sm:$0xff]  }
 0x19a   : > { %v1809_v31 = vrot.slane %v1807_v20, 4  ;;  %v1815_v32 = vrot.slane %v1813_v21, 5  ;;  %v1819_v33 = vrot.slane %v1817_v22, 4  ;;  %1698 = vst [vmem:[#allocation4 + $0x90] sm:$0xf] %v1668_v29  ;;  %v6635_v35 = vld [vmem:[%s8151_s4 + $0x138] sm:$0xff]  }
 0x19b   : > { %5837 = vmatpush3.bf16.msra.mxu0 %v6626_v4  ;;  %6422 = vmatpush3.bf16.msra.mxu1 %v6626_v4  ;;  %v1730_v34 = vld [vmem:[#allocation3 + $0x38] sm:$0xf]  ;;  %v1800_v40 = vor.u32 %v1799_v27, %v1796_v25  ;;  %v1731_v36 = vld [vmem:[#allocation3 + $0x3c] sm:$0x1]  ;;  %v1732_v37 = vld [vmem:[#allocation3 + $0x40] sm:$0xf] }
 0x19c   : > { %5838 = vmatprep.subr.bf16.mxu0 %v6627_v5  ;;  %6415 = vmatprep.subr.bf16.mxu1 %v6627_v5  ;;  %v1733_v38 = vld [vmem:[#allocation3 + $0x44] sm:$0xf]  ;;  %v1810_v42 = vor.u32 %v1809_v31, %v1805_v28  ;;  %v1881_v41 = vshll.u32 %v1730_v34, 16  ;;  %v1885_v43 = vshrl.u32 %v1730_v34, 16  ;;  %v1891_v45 = vshll.u32 %v1731_v36, 16  ;;  %v7309_v56 = vld [vmem:[%s8151_s4 + $0x140] sm:$0xff]  }
 0x19d   : > { %v1801_v44 = vrot.slane %v1800_v40, 4  ;;  %v1896_v46 = vshrl.u32 %v1732_v37, 16  ;;  %v1899_v47 = vshll.u32 %v1732_v37, 16  ;;  %v6636_v48 = vld [vmem:[%s8151_s4 + $0xf8] sm:$0xff]   ;;  %v1820_v50 = vor.u32 %v1819_v33, %v1815_v32  ;;  %v6643_v57 = vld [vmem:[%s8151_s4 + $0x40] sm:$0xff]   ;;  %v6645_v40 = vld [vmem:[%s8151_s4 + $0x48] sm:$0xff]  }
 0x19e   : > { %v1811_v49 = vrot.slane %v1810_v42, 4  ;;  %v7302_v51 = vrot.slane %v1881_v41, 5  ;;  %v1887_v52 = vrot.slane %v1885_v43, 4  ;;  %v1893_v54 = vrot.slane %v1891_v45, 5  ;;  %v1661_v1 = vld [vmem:[#allocation3 + $0x18] sm:$0xf] }
 0x19f   : > { %5839 = vmatpush3.bf16.msra.mxu0 %v6628_v6  ;;  %6423 = vmatpush3.bf16.msra.mxu1 %v6628_v6  ;;  %v1806_v53 = vsel %vm7295_vm12, %v1801_v44, %v1805_v28  ;;  %v1898_v55 = vrot.slane %v1896_v46, 4  ;;  %v1901_v0 = vrot.slane %v1899_v47, 5  ;;  %v1905_v61 = vshll.u32 %v1733_v38, 16  ;;  %v1662_v3 = vld [vmem:[#allocation3 + $0x20] sm:$0xf]  ;;  %v6644_v22 = vld [vmem:[%s8151_s4] sm:$0xff]  }
 0x1a0   : > { %5840 = vmatprep.subr.bf16.mxu0 %v6629_v8  ;;  %6416 = vmatprep.subr.bf16.mxu1 %v6629_v8  ;;  %v1816_v58 = vsel %vm7295_vm12, %v1811_v49, %v1815_v32  ;;  %2132 = vst [vmem:[#allocation4 + $0x28] sm:$0xf] %v1806_v53  ;;  %v1888_v59 = vor.u32 %v1887_v52, %v7302_v51  ;;  %v1909_v62 = vshrl.u32 %v1733_v38, 16  ;;  %1691 = vst [vmem:[#allocation4 + $0x3c] sm:$0xf] %v1661_v1  ;;  %v6646_v41 = vld [vmem:[%s8151_s4 + $0x8] sm:$0xff]  }
 0x1a1   : > { %2133 = vst [vmem:[#allocation4 + $0x34] sm:$0xf] %v1816_v58  ;;  %v1902_v7 = vor.u32 %v1901_v0, %v1898_v55  ;;  %v1907_v60 = vrot.slane %v1905_v61, 5  ;;  %v1723_v4 = vld [vmem:[#allocation3 + $0x1c] sm:$0x1]  ;;  %v1821_v5 = vrot.slane %v1820_v50, 4 }
 0x1a2   : > { %v1889_v26 = vrot.slane %v1888_v59, 4  ;;  %v1911_v63 = vrot.slane %v1909_v62, 4  ;;  %1692 = vst [vmem:[#allocation4 + $0x48] sm:$0xf] %v1662_v3  ;;  %v1823_v11 = vshll.u32 %v1723_v4, 16  ;;  %v6651_v47 = vld [vmem:[%s8151_s4 + $0x148] sm:$0xff]  }
 0x1a3   : > { %5841 = vmatpush3.bf16.msra.mxu0 %v6630_v9  ;;  %6424 = vmatpush3.bf16.msra.mxu1 %v6630_v9  ;;  %v1903_v2 = vrot.slane %v1902_v7, 4  ;;  %v1724_v9 = vld [vmem:[#allocation3 + $0x20] sm:$0xf]  ;;  %v1669_v16 = vld [vmem:[#allocation3 + $0x44] sm:$0xf]  ;;  %v6653_v55 = vld [vmem:[%s8151_s4 + $0x10] sm:$0xff]  }
 0x1a4   : > { %5842 = vmatprep.subr.bf16.mxu0 %v6631_v10  ;;  %6417 = vmatprep.subr.bf16.mxu1 %v6631_v10  ;;  %v1894_v6 = vsel %vm7295_vm12, %v1889_v26, %v1893_v54  ;;  %v1912_v8 = vor.u32 %v1911_v63, %v1907_v60  ;;  %v1725_v10 = vld [vmem:[#allocation3 + $0x24] sm:$0xf]  ;;  %v1828_v13 = vshrl.u32 %v1724_v9, 16  ;;  %v1831_v14 = vshll.u32 %v1724_v9, 16  ;;  %v1670_v20 = vld [vmem:[#allocation3 + $0x48] sm:$0xf] }
 0x1a5   : > { %v1908_v12 = vsel %vm7295_vm12, %v1903_v2, %v1907_v60  ;;  %2140 = vst [vmem:[#allocation4 + $0x88] sm:$0xf] %v1894_v6  ;;  %v1837_v15 = vshll.u32 %v1725_v10, 16  ;;  %v1825_v18 = vrot.slane %v1823_v11, 5  ;;  %1699 = vst [vmem:[#allocation4 + $0x9c] sm:$0xf] %v1669_v16 }
 0x1a6   : > { %v1913_v17 = vrot.slane %v1912_v8, 4  ;;  %2141 = vst [vmem:[#allocation4 + $0x94] sm:$0xf] %v1908_v12  ;;  %v1830_v23 = vrot.slane %v1828_v13, 4  ;;  %1700 = vst [vmem:[#allocation4 + $0xa8] sm:$0xf] %v1670_v20 }
 0x1a7   : > { %5843 = vmatpush3.bf16.msra.mxu0 %v6632_v19  ;;  %6425 = vmatpush3.bf16.msra.mxu1 %v6632_v19  ;;  %v1841_v19 = vshrl.u32 %v1725_v10, 16  ;;  %v7322_v21 = vld [vmem:[#allocation4 + $0x24] sm:$0xff]  ;;  %v1839_v25 = vrot.slane %v1837_v15, 5  ;;  %v1826_v29 = vsel %vm7295_vm12, %v1821_v5, %v1825_v18  ;;  %v6652_v54 = vld [vmem:[%s8151_s4 + $0x50] sm:$0xff]   ;;  %v1727_v62 = vld [vmem:[#allocation3 + $0x2c] sm:$0x1] }
 0x1a8   : > { %5844 = vmatprep.subr.bf16.mxu0 %v6633_v24  ;;  %6418 = vmatprep.subr.bf16.mxu1 %v6633_v24  ;;  %v1833_v24 = vrot.slane %v1831_v14, 5  ;;  %v1734_v27 = vld [vmem:[#allocation3 + $0x48] sm:$0xf]  ;;  %v7327_v28 = vld [vmem:[#allocation4 + $0x30] sm:$0xff]  ;;  %2134 = vst [vmem:[#allocation4 + $0x40] sm:$0xf] %v1826_v29 }
 0x1a9   : > { %v1915_v31 = vshll.u32 %v1734_v27, 16  ;;  %v1919_v32 = vshrl.u32 %v1734_v27, 16  ;;  %v1843_v33 = vrot.slane %v1841_v19, 4  ;;  %v5351_v34 = vcombine.low %v7322_v21, %v7327_v28  ;;  %v6639_v49 = vld [vmem:[#allocation4 + $0x84] ss:$12 sps:$4 sm:$0xff]   ;;  %v6660_v63 = vld [vmem:[%s8151_s4 + $0x150] sm:$0xff]  }
 0x1aa   : > { %v1834_v36 = vor.u32 %v1833_v24, %v1830_v23  ;;  %v1663_v0 = vld [vmem:[#allocation3 + $0x24] sm:$0xf]  ;;  %v1726_v58 = vld [vmem:[#allocation3 + $0x28] sm:$0xf]  ;;  %v1857_v2 = vshll.u32 %v1727_v62, 16 }
 0x1ab   : > { %5845 = vmatpush3.bf16.msra.mxu0 %v6634_v30  ;;  %6426 = vmatpush3.bf16.msra.mxu1 %v6634_v30  ;;  %v1735_v30 = vld [vmem:[#allocation3 + $0x4c] sm:$0x1]  ;;  %v1917_v38 = vrot.slane %v1915_v31, 5  ;;  %v1921_v42 = vrot.slane %v1919_v32, 4  ;;  %v6654_v61 = vld [vmem:[%s8151_s4 + $0x58] sm:$0xff]   ;;  %v1847_v26 = vshll.u32 %v1726_v58, 16 }
 0x1ac   : > { %5846 = vmatprep.subr.bf16.mxu0 %v6635_v35  ;;  %6419 = vmatprep.subr.bf16.mxu1 %v6635_v35  ;;  %v5352_v35 = vcombine.high %v7322_v21, %v7327_v28  ;;  %v1925_v37 = vshll.u32 %v1735_v30, 16  ;;  %v1835_v43 = vrot.slane %v1834_v36, 4  ;;  %1693 = vst [vmem:[#allocation4 + $0x54] sm:$0xf] %v1663_v0  ;;  %v1851_v60 = vshrl.u32 %v1726_v58, 16  ;;  %v6655_v15 = vld [vmem:[%s8151_s4 + $0x18] sm:$0xff]  }
 0x1ad   : > { %v1918_v44 = vsel %vm7295_vm12, %v1913_v17, %v1917_v38  ;;  %v1922_v45 = vor.u32 %v1921_v42, %v1917_v38  ;;  %v6641_v50 = vld [vmem:[#allocation4 + $0x88] ss:$12 sps:$4 sm:$0xff]   ;;  %v1671_v3 = vld [vmem:[#allocation3 + $0x50] sm:$0xf]  ;;  %v1849_v5 = vrot.slane %v1847_v26, 5  ;;  %v1859_v10 = vrot.slane %v1857_v2, 5 }
 0x1ae   : > { %2964 = vmatprep.mubr.bf16.mxu0 %v5352_v35  ;;  %v1927_v46 = vrot.slane %v1925_v37, 5  ;;  %v1840_v52 = vsel %vm7295_vm12, %v1835_v43, %v1839_v25  ;;  %2142 = vst [vmem:[#allocation4 + $0xa0] sm:$0xf] %v1918_v44  ;;  %2996 = vmatprep.mubr.bf16.mxu1 %v6641_v50  ;;  %v1672_v4 = vld [vmem:[#allocation3 + $0x54] sm:$0xf]  ;;  %v1853_v6 = vrot.slane %v1851_v60, 4 }
 0x1af   : > { %5847 = vmatpush3.bf16.msra.mxu0 %v6636_v48  ;;  %6427 = vmatpush3.bf16.msra.mxu1 %v6636_v48  ;;  %v1844_v48 = vor.u32 %v1843_v33, %v1839_v25  ;;  %2135 = vst [vmem:[#allocation4 + $0x4c] sm:$0xf] %v1840_v52  ;;  %v1923_v53 = vrot.slane %v1922_v45, 4  ;;  %v7363_v1 = vld [vmem:[#allocation4 + $0x3c] sm:$0xff]  ;;  %1701 = vst [vmem:[#allocation4 + $0xb4] sm:$0xf] %v1671_v3 }
 0x1b0   : > { %6252 = vmatprep.subr.bf16.mxu1 %v7309_v56  ;;  %5940 = vmatprep.subr.bf16.mxu0 %v6643_v57  ;;  %v1664_v57 = vld [vmem:[#allocation3 + $0x28] sm:$0xf]  ;;  %1702 = vst [vmem:[#allocation4 + $0xc0] sm:$0xf] %v1672_v4  ;;  %v1736_v8 = vld [vmem:[#allocation3 + $0x50] sm:$0xf]  ;;  %v1854_v17 = vor.u32 %v1853_v6, %v1849_v5 }
 0x1b1   : > { %v1928_v59 = vsel %vm7295_vm12, %v1923_v53, %v1927_v46  ;;  %1694 = vst [vmem:[#allocation4 + $0x60] sm:$0xf] %v1664_v57  ;;  %v1845_v7 = vrot.slane %v1844_v48, 4  ;;  %v1737_v9 = vld [vmem:[#allocation3 + $0x54] sm:$0xf]  ;;  %v1930_v12 = vshrl.u32 %v1736_v8, 16 }
 0x1b2   : > { %2965 = vmatmul.mubr.bf16.vlgmr.msra.gmra.mrb[60].mxu0 %v5351_v34  ;;  %2997 = vmatmul.mubr.bf16.vlgmr.msra.gmra.mrb[0].mxu1 %v6639_v49  ;;  %2143 = vst [vmem:[#allocation4 + $0xac] sm:$0xf] %v1928_v59  ;;  %v1738_v11 = vld [vmem:[#allocation3 + $0x58] sm:$0xf]  ;;  %v1933_v13 = vshll.u32 %v1736_v8, 16  ;;  %v1943_v18 = vshrl.u32 %v1737_v9, 16 }
 0x1b3   : > { %5941 = vmatpush3.bf16.msra.mxu0 %v6644_v22  ;;  %6253 = vmatpush3.bf16.msra.mxu1 %v7309_v56  ;;  %v1939_v56 = vshll.u32 %v1737_v9, 16  ;;  %v1850_v16 = vsel %vm7295_vm12, %v1845_v7, %v1849_v5  ;;  %v1949_v19 = vshll.u32 %v1738_v11, 16  ;;  %v1932_v22 = vrot.slane %v1930_v12, 4  ;;  %v6661_v27 = vld [vmem:[%s8151_s4 + $0x60] sm:$0xff]   ;;  %v6669_v29 = vld [vmem:[%s8151_s4 + $0x158] sm:$0xff]   ;;  %v6664_v0 = vld [vmem:[%s8151_s4 + $0x28] sm:$0xff]  }
 0x1b4   : > { %5942 = vmatprep.subr.bf16.mxu0 %v6645_v40  ;;  %6254 = vmatprep.subr.bf16.mxu1 %v6651_v47  ;;  %2136 = vst [vmem:[#allocation4 + $0x58] sm:$0xf] %v1850_v16  ;;  %v1935_v23 = vrot.slane %v1933_v13, 5  ;;  %v1953_v25 = vshrl.u32 %v1738_v11, 16  ;;  %v1855_v32 = vrot.slane %v1854_v17, 4  ;;  %v1945_v33 = vrot.slane %v1943_v18, 4 }
 0x1b5   : > { %v2519_v14 = vld [vmem:[#allocation4 + $0x9c] sm:$0xff]  ;;  %v1941_v24 = vrot.slane %v1939_v56, 5  ;;  %v1951_v35 = vrot.slane %v1949_v19, 5  ;;  %v6662_v44 = vld [vmem:[%s8151_s4 + $0x20] sm:$0xff]   ;;  %v1665_v48 = vld [vmem:[#allocation3 + $0x30] sm:$0xf] }
 0x1b6   : > { %v7370_v20 = vld [vmem:[#allocation4 + $0x48] sm:$0xff]  ;;  %v1936_v34 = vor.u32 %v1935_v23, %v1932_v22  ;;  %v1955_v40 = vrot.slane %v1953_v25, 4  ;;  %v1860_v37 = vsel %vm7295_vm12, %v1855_v32, %v1859_v10  ;;  %v1666_v50 = vld [vmem:[#allocation3 + $0x34] sm:$0xf]  ;;  %1695 = vst [vmem:[#allocation4 + $0x6c] sm:$0xf] %v1665_v48 }
 0x1b7   : > { %5943 = vmatpush3.bf16.msra.mxu0 %v6646_v41  ;;  %6255 = vmatpush3.bf16.msra.mxu1 %v6651_v47  ;;  %v5355_v30 = vcombine.high %v7363_v1, %v7370_v20  ;;  %v5354_v31 = vcombine.low %v7363_v1, %v7370_v20  ;;  %v1946_v38 = vor.u32 %v1945_v33, %v1941_v24  ;;  %v6663_v47 = vld [vmem:[%s8151_s4 + $0x68] sm:$0xff]   ;;  %v1674_v7 = vld [vmem:[#allocation3 + $0x60] sm:$0xf]  ;;  %v1739_v26 = vld [vmem:[#allocation3 + $0x5c] sm:$0x1] }
 0x1b8   : > { %5944 = vmatprep.subr.bf16.mxu0 %v6652_v54  ;;  %6256 = vmatprep.subr.bf16.mxu1 %v6660_v63  ;;  %2137 = vst [vmem:[#allocation4 + $0x64] sm:$0xf] %v1860_v37  ;;  %v1937_v43 = vrot.slane %v1936_v34, 4  ;;  %v1956_v45 = vor.u32 %v1955_v40, %v1951_v35  ;;  %v1728_v52 = vld [vmem:[#allocation3 + $0x30] sm:$0xf]  ;;  %v1959_v5 = vshll.u32 %v1739_v26, 16 }
 0x1b9   : > { %2972 = vmatprep.mubr.bf16.mxu0 %v5355_v30  ;;  %v2521_v36 = vld [vmem:[#allocation4 + $0xa8] sm:$0xff]  ;;  %v1947_v46 = vrot.slane %v1946_v38, 4  ;;  %v1729_v53 = vld [vmem:[#allocation3 + $0x34] sm:$0xf]  ;;  %1696 = vst [vmem:[#allocation4 + $0x78] sm:$0xf] %v1666_v50 }
 0x1ba   : > { %v5367_v42 = vcombine.high %v2519_v14, %v2521_v36  ;;  %2973 = vmatmul.mubr.bf16.gmra.mrb[64].mxu0 %v5354_v31  ;;  %v5366_v41 = vcombine.low %v2519_v14, %v2521_v36  ;;  %v1942_v49 = vsel %vm7295_vm12, %v1937_v43, %v1941_v24  ;;  %v1862_v57 = vshrl.u32 %v1728_v52, 16  ;;  %1704 = vst [vmem:[#allocation4 + $0xd8] sm:$0xf] %v1674_v7  ;;  %v1740_v4 = vld [vmem:[#allocation3 + $0x60] sm:$0xf]  ;;  %v6670_v11 = vld [vmem:[%s8151_s4 + $0x70] sm:$0xff]  }
 0x1bb   : > { %5945 = vmatpush3.bf16.msra.mxu0 %v6653_v55  ;;  %6257 = vmatpush3.bf16.msra.mxu1 %v6660_v63  ;;  %v7392_v54 = vld [vmem:[#allocation4 + $0x54] sm:$0xff]  ;;  %v1952_v55 = vsel %vm7295_vm12, %v1947_v46, %v1951_v35  ;;  %2144 = vst [vmem:[#allocation4 + $0xb8] sm:$0xf] %v1942_v49  ;;  %v1865_v58 = vshll.u32 %v1728_v52, 16  ;;  %v1871_v59 = vshll.u32 %v1729_v53, 16  ;;  %v1875_v62 = vshrl.u32 %v1729_v53, 16 }
 0x1bc   : > { %5946 = vmatprep.subr.bf16.mxu0 %v6654_v61  ;;  %6258 = vmatprep.subr.bf16.mxu1 %v6669_v29  ;;  %v1673_v61 = vld [vmem:[#allocation3 + $0x58] sm:$0xf]  ;;  %2145 = vst [vmem:[#allocation4 + $0xc4] sm:$0xf] %v1952_v55  ;;  %v1957_v60 = vrot.slane %v1956_v45, 4  ;;  %v1864_v63 = vrot.slane %v1862_v57, 4 }
 0x1bd   : > { %3004 = vmatprep.mubr.bf16.mxu1 %v5367_v42  ;;  %1703 = vst [vmem:[#allocation4 + $0xcc] sm:$0xf] %v1673_v61  ;;  %v1867_v2 = vrot.slane %v1865_v58, 5  ;;  %v1873_v3 = vrot.slane %v1871_v59, 5  ;;  %v1877_v6 = vrot.slane %v1875_v62, 4  ;;  %v1964_v9 = vshrl.u32 %v1740_v4, 16 }
 0x1be   : > { %3005 = vmatmul.mubr.bf16.gmra.mrb[4].mxu1 %v5366_v41  ;;  %v1741_v8 = vld [vmem:[#allocation3 + $0x64] sm:$0xf]  ;;  %v1967_v10 = vshll.u32 %v1740_v4, 16  ;;  %v1961_v56 = vrot.slane %v1959_v5, 5  ;;  %v6671_v16 = vld [vmem:[%s8151_s4 + $0x30] sm:$0xff]   ;;  %v6679_v30 = vld [vmem:[%s8151_s4 + $0x160] sm:$0xff]  }
 0x1bf   : > { %5947 = vmatpush3.bf16.msra.mxu0 %v6655_v15  ;;  %6259 = vmatpush3.bf16.msra.mxu1 %v6669_v29  ;;  %v7402_v12 = vld [vmem:[#allocation4 + $0x60] sm:$0xff]  ;;  %v1868_v13 = vor.u32 %v1867_v2, %v1864_v63  ;;  %v1973_v14 = vshll.u32 %v1741_v8, 16  ;;  %v1977_v15 = vshrl.u32 %v1741_v8, 16  ;;  %v1878_v19 = vor.u32 %v1877_v6, %v1873_v3  ;;  %v1742_v45 = vld [vmem:[#allocation3 + $0x68] sm:$0xf]  ;;  %v6685_v2 = vld [vmem:[%s8151_s4 + $0x170] sm:$0xff]  }
 0x1c0   : > { %5948 = vmatprep.subr.bf16.mxu0 %v6661_v27  ;;  %v5358_v17 = vcombine.high %v7392_v54, %v7402_v12  ;;  %v5357_v18 = vcombine.low %v7392_v54, %v7402_v12  ;;  %v1966_v22 = vrot.slane %v1964_v9, 4  ;;  %v6672_v23 = vld [vmem:[%s8151_s4 + $0x78] sm:$0xff]   ;;  %v1962_v25 = vsel %vm7295_vm12, %v1957_v60, %v1961_v56  ;;  %6260 = vmatprep.subr.bf16.mxu1 %v6679_v30  ;;  %v1743_v48 = vld [vmem:[#allocation3 + $0x6c] sm:$0x1]  ;;  %v7440_v62 = vld [vmem:[#allocation3 + $0x8] sm:$0xf] }
 0x1c1   : > { %v1869_v24 = vrot.slane %v1868_v13, 4  ;;  %v1969_v27 = vrot.slane %v1967_v10, 5  ;;  %v1975_v29 = vrot.slane %v1973_v14, 5  ;;  %v1879_v32 = vrot.slane %v1878_v19, 4  ;;  %2146 = vst [vmem:[#allocation4 + $0xd0] sm:$0xf] %v1962_v25 }
 0x1c2   : > { %2980 = vmatprep.mubr.bf16.mxu0 %v5358_v17  ;;  %v7419_v31 = vld [vmem:[#allocation4 + $0xb4] sm:$0xff]  ;;  %v6673_v40 = vld [vmem:[%s8151_s4 + $0x38] sm:$0xff]   ;;  %v1979_v36 = vrot.slane %v1977_v15, 4  ;;  %v1983_v49 = vshll.u32 %v1742_v45, 16  ;;  %v1993_v55 = vshll.u32 %v1743_v48, 16  ;;  %v1779_v6 = vshll.u32 %v7440_v62, 16 }
 0x1c3   : > { %5949 = vmatpush3.bf16.msra.mxu0 %v6662_v44  ;;  %v7421_v33 = vld [vmem:[#allocation4 + $0xc0] sm:$0xff]  ;;  %v1874_v34 = vsel %vm7295_vm12, %v1869_v24, %v1873_v3  ;;  %v1970_v35 = vor.u32 %v1969_v27, %v1966_v22  ;;  %v1884_v42 = vsel %vm7295_vm12, %v1879_v32, %v7302_v51  ;;  %6261 = vmatpush3.bf16.msra.mxu1 %v6679_v30  ;;  %v1676_v44 = vld [vmem:[#allocation3 + $0x68] sm:$0xf]  ;;  %v1987_v51 = vshrl.u32 %v1742_v45, 16  ;;  %v1677_v19 = vld [vmem:[#allocation3 + $0x70] sm:$0xf] }
 0x1c4   : > { %5950 = vmatprep.subr.bf16.mxu0 %v6663_v47  ;;  %2981 = vmatmul.mubr.bf16.gmra.mrb[68].mxu0 %v5357_v18  ;;  %v5370_v37 = vcombine.high %v7419_v31, %v7421_v33  ;;  %v5369_v38 = vcombine.low %v7419_v31, %v7421_v33  ;;  %2138 = vst [vmem:[#allocation4 + $0x70] sm:$0xf] %v1874_v34  ;;  %v1675_v41 = vld [vmem:[#allocation3 + $0x64] sm:$0xf]  ;;  %2139 = vst [vmem:[#allocation4 + $0x7c] sm:$0xf] %v1884_v42 }
 0x1c5   : > { %v1971_v43 = vrot.slane %v1970_v35, 4  ;;  %1705 = vst [vmem:[#allocation4 + $0xe4] sm:$0xf] %v1675_v41  ;;  %v1980_v46 = vor.u32 %v1979_v36, %v1975_v29  ;;  %v6682_v47 = vld [vmem:[%s8151_s4 + $0x168] sm:$0xff]   ;;  %1706 = vst [vmem:[#allocation4 + $0xf0] sm:$0xf] %v1676_v44 }
 0x1c6   : > { %3012 = vmatprep.mubr.bf16.mxu1 %v5370_v37  ;;  %v1656_v50 = vld [vmem:[#allocation3] sm:$0xf]  ;;  %6262 = vmatprep.subr.bf16.mxu1 %v6682_v47  ;;  %v1985_v58 = vrot.slane %v1983_v49, 5  ;;  %v1989_v59 = vrot.slane %v1987_v51, 4  ;;  %v1717_v61 = vld [vmem:[#allocation3 + $0x4] sm:$0xf] }
 0x1c7   : > { %5951 = vmatpush3.bf16.msra.mxu0 %v6664_v0  ;;  %3013 = vmatmul.mubr.bf16.gmra.mrb[8].mxu1 %v5369_v38  ;;  %v1976_v52 = vsel %vm7295_vm12, %v1971_v43, %v1975_v29  ;;  %v1981_v53 = vrot.slane %v1980_v46, 4  ;;  %v1657_v0 = vld [vmem:[#allocation3 + $0x4] sm:$0xf]  ;;  %1686 = vst [vmem:[#allocation4] sm:$0xf] %v1656_v50  ;;  %v1995_v7 = vrot.slane %v1993_v55, 5 }
 0x1c8   : > { %5952 = vmatprep.subr.bf16.mxu0 %v6670_v11  ;;  %v1716_v57 = vld [vmem:[#allocation3] sm:$0xf]  ;;  %2147 = vst [vmem:[#allocation4 + $0xdc] sm:$0xf] %v1976_v52  ;;  %1687 = vst [vmem:[#allocation4 + $0xc] sm:$0xf] %v1657_v0  ;;  %6263 = vmatpush3.bf16.msra.mxu1 %v6682_v47  ;;  %v1990_v4 = vor.u32 %v1989_v59, %v1985_v58 }
 0x1c9   : > { %v1760_v26 = vshrl.u32 %v1716_v57, 16  ;;  %v1763_v60 = vshll.u32 %v1716_v57, 16  ;;  %v1769_v63 = vshll.u32 %v1717_v61, 16  ;;  %v1986_v3 = vsel %vm7295_vm12, %v1981_v53, %v1985_v58  ;;  %v7450_v9 = vld [vmem:[#allocation4 + $0xcc] sm:$0xff]  ;;  %6264 = vmatprep.subr.bf16.mxu1 %v6685_v2  ;;  %v6689_v14 = vld [vmem:[%s8151_s4 + $0x178] sm:$0xff]  }
 0x1ca   : > { %v1773_v5 = vshrl.u32 %v1717_v61, 16  ;;  %2148 = vst [vmem:[#allocation4 + $0xe8] sm:$0xf] %v1986_v3  ;;  %v1783_v56 = vshrl.u32 %v7440_v62, 16  ;;  %v7458_v18 = vrot.slane %v1779_v6, 5  ;;  %v7471_v44 = vld [vmem:[%s8151_s4 + $0x80] sm:$0xff]  }
 0x1cb   : > { %5953 = vmatpush3.bf16.msra.mxu0 %v6671_v16  ;;  %v7448_v8 = vld [vmem:[#allocation4 + $0x6c] sm:$0xff]  ;;  %v1762_v10 = vrot.slane %v1760_v26, 4  ;;  %v1765_v11 = vrot.slane %v1763_v60, 5  ;;  %v1771_v13 = vrot.slane %v1769_v63, 5  ;;  %v7456_v15 = vld [vmem:[#allocation4 + $0x78] sm:$0xff]  ;;  %v1991_v16 = vrot.slane %v1990_v4, 4 }
 0x1cc   : > { %5954 = vmatprep.subr.bf16.mxu0 %v6672_v23  ;;  %v1775_v17 = vrot.slane %v1773_v5, 4  ;;  %6265 = vmatpush3.bf16.msra.mxu1 %v6685_v2  ;;  %v5361_v22 = vcombine.high %v7448_v8, %v7456_v15  ;;  %v5360_v23 = vcombine.low %v7448_v8, %v7456_v15  ;;  %v1678_v25 = vld [vmem:[#allocation3 + $0x74] sm:$0xf]  ;;  %1707 = vst [vmem:[#allocation4 + $0xfc] sm:$0xf] %v1677_v19  ;;  %v1785_v58 = vrot.slane %v1783_v56, 4 }
 0x1cd   : > { %v1766_v24 = vor.u32 %v1765_v11, %v1762_v10  ;;  %v1744_v27 = vld [vmem:[#allocation3 + $0x70] sm:$0xf]  ;;  %v1745_v29 = vld [vmem:[#allocation3 + $0x74] sm:$0xf]  ;;  %6266 = vmatprep.subr.bf16.mxu1 %v6689_v14  ;;  %v1996_v30 = vsel %vm7295_vm12, %v1991_v16, %v1995_v7  ;;  %1708 = vst [vmem:[#allocation4 + $0x108] sm:$0xf] %v1678_v25  ;;  %v5436_v2 = vcombine.high %v7421_v33, %v7450_v9 }
 0x1ce   : > { %v1776_v32 = vor.u32 %v1775_v17, %v1771_v13  ;;  %v1746_v34 = vld [vmem:[#allocation3 + $0x78] sm:$0xf]  ;;  %v1998_v35 = vshrl.u32 %v1744_v27, 16  ;;  %v1658_v36 = vld [vmem:[#allocation3 + $0x8] sm:$0xf]  ;;  %2988 = vmatprep.mubr.bf16.mxu0 %v5361_v22  ;;  %v2007_v42 = vshll.u32 %v1745_v29, 16  ;;  %v1786_v3 = vor.u32 %v1785_v58, %v7458_v18 }
 0x1cf   : > { %5955 = vmatpush3.bf16.msra.mxu0 %v6673_v40  ;;  %v2001_v40 = vshll.u32 %v1744_v27, 16  ;;  %v7466_v37 = vld [vmem:[#allocation4 + $0xd8] sm:$0xff]  ;;  %2149 = vst [vmem:[#allocation4 + $0xf4] sm:$0xf] %v1996_v30  ;;  %v1767_v38 = vrot.slane %v1766_v24, 4  ;;  %v2011_v41 = vshrl.u32 %v1745_v29, 16 }
 0x1d0   : > { %v2017_v43 = vshll.u32 %v1746_v34, 16  ;;  %1688 = vst [vmem:[#allocation4 + $0x18] sm:$0xf] %v1658_v36  ;;  %v5373_v45 = vcombine.high %v7450_v9, %v7466_v37  ;;  %2989 = vmatmul.mubr.bf16.gmra.mrb[72].mxu0 %v5360_v23  ;;  %v5372_v46 = vcombine.low %v7450_v9, %v7466_v37  ;;  %v1777_v47 = vrot.slane %v1776_v32, 4  ;;  %v1719_v49 = vld [vmem:[#allocation3 + $0xc] sm:$0x1]  ;;  %6267 = vmatpush3.bf16.msra.mxu1 %v6689_v14 }
 0x1d1   : > { %v2000_v48 = vrot.slane %v1998_v35, 4  ;;  %v1772_v51 = vsel %vm7295_vm12, %v1767_v38, %v1771_v13  ;;  %v2003_v50 = vrot.slane %v2001_v40, 5  ;;  %v2009_v52 = vrot.slane %v2007_v42, 5  ;;  %6292 = vmatprep.subr.bf16.mxu1 %v7471_v44  ;;  %v1679_v59 = vld [vmem:[#allocation3 + $0x78] sm:$0xf]  ;;  %v7483_v61 = vld [vmem:[#allocation4 + $0xe4] sm:$0xff] }
 0x1d2   : > { %v2013_v53 = vrot.slane %v2011_v41, 4  ;;  %3020 = vmatprep.mubr.bf16.mxu1 %v5373_v45  ;;  %v1782_v55 = vsel %vm7295_vm12, %v1777_v47, %v7458_v18  ;;  %2129 = vst [vmem:[#allocation4 + $0x4] sm:$0xf] %v1772_v51  ;;  %v2019_v0 = vrot.slane %v2017_v43, 5  ;;  %v2021_v57 = vshrl.u32 %v1746_v34, 16 }
 0x1d3   : > { %3021 = vmatmul.mubr.bf16.gmra.mrb[12].mxu1 %v5372_v46  ;;  %2130 = vst [vmem:[#allocation4 + $0x10] sm:$0xf] %v1782_v55  ;;  %v2004_v62 = vor.u32 %v2003_v50, %v2000_v48  ;;  %v1789_v26 = vshll.u32 %v1719_v49, 16  ;;  %v1680_v60 = vld [vmem:[#allocation3 + $0x80] sm:$0xf]  ;;  %v1787_v17 = vrot.slane %v1786_v3, 4  ;;  %v5435_v3 = vcombine.low %v7421_v33, %v7450_v9 }
 0x1d4   : > { %v2014_v7 = vor.u32 %v2013_v53, %v2009_v52  ;;  %1709 = vst [vmem:[#allocation4 + $0x114] sm:$0xf] %v1679_v59  ;;  %v1747_v63 = vld [vmem:[#allocation3 + $0x7c] sm:$0x1]  ;;  %1710 = vst [vmem:[#allocation4 + $0x120] sm:$0xf] %v1680_v60 }
 0x1d5   : > { %v1748_v4 = vld [vmem:[#allocation3 + $0x80] sm:$0xf]  ;;  %v1749_v5 = vld [vmem:[#allocation3 + $0x84] sm:$0xf]  ;;  %v2023_v6 = vrot.slane %v2021_v57, 4  ;;  %v2027_v10 = vshll.u32 %v1747_v63, 16 }
 0x1d6   : > { %v2005_v11 = vrot.slane %v2004_v62, 4  ;;  %v2015_v13 = vrot.slane %v2014_v7, 4  ;;  %v1791_v56 = vrot.slane %v1789_v26, 5  ;;  %v2032_v14 = vshrl.u32 %v1748_v4, 16  ;;  %v7488_v16 = vld [vmem:[#allocation4 + $0xf0] sm:$0xff]  ;;  %v6714_v33 = vld [vmem:[%s8151_s4 + $0x180] sm:$0xff]  }
 0x1d7   : > { %v2024_v19 = vor.u32 %v2023_v6, %v2019_v0  ;;  %v2029_v22 = vrot.slane %v2027_v10, 5  ;;  %v2035_v23 = vshll.u32 %v1748_v4, 16  ;;  %v5376_v24 = vcombine.high %v7483_v61, %v7488_v16  ;;  %v1681_v29 = vld [vmem:[#allocation3 + $0x84] sm:$0xf]  ;;  %v1682_v30 = vld [vmem:[#allocation3 + $0x88] sm:$0xf] }
 0x1d8   : > { %v5375_v18 = vcombine.low %v7483_v61, %v7488_v16  ;;  %v2010_v25 = vsel %vm7295_vm12, %v2005_v11, %v2009_v52  ;;  %v2020_v27 = vsel %vm7295_vm12, %v2015_v13, %v2019_v0  ;;  %v1750_v32 = vld [vmem:[#allocation3 + $0x88] sm:$0xf]  ;;  %v1792_v34 = vsel %vm7295_vm12, %v1787_v17, %v1791_v56  ;;  %1711 = vst [vmem:[#allocation4 + $0x12c] sm:$0xf] %v1681_v29  ;;  %v1751_v38 = vld [vmem:[#allocation3 + $0x8c] sm:$0x1] }
 0x1d9   : > { %2150 = vst [vmem:[#allocation4 + $0x100] sm:$0xf] %v2010_v25  ;;  %2151 = vst [vmem:[#allocation4 + $0x10c] sm:$0xf] %v2020_v27  ;;  %v2025_v35 = vrot.slane %v2024_v19, 4  ;;  %v2034_v40 = vrot.slane %v2032_v14, 4  ;;  %3028 = vmatprep.mubr.bf16.mxu1 %v5376_v24  ;;  %v5439_v13 = vcombine.high %v7466_v37, %v7483_v61  ;;  %v5418_v17 = vcombine.high %v7327_v28, %v7363_v1 }
 0x1da   : > { %v2037_v36 = vrot.slane %v2035_v23, 5  ;;  %1712 = vst [vmem:[#allocation4 + $0x138] sm:$0xf] %v1682_v30  ;;  %2131 = vst [vmem:[#allocation4 + $0x1c] sm:$0xf] %v1792_v34  ;;  %v2041_v42 = vshll.u32 %v1749_v5, 16  ;;  %v5438_v24 = vcombine.low %v7466_v37, %v7483_v61 }
 0x1db   : > { %v2045_v41 = vshrl.u32 %v1749_v5, 16  ;;  %v2051_v43 = vshll.u32 %v1750_v32, 16  ;;  %v2055_v45 = vshrl.u32 %v1750_v32, 16  ;;  %v6675_v46 = vld [vmem:[#allocation4] ss:$12 sps:$4 sm:$0xff]   ;;  %v2030_v48 = vsel %vm7295_vm12, %v2025_v35, %v2029_v22  ;;  %3029 = vmatmul.mubr.bf16.gmra.mrb[16].mxu1 %v5375_v18  ;;  %v6717_v37 = vld [vmem:[%s8151_s4 + $0x188] sm:$0xff]  }
 0x1dc   : > { %v6677_v47 = vld [vmem:[#allocation4 + $0x4] ss:$12 sps:$4 sm:$0xff]   ;;  %v2038_v49 = vor.u32 %v2037_v36, %v2034_v40  ;;  %v2061_v51 = vshll.u32 %v1751_v38, 16  ;;  %v2043_v50 = vrot.slane %v2041_v42, 5  ;;  %2152 = vst [vmem:[#allocation4 + $0x118] sm:$0xf] %v2030_v48 }
 0x1dd   : > { %v2047_v52 = vrot.slane %v2045_v41, 4  ;;  %v2053_v53 = vrot.slane %v2051_v43, 5  ;;  %v2057_v55 = vrot.slane %v2055_v45, 4  ;;  %3558 = vmatprep.mubr.bf16.mxu0 %v6677_v47  ;;  %v2163_v58 = vld [vmem:[#allocation3 + $0x10] sm:$0xe]  ;;  %v6719_v61 = vld [vmem:[%s8151_s4 + $0x1d0] sm:$0xff]  }
 0x1de   : > { %v2039_v0 = vrot.slane %v2038_v49, 4  ;;  %v2063_v57 = vrot.slane %v2061_v51, 5  ;;  %3559 = vmatmul.mubr.bf16.vlgmr.msra.gmra.mrb[76].mxu0 %v6675_v46  ;;  %v2164_v7 = vld [vmem:[#allocation3 + $0x14] sm:$0xf]  ;;  %v2165_v26 = vld [vmem:[#allocation3 + $0x18] sm:$0xf] }
 0x1df   : > { %v2048_v59 = vor.u32 %v2047_v52, %v2043_v50  ;;  %v2058_v62 = vor.u32 %v2057_v55, %v2053_v53  ;;  %v5294_v63 = vrot.slane %v2163_v58, 9  ;;  %v2254_v5 = vrot.slane %v2164_v7, 5  ;;  %v2166_v10 = vld [vmem:[#allocation3 + $0x1c] sm:$0x1]  ;;  %v2167_v11 = vld [vmem:[#allocation3 + $0x20] sm:$0xe] }
 0x1e0   : > { %v2044_v4 = vsel %vm7295_vm12, %v2039_v0, %v2043_v50  ;;  %v2257_v6 = vrot.slane %v2165_v26, 5  ;;  %v7514_v56 = vld [vmem:[#allocation4 + $0xfc] sm:$0xff]  ;;  %v7516_v14 = vld [vmem:[#allocation4 + $0x108] sm:$0xff]  ;;  %v2168_v23 = vld [vmem:[#allocation3 + $0x24] sm:$0xf]  ;;  %v2260_v41 = vrot.slane %v2166_v10, 5 }
 0x1e1   : > { %2153 = vst [vmem:[#allocation4 + $0x124] sm:$0xf] %v2044_v4  ;;  %v2049_v19 = vrot.slane %v2048_v59, 4  ;;  %v2059_v22 = vrot.slane %v2058_v62, 4  ;;  %v5379_v18 = vcombine.high %v7514_v56, %v7516_v14  ;;  %v2406_v25 = vld [vmem:[#allocation4 + $0x18] sm:$0xff]  ;;  %v5378_v27 = vcombine.low %v7514_v56, %v7516_v14  ;;  %v6750_v60 = vld [vmem:[%s8151_s4 + $0x218] sm:$0xff]  }
 0x1e2   : > { %v2255_v29 = vsel %vm7504_vm15, %v5294_v63, %v2254_v5  ;;  %v2256_v30 = vrot.slane %v2254_v5, 4  ;;  %v5415_v32 = vcombine.high %v2406_v25, %v7322_v21  ;;  %v5414_v34 = vcombine.low %v2406_v25, %v7322_v21  ;;  %v2169_v36 = vld [vmem:[#allocation3 + $0x28] sm:$0xf]  ;;  %v2170_v45 = vld [vmem:[#allocation3 + $0x2c] sm:$0x1] }
 0x1e3   : > { %v2054_v35 = vsel %vm7295_vm12, %v2049_v19, %v2053_v53  ;;  %v2064_v40 = vsel %vm7295_vm12, %v2059_v22, %v2063_v57  ;;  %2375 = vst [vmem:[#allocation4 + $0x2c] sm:$0xf] %v2255_v29  ;;  %3036 = vmatprep.mubr.bf16.mxu1 %v5379_v18  ;;  %v2259_v42 = vrot.slane %v2257_v6, 4  ;;  %v5295_v43 = vrot.slane %v2167_v11, 9  ;;  %v2171_v48 = vld [vmem:[#allocation3 + $0x30] sm:$0xe] }
 0x1e4   : > { %2154 = vst [vmem:[#allocation4 + $0x130] sm:$0xf] %v2054_v35  ;;  %2155 = vst [vmem:[#allocation4 + $0x13c] sm:$0xf] %v2064_v40  ;;  %v2258_v38 = vsel %vm7504_vm15, %v2256_v30, %v2257_v6  ;;  %3566 = vmatprep.mubr.bf16.mxu0 %v5415_v32  ;;  %3037 = vmatmul.mubr.bf16.gmra.mrb[20].mxu1 %v5378_v27  ;;  %v2264_v21 = vrot.slane %v2168_v23, 5  ;;  %v2267_v46 = vrot.slane %v2169_v36, 5 }
 0x1e5   : > { %2376 = vst [vmem:[#allocation4 + $0x38] sm:$0xf] %v2258_v38  ;;  %v2270_v47 = vrot.slane %v2170_v45, 5  ;;  %v5442_v49 = vcombine.high %v7488_v16, %v7514_v56  ;;  %v7538_v51 = vld [vmem:[#allocation4 + $0x114] sm:$0xff]  ;;  %v2261_v50 = vsel %vm7504_vm15, %v2259_v42, %v2260_v41  ;;  %v5296_v55 = vrot.slane %v2171_v48, 9 }
 0x1e6   : > { %v2172_v52 = vld [vmem:[#allocation3 + $0x34] sm:$0xf]  ;;  %v2173_v53 = vld [vmem:[#allocation3 + $0x38] sm:$0xf]  ;;  %3567 = vmatmul.mubr.bf16.gmra.mrb[80].mxu0 %v5414_v34  ;;  %v2265_v0 = vsel %vm7504_vm15, %v5295_v43, %v2264_v21  ;;  %2377 = vst [vmem:[#allocation4 + $0x44] sm:$0xf] %v2261_v50  ;;  %v5441_v63 = vcombine.low %v7488_v16, %v7514_v56  ;;  %v5445_v4 = vcombine.high %v7516_v14, %v7538_v51 }
 0x1e7   : > { %v2266_v57 = vrot.slane %v2264_v21, 4  ;;  %v2269_v58 = vrot.slane %v2267_v46, 4  ;;  %v2274_v59 = vrot.slane %v2172_v52, 5  ;;  %3574 = vmatprep.mubr.bf16.mxu0 %v5418_v17  ;;  %2378 = vst [vmem:[#allocation4 + $0x50] sm:$0xf] %v2265_v0  ;;  %v2277_v7 = vrot.slane %v2173_v53, 5 }
 0x1e8   : > { %v2541_v62 = vld [vmem:[#allocation4 + $0x120] sm:$0xff]  ;;  %v2174_v26 = vld [vmem:[#allocation3 + $0x3c] sm:$0x1]  ;;  %v5444_v5 = vcombine.low %v7516_v14, %v7538_v51  ;;  %v2177_v23 = vld [vmem:[#allocation3 + $0x48] sm:$0xf]  ;;  %v5417_v30 = vcombine.low %v7327_v28, %v7363_v1  ;;  %v5421_v40 = vcombine.high %v7370_v20, %v7392_v54 }
 0x1e9   : > { %v5382_v6 = vcombine.high %v7538_v51, %v2541_v62  ;;  %v5381_v10 = vcombine.low %v7538_v51, %v2541_v62  ;;  %v2268_v11 = vsel %vm7504_vm15, %v2266_v57, %v2267_v46  ;;  %v2271_v17 = vsel %vm7504_vm15, %v2269_v58, %v2270_v47  ;;  %v2175_v19 = vld [vmem:[#allocation3 + $0x40] sm:$0xe]  ;;  %v2176_v22 = vld [vmem:[#allocation3 + $0x44] sm:$0xf]  ;;  %v2178_v28 = vld [vmem:[#allocation3 + $0x4c] sm:$0x1] }
 0x1ea   : > { %2379 = vst [vmem:[#allocation4 + $0x5c] sm:$0xf] %v2268_v11  ;;  %2380 = vst [vmem:[#allocation4 + $0x68] sm:$0xf] %v2271_v17  ;;  %v2275_v18 = vsel %vm7504_vm15, %v5296_v55, %v2274_v59  ;;  %v2276_v25 = vrot.slane %v2274_v59, 4  ;;  %v2279_v27 = vrot.slane %v2277_v7, 4  ;;  %v5420_v58 = vcombine.low %v7370_v20, %v7392_v54 }
 0x1eb   : > { %v2280_v29 = vrot.slane %v2174_v26, 5  ;;  %3044 = vmatprep.mubr.bf16.mxu1 %v5382_v6  ;;  %v6686_v32 = vld [vmem:[#allocation4 + $0x130] ss:$12 sps:$4 sm:$0xff]   ;;  %2381 = vst [vmem:[#allocation4 + $0x74] sm:$0xf] %v2275_v18  ;;  %v5297_v34 = vrot.slane %v2175_v19, 9  ;;  %v5424_v26 = vcombine.high %v7402_v12, %v7448_v8 }
 0x1ec   : > { %v2284_v35 = vrot.slane %v2176_v22, 5  ;;  %v2278_v36 = vsel %vm7504_vm15, %v2276_v25, %v2277_v7  ;;  %3045 = vmatmul.mubr.bf16.gmra.mrb[24].mxu1 %v5381_v10  ;;  %v2287_v41 = vrot.slane %v2177_v23, 5  ;;  %v2290_v43 = vrot.slane %v2178_v28, 5  ;;  %v6688_v45 = vld [vmem:[#allocation4 + $0x12c] ss:$12 sps:$4 sm:$0xff]   ;;  %v7578_v20 = vld [vmem:[#allocation4 + $0x84] sm:$0xff] }
 0x1ed   : > { %v2281_v38 = vsel %vm7504_vm15, %v2279_v27, %v2280_v29  ;;  %2382 = vst [vmem:[#allocation4 + $0x80] sm:$0xf] %v2278_v36  ;;  %3052 = vmatprep.mubr.bf16.mxu1 %v6686_v32  ;;  %v2179_v47 = vld [vmem:[#allocation3 + $0x50] sm:$0xe]  ;;  %v2180_v48 = vld [vmem:[#allocation3 + $0x54] sm:$0xf] }
 0x1ee   : > { %v2285_v42 = vsel %vm7504_vm15, %v5297_v34, %v2284_v35  ;;  %2383 = vst [vmem:[#allocation4 + $0x8c] sm:$0xf] %v2281_v38  ;;  %v2286_v1 = vrot.slane %v2284_v35, 4  ;;  %3575 = vmatmul.mubr.bf16.gmra.mrb[84].mxu0 %v5417_v30  ;;  %v2289_v46 = vrot.slane %v2287_v41, 4  ;;  %v2181_v50 = vld [vmem:[#allocation3 + $0x58] sm:$0xf]  ;;  %v5423_v35 = vcombine.low %v7402_v12, %v7448_v8 }
 0x1ef   : > { %2384 = vst [vmem:[#allocation4 + $0x98] sm:$0xf] %v2285_v42  ;;  %3582 = vmatprep.mubr.bf16.mxu0 %v5421_v40  ;;  %v6690_v52 = vld [vmem:[#allocation4 + $0x2c] ss:$12 sps:$4 sm:$0xff]   ;;  %v5298_v55 = vrot.slane %v2179_v47, 9  ;;  %v2294_v0 = vrot.slane %v2180_v48, 5 }
 0x1f0   : > { %v2288_v21 = vsel %vm7504_vm15, %v2286_v1, %v2287_v41  ;;  %v2291_v53 = vsel %vm7504_vm15, %v2289_v46, %v2290_v43  ;;  %v2297_v57 = vrot.slane %v2181_v50, 5  ;;  %v2182_v59 = vld [vmem:[#allocation3 + $0x5c] sm:$0x1]  ;;  %v2183_v62 = vld [vmem:[#allocation3 + $0x60] sm:$0xe]  ;;  %v6693_v42 = vld [vmem:[%s8151_s4 + $0x88] sm:$0xff]  }
 0x1f1   : > { %2385 = vst [vmem:[#allocation4 + $0xa4] sm:$0xf] %v2288_v21  ;;  %2386 = vst [vmem:[#allocation4 + $0xb0] sm:$0xf] %v2291_v53  ;;  %v2184_v7 = vld [vmem:[#allocation3 + $0x64] sm:$0xf]  ;;  %v2295_v6 = vsel %vm7504_vm15, %v5298_v55, %v2294_v0  ;;  %v5427_v21 = vcombine.high %v7456_v15, %v7578_v20 }
 0x1f2   : > { %v2296_v10 = vrot.slane %v2294_v0, 4  ;;  %2387 = vst [vmem:[#allocation4 + $0xbc] sm:$0xf] %v2295_v6  ;;  %v2299_v11 = vrot.slane %v2297_v57, 4  ;;  %v2300_v17 = vrot.slane %v2182_v59, 5  ;;  %v5299_v19 = vrot.slane %v2183_v62, 9 }
 0x1f3   : > { %v2304_v22 = vrot.slane %v2184_v7, 5  ;;  %v6691_v23 = vld [vmem:[#allocation4 + $0x44] ss:$12 sps:$4 sm:$0xff]   ;;  %v2185_v27 = vld [vmem:[#allocation3 + $0x68] sm:$0xf]  ;;  %v6697_v12 = vld [vmem:[%s8151_s4 + $0x90] sm:$0xff]  }
 0x1f4   : > { %3053 = vmatmul.mubr.bf16.gmra.mrb[28].mxu1 %v6688_v45  ;;  %v2298_v54 = vsel %vm7504_vm15, %v2296_v10, %v2297_v57  ;;  %v2301_v18 = vsel %vm7504_vm15, %v2299_v11, %v2300_v17  ;;  %v2186_v29 = vld [vmem:[#allocation3 + $0x6c] sm:$0x1]  ;;  %v6694_v30 = vld [vmem:[#allocation4 + $0x5c] ss:$12 sps:$4 sm:$0xff]   ;;  %v2307_v34 = vrot.slane %v2185_v27, 5  ;;  %v6700_v6 = vld [vmem:[%s8151_s4 + $0x98] sm:$0xff]  }
 0x1f5   : > { %6268 = vmatprep.mubr.bf16.mxu1 %v6690_v52  ;;  %2388 = vst [vmem:[#allocation4 + $0xc8] sm:$0xf] %v2298_v54  ;;  %v2305_v25 = vsel %vm7504_vm15, %v5299_v19, %v2304_v22  ;;  %2389 = vst [vmem:[#allocation4 + $0xd4] sm:$0xf] %v2301_v18  ;;  %v2306_v32 = vrot.slane %v2304_v22, 4  ;;  %v2310_v40 = vrot.slane %v2186_v29, 5  ;;  %v5426_v54 = vcombine.low %v7456_v15, %v7578_v20 }
 0x1f6   : > { %3583 = vmatmul.mubr.bf16.gmra.mrb[88].mxu0 %v5420_v58  ;;  %2390 = vst [vmem:[#allocation4 + $0xe0] sm:$0xf] %v2305_v25  ;;  %v2187_v36 = vld [vmem:[#allocation3 + $0x70] sm:$0xe]  ;;  %v2188_v38 = vld [vmem:[#allocation3 + $0x74] sm:$0xf] }
 0x1f7   : > { %3590 = vmatprep.mubr.bf16.mxu0 %v5424_v26  ;;  %v2308_v28 = vsel %vm7504_vm15, %v2306_v32, %v2307_v34  ;;  %v2309_v1 = vrot.slane %v2307_v34, 4  ;;  %v2189_v41 = vld [vmem:[#allocation3 + $0x78] sm:$0xf]  ;;  %v5300_v43 = vrot.slane %v2187_v36, 9  ;;  %v2314_v45 = vrot.slane %v2188_v38, 5  ;;  %v7603_v52 = vld [vmem:[#allocation4 + $0x90] sm:$0xff] }
 0x1f8   : > { %2391 = vst [vmem:[#allocation4 + $0xec] sm:$0xf] %v2308_v28  ;;  %v2317_v46 = vrot.slane %v2189_v41, 5  ;;  %v2190_v50 = vld [vmem:[#allocation3 + $0x7c] sm:$0x1]  ;;  %v6703_v41 = vld [vmem:[%s8151_s4 + $0xa0] sm:$0xff]  }
 0x1f9   : > { %v2311_v8 = vsel %vm7504_vm15, %v2309_v1, %v2310_v40  ;;  %v2315_v47 = vsel %vm7504_vm15, %v5300_v43, %v2314_v45  ;;  %v2316_v48 = vrot.slane %v2314_v45, 4  ;;  %v2191_v53 = vld [vmem:[#allocation3 + $0x80] sm:$0xe]  ;;  %v2192_v55 = vld [vmem:[#allocation3 + $0x84] sm:$0xf]  ;;  %v2320_v57 = vrot.slane %v2190_v50, 5 }
 0x1fa   : > { %2392 = vst [vmem:[#allocation4 + $0xf8] sm:$0xf] %v2311_v8  ;;  %2393 = vst [vmem:[#allocation4 + $0x104] sm:$0xf] %v2315_v47  ;;  %v2319_v0 = vrot.slane %v2317_v46, 4  ;;  %v5301_v62 = vrot.slane %v2191_v53, 9 }
 0x1fb   : > { %v6696_v58 = vld [vmem:[#allocation4 + $0x74] ss:$12 sps:$4 sm:$0xff]   ;;  %v2318_v59 = vsel %vm7504_vm15, %v2316_v48, %v2317_v46  ;;  %v2324_v7 = vrot.slane %v2192_v55, 5  ;;  %v6698_v26 = vld [vmem:[#allocation4 + $0x8c] ss:$12 sps:$4 sm:$0xff]  }
 0x1fc   : > { %6269 = vmatmul.mubr.bf16.vlgmr.msra.gmra.mrb[32].mxu1 %v6691_v23  ;;  %2394 = vst [vmem:[#allocation4 + $0x110] sm:$0xf] %v2318_v59  ;;  %v2193_v11 = vld [vmem:[#allocation3 + $0x88] sm:$0xf]  ;;  %v2194_v17 = vld [vmem:[#allocation3 + $0x8c] sm:$0x1] }
 0x1fd   : > { %6293 = vmatpush3.bf16.msra.mxu1 %v7471_v44  ;;  %6272 = vmatprep.mubr.bf16.mxu1 %v6694_v30  ;;  %v2321_v44 = vsel %vm7504_vm15, %v2319_v0, %v2320_v57  ;;  %v2325_v10 = vsel %vm7504_vm15, %v5301_v62, %v2324_v7  ;;  %v2326_v19 = vrot.slane %v2324_v7, 4  ;;  %v2327_v22 = vrot.slane %v2193_v11, 5  ;;  %v6796_v18 = vld [vmem:[#allocation4 + $0x9c] sm:$0xff]  ;;  %v2160_v29 = vld [vmem:[#allocation3 + $0x4] sm:$0xf]  ;;  %v7626_v45 = vld [vmem:[#allocation4 + $0xa8] sm:$0xff] }
 0x1fe   : > { %3591 = vmatmul.mubr.bf16.gmra.mrb[92].mxu0 %v5423_v35  ;;  %6294 = vmatprep.subr.bf16.mxu1 %v6693_v42  ;;  %2395 = vst [vmem:[#allocation4 + $0x11c] sm:$0xf] %v2321_v44  ;;  %2396 = vst [vmem:[#allocation4 + $0x128] sm:$0xf] %v2325_v10  ;;  %v2330_v23 = vrot.slane %v2194_v17, 5  ;;  %v5430_v25 = vcombine.high %v7603_v52, %v6796_v18  ;;  %v2244_v40 = vrot.slane %v2160_v29, 5 }
 0x1ff   : > { %3598 = vmatprep.mubr.bf16.mxu0 %v5427_v21  ;;  %v2159_v27 = vld [vmem:[#allocation3] sm:$0xe]  ;;  %v2328_v30 = vsel %vm7504_vm15, %v2326_v19, %v2327_v22  ;;  %v2329_v32 = vrot.slane %v2327_v22, 4  ;;  %v2161_v34 = vld [vmem:[#allocation3 + $0x8] sm:$0xf]  ;;  %v6704_v8 = vld [vmem:[%s8151_s4 + $0xa8] sm:$0xff]   ;;  %v5429_v48 = vcombine.low %v7603_v52, %v6796_v18  ;;  %v5433_v50 = vcombine.high %v7626_v45, %v7419_v31 }
 0x200   : > { %v5293_v35 = vrot.slane %v2159_v27, 9  ;;  %2397 = vst [vmem:[#allocation4 + $0x134] sm:$0xf] %v2328_v30  ;;  %v2246_v38 = vrot.slane %v2244_v40, 4  ;;  %v2162_v28 = vld [vmem:[#allocation3 + $0xc] sm:$0x1]  ;;  %v5432_v57 = vcombine.low %v7626_v45, %v7419_v31 }
 0x201   : > { %6295 = vmatpush3.bf16.msra.mxu1 %v6693_v42  ;;  %v2331_v15 = vsel %vm7504_vm15, %v2329_v32, %v2330_v23  ;;  %v2247_v42 = vrot.slane %v2161_v34, 5  ;;  %v6699_v1 = vld [vmem:[#allocation4 + $0xa4] ss:$12 sps:$4 sm:$0xff]   ;;  %v2250_v43 = vrot.slane %v2162_v28, 5  ;;  %v6707_v53 = vld [vmem:[%s8151_s4 + $0xb0] sm:$0xff]   ;;  %v6713_v59 = vld [vmem:[%s8151_s4 + $0x1c0] sm:$0xff]  }
 0x202   : > { %6296 = vmatprep.subr.bf16.mxu1 %v6697_v12  ;;  %v2245_v36 = vsel %vm7504_vm15, %v5293_v35, %v2244_v40  ;;  %2398 = vst [vmem:[#allocation4 + $0x140] sm:$0xf] %v2331_v15  ;;  %v6702_v55 = vld [vmem:[#allocation4 + $0xd4] ss:$12 sps:$4 sm:$0xff]   ;;  %v6705_v0 = vld [vmem:[#allocation4 + $0xec] ss:$12 sps:$4 sm:$0xff]  }
 0x203   : > { %2372 = vst [vmem:[#allocation4 + $0x8] sm:$0xf] %v2245_v36  ;;  %v2248_v21 = vsel %vm7504_vm15, %v2246_v38, %v2247_v42  ;;  %v2249_v46 = vrot.slane %v2247_v42, 4  ;;  %v6706_v62 = vld [vmem:[#allocation4 + $0x104] ss:$12 sps:$4 sm:$0xff]   ;;  %v6727_v19 = vld [vmem:[%s8151_s4 + $0x1e0] sm:$0xff]  }
 0x204   : > { %6273 = vmatmul.mubr.bf16.gmra.mrb[36].mxu1 %v6696_v58  ;;  %2373 = vst [vmem:[#allocation4 + $0x14] sm:$0xf] %v2248_v21  ;;  %v6710_v58 = vld [vmem:[%s8151_s4 + $0xb8] sm:$0xff]   ;;  %v1683_v56 = vld [vmem:[#allocation3 + $0x90] sm:$0xf]  ;;  %v6728_v32 = vld [vmem:[%s8151_s4 + $0x1a0] sm:$0xff]  }
 0x205   : > { %6297 = vmatpush3.bf16.msra.mxu1 %v6697_v12  ;;  %6276 = vmatprep.mubr.bf16.mxu1 %v6698_v26  ;;  %v6701_v12 = vld [vmem:[#allocation4 + $0xbc] ss:$12 sps:$4 sm:$0xff]   ;;  %v2251_v47 = vsel %vm7504_vm15, %v2249_v46, %v2250_v43  ;;  %v6723_v16 = vld [vmem:[%s8151_s4 + $0x1d8] sm:$0xff]   ;;  %1713 = vst [vmem:[#allocation4 + $0x144] sm:$0xf] %v1683_v56 }
 0x206   : > { %3599 = vmatmul.mubr.bf16.gmra.mrb[96].mxu0 %v5426_v54  ;;  %6298 = vmatprep.subr.bf16.mxu1 %v6700_v6  ;;  %2374 = vst [vmem:[#allocation4 + $0x20] sm:$0xf] %v2251_v47  ;;  %v6708_v31 = vld [vmem:[#allocation4 + $0x11c] ss:$12 sps:$4 sm:$0xff]   ;;  %v1752_v44 = vld [vmem:[#allocation3 + $0x90] sm:$0xf] }
 0x207   : > { %3606 = vmatprep.mubr.bf16.mxu0 %v5430_v25  ;;  %v2069_v10 = vshll.u32 %v1752_v44, 16  ;;  %v1684_v22 = vld [vmem:[#allocation3 + $0x94] sm:$0xf]  ;;  %v6722_v23 = vld [vmem:[#allocation4 + $0x80] ss:$12 sps:$4 sm:$0xff]   ;;  %v6733_v47 = vld [vmem:[%s8151_s4 + $0x1f0] sm:$0xff]  }
 0x208   : > { %v1685_v27 = vld [vmem:[#allocation3 + $0x98] sm:$0xf]  ;;  %1714 = vst [vmem:[#allocation4 + $0x150] sm:$0xf] %v1684_v22  ;;  %v1755_v35 = vld [vmem:[#allocation3 + $0x9c] sm:$0x1] }
 0x209   : > { %6299 = vmatpush3.bf16.msra.mxu1 %v6700_v6  ;;  %v6709_v7 = vld [vmem:[#allocation4 + $0x134] ss:$12 sps:$4 sm:$0xff]   ;;  %v2066_v6 = vshrl.u32 %v1752_v44, 16  ;;  %v2071_v18 = vrot.slane %v2069_v10, 5  ;;  %v6725_v30 = vld [vmem:[#allocation4 + $0x98] ss:$12 sps:$4 sm:$0xff]  }
 0x20a   : > { %6300 = vmatprep.subr.bf16.mxu1 %v6703_v41  ;;  %1715 = vst [vmem:[#allocation4 + $0x15c] sm:$0xf] %v1685_v27  ;;  %v1754_v34 = vld [vmem:[#allocation3 + $0x98] sm:$0xf]  ;;  %v2095_v36 = vshll.u32 %v1755_v35, 16  ;;  %v6757_v22 = vld [vmem:[%s8151_s4 + $0x220] sm:$0xff]  }
 0x20b   : > { %v6711_v26 = vld [vmem:[#allocation4 + $0x8] ss:$12 sps:$4 sm:$0xff]   ;;  %v2068_v54 = vrot.slane %v2066_v6, 4  ;;  %v2085_v14 = vshll.u32 %v1754_v34, 16  ;;  %v2089_v51 = vshrl.u32 %v1754_v34, 16  ;;  %v3793_v6 = vld [vmem:[#allocation4 + $0x78] sm:$0xff] }
 0x20c   : > { %6277 = vmatmul.mubr.bf16.gmra.mrb[40].mxu1 %v6699_v1  ;;  %v2097_v43 = vrot.slane %v2095_v36, 5  ;;  %v6736_v39 = vld [vmem:[#allocation4 + $0x110] ss:$12 sps:$4 sm:$0xff]  }
 0x20d   : > { %6280 = vmatprep.mubr.bf16.mxu1 %v6701_v12  ;;  %6301 = vmatpush3.bf16.msra.mxu1 %v6703_v41  ;;  %v6712_v9 = vld [vmem:[#allocation4 + $0x20] ss:$12 sps:$4 sm:$0xff]   ;;  %v2072_v40 = vor.u32 %v2071_v18, %v2068_v54  ;;  %v2087_v28 = vrot.slane %v2085_v14, 5  ;;  %v2091_v1 = vrot.slane %v2089_v51, 4  ;;  %v6731_v41 = vld [vmem:[%s8151_s4 + $0x1a8] sm:$0xff]   ;;  %v6747_v10 = vld [vmem:[%s8151_s4 + $0x210] sm:$0xff]  }
 0x20e   : > { %3607 = vmatmul.mubr.bf16.gmra.mrb[100].mxu0 %v5429_v48  ;;  %6302 = vmatprep.subr.bf16.mxu1 %v6704_v8  ;;  %v6761_v18 = vld [vmem:[%s8151_s4 + $0x228] sm:$0xff]   ;;  %v6768_v27 = vld [vmem:[%s8151_s4 + $0x230] sm:$0xff]  }
 0x20f   : > { %3614 = vmatprep.mubr.bf16.mxu0 %v5433_v50  ;;  %v2073_v38 = vrot.slane %v2072_v40, 4  ;;  %v2092_v12 = vor.u32 %v2091_v1, %v2087_v28  ;;  %v6730_v50 = vld [vmem:[#allocation4 + $0xc8] ss:$12 sps:$4 sm:$0xff]   ;;  %v6751_v34 = vld [vmem:[#allocation4 + $0xc4] ss:$12 sps:$4 sm:$0xff]  }
 0x211   : > { %6303 = vmatpush3.bf16.msra.mxu1 %v6704_v8  ;;  %v6726_v8 = vld [vmem:[#allocation4 + $0xb0] ss:$12 sps:$4 sm:$0xff]   ;;  %v2093_v48 = vrot.slane %v2092_v12, 4 }
 0x212   : > { %6304 = vmatprep.subr.bf16.mxu1 %v6707_v53 }
 0x214   : > { %6281 = vmatmul.mubr.bf16.gmra.mrb[44].mxu1 %v6702_v55  ;;  %v6737_v55 = vld [vmem:[%s8151_s4 + $0x1f8] sm:$0xff]  }
 0x215   : > { %6284 = vmatprep.mubr.bf16.mxu1 %v6705_v0  ;;  %6305 = vmatpush3.bf16.msra.mxu1 %v6707_v53  ;;  %v6734_v53 = vld [vmem:[%s8151_s4 + $0x1b0] sm:$0xff]   ;;  %v2098_v0 = vsel %vm7295_vm12, %v2093_v48, %v2097_v43 }
 0x216   : > { %3615 = vmatmul.mubr.bf16.gmra.mrb[104].mxu0 %v5432_v57  ;;  %6306 = vmatprep.subr.bf16.mxu1 %v6710_v58  ;;  %2158 = vst [vmem:[#allocation4 + $0x160] sm:$0xf] %v2098_v0  ;;  %v6738_v57 = vld [vmem:[%s8151_s4 + $0x1b8] sm:$0xff]  }
 0x217   : > { %3622 = vmatprep.mubr.bf16.mxu0 %v5436_v2  ;;  %v6716_v2 = vld [vmem:[#allocation4 + $0x38] ss:$12 sps:$4 sm:$0xff]  }
 0x218   : > { %v6756_v43 = vld [vmem:[#allocation4 + $0xd8] ss:$12 sps:$4 sm:$0xff]  }
 0x219   : > { %6307 = vmatpush3.bf16.msra.mxu1 %v6710_v58  ;;  %v6742_v58 = vld [vmem:[%s8151_s4 + $0x200] sm:$0xff]  }
 0x21a   : > { %6048 = vmatprep.subr.bf16.mxu1 %v6713_v59  ;;  %v6732_v59 = vld [vmem:[#allocation4 + $0xe0] ss:$12 sps:$4 sm:$0xff]  }
 0x21c   : > { %6285 = vmatmul.mubr.bf16.gmra.mrb[48].mxu1 %v6706_v62  ;;  %v6735_v62 = vld [vmem:[#allocation4 + $0xf8] ss:$12 sps:$4 sm:$0xff]  }
 0x21d   : > { %6288 = vmatprep.mubr.bf16.mxu1 %v6708_v31  ;;  %v6741_v31 = vld [vmem:[#allocation4 + $0x4c] ss:$12 sps:$4 sm:$0xff]  }
 0x21e   : > { %3623 = vmatmul.mubr.bf16.gmra.mrb[108].mxu0 %v5435_v3  ;;  %v6715_v3 = vld [vmem:[%s8151_s4 + $0x1c8] sm:$0xff]  }
 0x21f   : > { %3630 = vmatprep.mubr.bf16.mxu0 %v5439_v13  ;;  %v6718_v13 = vld [vmem:[#allocation4 + $0x50] ss:$12 sps:$4 sm:$0xff]  }
 0x224   : > { %6289 = vmatmul.mubr.bf16.gmra.mrb[52].mxu1 %v6709_v7  ;;  %v2196_v7 = vld [vmem:[#allocation3 + $0x94] sm:$0xf] }
 0x225   : > { %6308 = vmatprep.mubr.bf16.mxu1 %v6711_v26  ;;  %v2197_v26 = vld [vmem:[#allocation3 + $0x98] sm:$0xf] }
 0x226   : > { %3631 = vmatmul.mubr.bf16.gmra.mrb[112].mxu0 %v5438_v24  ;;  %v6720_v24 = vld [vmem:[%s8151_s4 + $0x190] sm:$0xff]  }
 0x227   : > { %3638 = vmatprep.mubr.bf16.mxu0 %v5442_v49  ;;  %v6721_v49 = vld [vmem:[#allocation4 + $0x68] ss:$12 sps:$4 sm:$0xff]  }
 0x22c   : > { %6309 = vmatmul.mubr.bf16.vlgmr.msra.gmra.mrb[32].mxu1 %v6712_v9  ;;  %v2195_v9 = vld [vmem:[#allocation3 + $0x90] sm:$0xe] }
 0x22d   : > { %6049 = vmatpush3.bf16.msra.mxu1 %v6714_v33  ;;  %6312 = vmatprep.mubr.bf16.mxu1 %v6716_v2  ;;  %v6739_v33 = vld [vmem:[#allocation4 + $0x48] ss:$12 sps:$4 sm:$0xff]   ;;  %v2334_v2 = vrot.slane %v2196_v7, 5 }
 0x22e   : > { %3639 = vmatmul.mubr.bf16.gmra.mrb[116].mxu0 %v5441_v63  ;;  %6050 = vmatprep.subr.bf16.mxu1 %v6715_v3  ;;  %v6724_v63 = vld [vmem:[%s8151_s4 + $0x198] sm:$0xff]   ;;  %v2337_v3 = vrot.slane %v2197_v26, 5  ;;  %v6764_v7 = vld [vmem:[#allocation4 + $0x108] ss:$12 sps:$4 sm:$0xff]  }
 0x22f   : > { %3646 = vmatprep.mubr.bf16.mxu0 %v5445_v4  ;;  %v1753_v4 = vld [vmem:[#allocation3 + $0x94] sm:$0xf] }
 0x230   : > { %v2075_v11 = vshll.u32 %v1753_v4, 16  ;;  %v2079_v17 = vshrl.u32 %v1753_v4, 16 }
 0x231   : > { %6051 = vmatpush3.bf16.msra.mxu1 %v6717_v37  ;;  %v6743_v37 = vld [vmem:[#allocation4 + $0x64] ss:$12 sps:$4 sm:$0xff]  }
 0x232   : > { %6052 = vmatprep.subr.bf16.mxu1 %v6719_v61  ;;  %v2077_v25 = vrot.slane %v2075_v11, 5  ;;  %v2081_v29 = vrot.slane %v2079_v17, 4  ;;  %v5302_v61 = vrot.slane %v2195_v9, 9  ;;  %v6745_v11 = vld [vmem:[#allocation4 + $0x60] ss:$12 sps:$4 sm:$0xff]   ;;  %v5526_v17 = vcombine.high %v3793_v6, %v7578_v20 }
 0x234   : > { %6313 = vmatmul.mubr.bf16.gmra.mrb[36].mxu1 %v6718_v13  ;;  %v2082_v15 = vor.u32 %v2081_v29, %v2077_v25  ;;  %v2078_v21 = vsel %vm7295_vm12, %v2073_v38, %v2077_v25  ;;  %v2198_v13 = vld [vmem:[#allocation3 + $0x9c] sm:$0x1]  ;;  %v3803_v25 = vld [vmem:[#allocation4 + $0xb4] sm:$0xff] }
 0x235   : > { %6053 = vmatpush3.bf16.msra.mxu1 %v6720_v24  ;;  %6316 = vmatprep.mubr.bf16.mxu1 %v6721_v49  ;;  %2156 = vst [vmem:[#allocation4 + $0x148] sm:$0xf] %v2078_v21  ;;  %v6746_v24 = vld [vmem:[%s8151_s4 + $0x208] sm:$0xff]   ;;  %v2336_v49 = vrot.slane %v2334_v2, 4  ;;  %v2340_v56 = vrot.slane %v2198_v13, 5 }
 0x236   : > { %3647 = vmatmul.mubr.bf16.gmra.mrb[120].mxu0 %v5444_v5  ;;  %6054 = vmatprep.subr.bf16.mxu1 %v6723_v16  ;;  %v6729_v5 = vld [vmem:[%s8151_s4 + $0x1e8] sm:$0xff]   ;;  %v2083_v42 = vrot.slane %v2082_v15, 4  ;;  %v2339_v16 = vrot.slane %v2337_v3, 4  ;;  %v6754_v15 = vld [vmem:[#allocation4 + $0xdc] ss:$12 sps:$4 sm:$0xff]  }
 0x237   : > { %v2338_v44 = vsel %vm7504_vm15, %v2336_v49, %v2337_v3  ;;  %v6758_v21 = vld [vmem:[#allocation4 + $0xf4] ss:$12 sps:$4 sm:$0xff]  }
 0x238   : > { %v2088_v46 = vsel %vm7295_vm12, %v2083_v42, %v2087_v28  ;;  %v2341_v4 = vsel %vm7504_vm15, %v2339_v16, %v2340_v56  ;;  %2400 = vst [vmem:[#allocation4 + $0x158] sm:$0xf] %v2338_v44 }
 0x239   : > { %6055 = vmatpush3.bf16.msra.mxu1 %v6724_v63  ;;  %2157 = vst [vmem:[#allocation4 + $0x154] sm:$0xf] %v2088_v46  ;;  %v2335_v63 = vsel %vm7504_vm15, %v5302_v61, %v2334_v2  ;;  %2401 = vst [vmem:[#allocation4 + $0x164] sm:$0xf] %v2341_v4 }
 0x23a   : > { %6056 = vmatprep.subr.bf16.mxu1 %v6727_v19  ;;  %2399 = vst [vmem:[#allocation4 + $0x14c] sm:$0xf] %v2335_v63  ;;  %v3799_v19 = vld [vmem:[#allocation4 + $0x9c] sm:$0xff] }
 0x23b   : > { %v5529_v54 = vcombine.high %v7603_v52, %v3799_v19  ;;  %v5528_v29 = vcombine.low %v7603_v52, %v3799_v19  ;;  %v6753_v52 = vld [vmem:[#allocation4 + $0xc0] ss:$12 sps:$4 sm:$0xff]  }
 0x23c   : > { %6317 = vmatmul.mubr.bf16.gmra.mrb[40].mxu1 %v6722_v23  ;;  %v5525_v23 = vcombine.low %v3793_v6, %v7578_v20  ;;  %v5532_v20 = vcombine.high %v7626_v45, %v3803_v25  ;;  %v6767_v63 = vld [vmem:[#allocation4 + $0x120] ss:$12 sps:$4 sm:$0xff]   ;;  %v6769_v44 = vld [vmem:[#allocation4 + $0x13c] ss:$12 sps:$4 sm:$0xff]  }
 0x23d   : > { %6320 = vmatprep.mubr.bf16.mxu1 %v6725_v30  ;;  %6057 = vmatpush3.bf16.msra.mxu1 %v6728_v32  ;;  %v6772_v30 = vld [vmem:[%s8151_s4 + $0x238] sm:$0xff]   ;;  %v5531_v32 = vcombine.low %v7626_v45, %v3803_v25 }
 0x23e   : > { %6058 = vmatprep.subr.bf16.mxu1 %v6729_v5 }
 0x240   : > { %v6773_v25 = vld [vmem:[#allocation4 + $0x154] ss:$12 sps:$4 sm:$0xff]  }
 0x241   : > { %6059 = vmatpush3.bf16.msra.mxu1 %v6731_v41 }
 0x242   : > { %6060 = vmatprep.subr.bf16.mxu1 %v6733_v47 }
 0x244   : > { %6321 = vmatmul.mubr.bf16.gmra.mrb[44].mxu1 %v6726_v8 }
 0x245   : > { %6324 = vmatprep.mubr.bf16.mxu1 %v6730_v50  ;;  %6061 = vmatpush3.bf16.msra.mxu1 %v6734_v53  ;;  %v6760_v53 = vld [vmem:[#allocation4 + $0xf0] ss:$12 sps:$4 sm:$0xff]  }
 0x246   : > { %6062 = vmatprep.subr.bf16.mxu1 %v6737_v55 }
 0x249   : > { %6063 = vmatpush3.bf16.msra.mxu1 %v6738_v57 }
 0x24a   : > { %6332 = vmatprep.subr.bf16.mxu1 %v6742_v58 }
 0x24c   : > { %6325 = vmatmul.mubr.bf16.gmra.mrb[48].mxu1 %v6732_v59  ;;  %v6762_v59 = vld [vmem:[#allocation4 + $0x10c] ss:$12 sps:$4 sm:$0xff]  }
 0x24d   : > { %6328 = vmatprep.mubr.bf16.mxu1 %v6735_v62 }
 0x254   : > { %6329 = vmatmul.mubr.bf16.gmra.mrb[52].mxu1 %v6736_v39 }
 0x255   : > { %4250 = vmatprep.mubr.bf16.mxu1 %v6741_v31 }
 0x25c   : > { %4251 = vmatmul.mubr.bf16.vlgmr.msra.gmra.mrb[56].mxu1 %v6739_v33  ;;  %v6765_v33 = vld [vmem:[#allocation4 + $0x124] ss:$12 sps:$4 sm:$0xff]  }
 0x25d   : > { %6333 = vmatpush3.bf16.msra.mxu1 %v6742_v58  ;;  %4258 = vmatprep.mubr.bf16.mxu1 %v6743_v37 }
 0x25e   : > { %6334 = vmatprep.subr.bf16.mxu1 %v6746_v24 }
 0x261   : > { %6335 = vmatpush3.bf16.msra.mxu1 %v6746_v24 }
 0x262   : > { %6336 = vmatprep.subr.bf16.mxu1 %v6747_v10 }
 0x264   : > { %4259 = vmatmul.mubr.bf16.gmra.mrb[60].mxu1 %v6745_v11 }
 0x265   : > { %4266 = vmatprep.mubr.bf16.mxu1 %v5526_v17  ;;  %6337 = vmatpush3.bf16.msra.mxu1 %v6747_v10 }
 0x266   : > { %6338 = vmatprep.subr.bf16.mxu1 %v6750_v60 }
 0x269   : > { %6339 = vmatpush3.bf16.msra.mxu1 %v6750_v60 }
 0x26a   : > { %6340 = vmatprep.subr.bf16.mxu1 %v6757_v22 }
 0x26c   : > { %4267 = vmatmul.mubr.bf16.gmra.mrb[64].mxu1 %v5525_v23 }
 0x26d   : > { %4274 = vmatprep.mubr.bf16.mxu1 %v5529_v54  ;;  %6341 = vmatpush3.bf16.msra.mxu1 %v6757_v22  ;;  %v6771_v22 = vld [vmem:[#allocation4 + $0x138] ss:$12 sps:$4 sm:$0xff]  }
 0x26e   : > { %6342 = vmatprep.subr.bf16.mxu1 %v6761_v18 }
 0x271   : > { %6343 = vmatpush3.bf16.msra.mxu1 %v6761_v18 }
 0x272   : > { %6344 = vmatprep.subr.bf16.mxu1 %v6768_v27 }
 0x274   : > { %4275 = vmatmul.mubr.bf16.gmra.mrb[68].mxu1 %v5528_v29 }
 0x275   : > { %4282 = vmatprep.mubr.bf16.mxu1 %v5532_v20  ;;  %6345 = vmatpush3.bf16.msra.mxu1 %v6768_v27 }
 0x276   : > { %6346 = vmatprep.subr.bf16.mxu1 %v6772_v30 }
 0x279   : > { %6347 = vmatpush3.bf16.msra.mxu1 %v6772_v30 }
 0x27c   : > { %4283 = vmatmul.mubr.bf16.gmra.mrb[72].mxu1 %v5531_v32  ;;  %v6775_v32 = vld [vmem:[#allocation4 + $0x150] ss:$12 sps:$4 sm:$0xff]  }
 0x27d   : > { %4290 = vmatprep.mubr.bf16.mxu1 %v6751_v34 }
 0x284   : > { %4291 = vmatmul.mubr.bf16.gmra.mrb[76].mxu1 %v6753_v52  ;;  %v6776_v52 = vld [vmem:[#allocation4 + $0x50] ss:$12 sps:$4 sm:$0xff]  }
 0x285   : > { %v5848_v35 = vpop.f32.mrb[60].mxu0  ;;  %v5872_v36 = vpop.f32.mrb[0].mxu1  ;;  %4298 = vmatprep.mubr.bf16.mxu1 %v6754_v15 }
 0x286   : > { %v5849_v40 = vpop.f32.mrb[61].mxu0  ;;  %v5873_v42 = vpop.f32.mrb[1].mxu1 }
 0x287   : > { %v7760_v14 = vadd.f32 %v5849_v40, %v5848_v35  ;;  %v5851_v51 = vpop.f32.mrb[62].mxu0  ;;  %v7764_v28 = vadd.f32 %v5873_v42, %v5872_v36  ;;  %v5875_v45 = vpop.f32.mrb[2].mxu1 }
 0x288   : > { %v5852_v5 = vpop.f32.mrb[63].mxu0  ;;  %v5876_v1 = vpop.f32.mrb[3].mxu1 }
 0x289   : > { %v7762_v38 = vadd.f32 %v5852_v5, %v5851_v51  ;;  %v7766_v41 = vadd.f32 %v5876_v1, %v5875_v45 }
 0x28c   : > { %4299 = vmatmul.mubr.bf16.gmra.mrb[80].mxu1 %v6756_v43 }
 0x28d   : > { %v5854_v46 = vpop.f32.mrb[64].mxu0  ;;  %4306 = vmatprep.mubr.bf16.mxu1 %v6758_v21 }
 0x28e   : > { %v5855_v12 = vpop.f32.mrb[65].mxu0 }
 0x28f   : > { %v7768_v8 = vadd.f32 %v5855_v12, %v5854_v46  ;;  %v5857_v47 = vpop.f32.mrb[66].mxu0 }
 0x290   : > { %v5858_v50 = vpop.f32.mrb[67].mxu0 }
 0x291   : > { %v5878_v48 = vpop.f32.mrb[4].mxu1  ;;  %v7770_v0 = vadd.f32 %v5858_v50, %v5857_v47  ;;  %v6777_v47 = vld [vmem:[#allocation4 + $0x68] ss:$12 sps:$4 sm:$0xff]  }
 0x292   : > { %v5879_v55 = vpop.f32.mrb[5].mxu1 }
 0x293   : > { %v7772_v57 = vadd.f32 %v5879_v55, %v5878_v48  ;;  %v5881_v58 = vpop.f32.mrb[6].mxu1  ;;  %v6778_v55 = vld [vmem:[#allocation4 + $0x80] ss:$12 sps:$4 sm:$0xff]  }
 0x294   : > { %v5882_v62 = vpop.f32.mrb[7].mxu1  ;;  %4307 = vmatmul.mubr.bf16.gmra.mrb[84].mxu1 %v6760_v53 }
 0x295   : > { %v7774_v39 = vadd.f32 %v5882_v62, %v5881_v58  ;;  %4314 = vmatprep.mubr.bf16.mxu1 %v6762_v59 }
 0x297   : > { %v5860_v31 = vpop.f32.mrb[68].mxu0 }
 0x298   : > { %v5861_v26 = vpop.f32.mrb[69].mxu0 }
 0x299   : > { %v7776_v9 = vadd.f32 %v5861_v26, %v5860_v31  ;;  %v5863_v2 = vpop.f32.mrb[70].mxu0 }
 0x29a   : > { %v5864_v3 = vpop.f32.mrb[71].mxu0  ;;  %v5884_v37 = vpop.f32.mrb[8].mxu1 }
 0x29b   : > { %v7778_v61 = vadd.f32 %v5864_v3, %v5863_v2  ;;  %v5885_v13 = vpop.f32.mrb[9].mxu1 }
 0x29c   : > { %4315 = vmatmul.mubr.bf16.gmra.mrb[88].mxu1 %v6764_v7  ;;  %v7780_v24 = vadd.f32 %v5885_v13, %v5884_v37  ;;  %v5887_v49 = vpop.f32.mrb[10].mxu1  ;;  %v6779_v13 = vld [vmem:[#allocation4 + $0x98] ss:$12 sps:$4 sm:$0xff]  }
 0x29d   : > { %4322 = vmatprep.mubr.bf16.mxu1 %v6765_v33  ;;  %v5888_v16 = vpop.f32.mrb[11].mxu1 }
 0x29e   : > { %v7782_v56 = vadd.f32 %v5888_v16, %v5887_v49 }
 0x2a3   : > { %v5866_v4 = vpop.f32.mrb[72].mxu0 }
 0x2a4   : > { %4323 = vmatmul.mubr.bf16.gmra.mrb[92].mxu1 %v6767_v63  ;;  %v5867_v6 = vpop.f32.mrb[73].mxu0 }
 0x2a5   : > { %4330 = vmatprep.mubr.bf16.mxu1 %v6769_v44  ;;  %v7784_v10 = vadd.f32 %v5867_v6, %v5866_v4  ;;  %v5869_v11 = vpop.f32.mrb[74].mxu0  ;;  %v6780_v44 = vld [vmem:[#allocation4 + $0xb0] ss:$12 sps:$4 sm:$0xff]  }
 0x2a6   : > { %v5890_v17 = vpop.f32.mrb[12].mxu1  ;;  %v5870_v60 = vpop.f32.mrb[75].mxu0 }
 0x2a7   : > { %v5891_v19 = vpop.f32.mrb[13].mxu1  ;;  %v7786_v23 = vadd.f32 %v5870_v60, %v5869_v11 }
 0x2a8   : > { %v7788_v54 = vadd.f32 %v5891_v19, %v5890_v17  ;;  %v5893_v18 = vpop.f32.mrb[14].mxu1 }
 0x2a9   : > { %v5894_v27 = vpop.f32.mrb[15].mxu1 }
 0x2aa   : > { %v7790_v29 = vadd.f32 %v5894_v27, %v5893_v18  ;;  %v6781_v27 = vld [vmem:[#allocation4 + $0xc8] ss:$12 sps:$4 sm:$0xff]  }
 0x2ac   : > { %4331 = vmatmul.mubr.bf16.gmra.mrb[96].mxu1 %v6771_v22 }
 0x2ad   : > { %4338 = vmatprep.mubr.bf16.mxu1 %v6773_v25 }
 0x2ae   : > { %v5896_v20 = vpop.f32.mrb[16].mxu1 }
 0x2af   : > { %v5897_v30 = vpop.f32.mrb[17].mxu1 }
 0x2b0   : > { %v7792_v34 = vadd.f32 %v5897_v30, %v5896_v20  ;;  %v5899_v35 = vpop.f32.mrb[18].mxu1 }
 0x2b1   : > { %v5956_v40 = vpop.f32.mrb[76].mxu0  ;;  %v5900_v15 = vpop.f32.mrb[19].mxu1 }
 0x2b2   : > { %v5957_v51 = vpop.f32.mrb[77].mxu0  ;;  %v7794_v5 = vadd.f32 %v5900_v15, %v5899_v35  ;;  %v6782_v35 = vld [vmem:[#allocation4 + $0xe0] ss:$12 sps:$4 sm:$0xff]  }
 0x2b3   : > { %v5958_v36 = vadd.f32 %v5957_v51, %v5956_v40  ;;  %v5959_v42 = vpop.f32.mrb[78].mxu0 }
 0x2b4   : > { %4339 = vmatmul.mubr.bf16.gmra.mrb[100].mxu1 %v6775_v32  ;;  %v5960_v45 = vpop.f32.mrb[79].mxu0 }
 0x2b5   : > { %6348 = vmatprep.mubr.bf16.mxu1 %v6776_v52  ;;  %v7797_v1 = vadd.f32 %v5958_v36, %v7760_v14  ;;  %v5961_v43 = vadd.f32 %v5960_v45, %v5959_v42  ;;  %v6788_v14 = vld [vmem:[%s8152_s5] sm:$0xff]   ;;  %v6789_v36 = vld [vmem:[%s8152_s5 + $0x8] sm:$0xff]  }
 0x2b6   : > { %6372 = vmatprep.subr.bf16.mxu0 %v6788_v14 }
 0x2b7   : > { %v5902_v21 = vpop.f32.mrb[20].mxu1  ;;  %v7800_v46 = vadd.f32 %v5961_v43, %v7762_v38  ;;  %6373 = vmatpush3.bf16.msra.mxu0 %v6788_v14 }
 0x2b8   : > { %v5903_v12 = vpop.f32.mrb[21].mxu1  ;;  %6374 = vmatprep.subr.bf16.mxu0 %v6789_v36 }
 0x2b9   : > { %v7802_v48 = vadd.f32 %v5903_v12, %v5902_v21  ;;  %v5905_v50 = vpop.f32.mrb[22].mxu1  ;;  %v5962_v53 = vpop.f32.mrb[80].mxu0  ;;  %v6783_v21 = vld [vmem:[#allocation4 + $0xf8] ss:$12 sps:$4 sm:$0xff]  }
 0x2ba   : > { %v5906_v58 = vpop.f32.mrb[23].mxu1  ;;  %v5963_v59 = vpop.f32.mrb[81].mxu0 }
 0x2bb   : > { %v7804_v62 = vadd.f32 %v5906_v58, %v5905_v50  ;;  %v5964_v31 = vadd.f32 %v5963_v59, %v5962_v53  ;;  %v5965_v7 = vpop.f32.mrb[82].mxu0  ;;  %6375 = vmatpush3.bf16.msra.mxu0 %v6789_v36  ;;  %v6790_v58 = vld [vmem:[%s8152_s5 + $0x10] sm:$0xff]  }
 0x2bc   : > { %6349 = vmatmul.mubr.bf16.vlgmr.msra.gmra.mrb[32].mxu1 %v6777_v47  ;;  %v5966_v38 = vpop.f32.mrb[83].mxu0  ;;  %v6784_v47 = vld [vmem:[#allocation4 + $0x110] ss:$12 sps:$4 sm:$0xff]   ;;  %6376 = vmatprep.subr.bf16.mxu0 %v6790_v58 }
 0x2bd   : > { %6352 = vmatprep.mubr.bf16.mxu1 %v6778_v55  ;;  %v7810_v26 = vadd.f32 %v5964_v31, %v7768_v8  ;;  %v5967_v33 = vadd.f32 %v5966_v38, %v5965_v7  ;;  %v6785_v7 = vld [vmem:[#allocation4 + $0x128] ss:$12 sps:$4 sm:$0xff]   ;;  %v6786_v38 = vld [vmem:[#allocation4 + $0x140] ss:$12 sps:$4 sm:$0xff]  }
 0x2bf   : > { %v5908_v2 = vpop.f32.mrb[24].mxu1  ;;  %v7813_v3 = vadd.f32 %v5967_v33, %v7770_v0  ;;  %6377 = vmatpush3.bf16.msra.mxu0 %v6790_v58 }
 0x2c0   : > { %v5909_v37 = vpop.f32.mrb[25].mxu1 }
 0x2c1   : > { %v7815_v49 = vadd.f32 %v5909_v37, %v5908_v2  ;;  %v5911_v16 = vpop.f32.mrb[26].mxu1  ;;  %v5968_v63 = vpop.f32.mrb[84].mxu0 }
 0x2c2   : > { %v5912_v4 = vpop.f32.mrb[27].mxu1  ;;  %v5969_v6 = vpop.f32.mrb[85].mxu0 }
 0x2c3   : > { %v7817_v11 = vadd.f32 %v5912_v4, %v5911_v16  ;;  %v5970_v8 = vadd.f32 %v5969_v6, %v5968_v63  ;;  %v5971_v17 = vpop.f32.mrb[86].mxu0 }
 0x2c4   : > { %6353 = vmatmul.mubr.bf16.gmra.mrb[36].mxu1 %v6779_v13  ;;  %v5972_v60 = vpop.f32.mrb[87].mxu0 }
 0x2c5   : > { %v7820_v19 = vadd.f32 %v5970_v8, %v7776_v9  ;;  %v5973_v0 = vadd.f32 %v5972_v60, %v5971_v17  ;;  %6356 = vmatprep.mubr.bf16.mxu1 %v6780_v44  ;;  %v6787_v44 = vld [vmem:[#allocation4 + $0x158] ss:$12 sps:$4 sm:$0xff]  }
 0x2c6   : > { %v6791_v17 = vld [vmem:[%s8152_s5 + $0x18] sm:$0xff]  }
 0x2c7   : > { %v5914_v22 = vpop.f32.mrb[28].mxu1  ;;  %v7823_v18 = vadd.f32 %v5973_v0, %v7778_v61  ;;  %6378 = vmatprep.subr.bf16.mxu0 %v6791_v17 }
 0x2c8   : > { %v5915_v25 = vpop.f32.mrb[29].mxu1  ;;  %6379 = vmatpush3.bf16.msra.mxu0 %v6791_v17 }
 0x2c9   : > { %v7825_v20 = vadd.f32 %v5915_v25, %v5914_v22  ;;  %v5917_v30 = vpop.f32.mrb[30].mxu1  ;;  %v5974_v32 = vpop.f32.mrb[88].mxu0 }
 0x2ca   : > { %v5918_v52 = vpop.f32.mrb[31].mxu1  ;;  %v5975_v40 = vpop.f32.mrb[89].mxu0 }
 0x2cb   : > { %v7827_v15 = vadd.f32 %v5918_v52, %v5917_v30  ;;  %v5976_v51 = vadd.f32 %v5975_v40, %v5974_v32  ;;  %v5977_v9 = vpop.f32.mrb[90].mxu0  ;;  %v6792_v32 = vld [vmem:[%s8152_s5 + $0x20] sm:$0xff]  }
 0x2cc   : > { %6357 = vmatmul.mubr.bf16.gmra.mrb[40].mxu1 %v6781_v27  ;;  %v5978_v61 = vpop.f32.mrb[91].mxu0  ;;  %6380 = vmatprep.subr.bf16.mxu0 %v6792_v32 }
 0x2cd   : > { %v7833_v42 = vadd.f32 %v5976_v51, %v7784_v10  ;;  %v5979_v45 = vadd.f32 %v5978_v61, %v5977_v9  ;;  %6360 = vmatprep.mubr.bf16.mxu1 %v6782_v35  ;;  %6381 = vmatpush3.bf16.msra.mxu0 %v6792_v32 }
 0x2cf   : > { %v7836_v43 = vadd.f32 %v5979_v45, %v7786_v23 }
 0x2d1   : > { %v5980_v12 = vpop.f32.mrb[92].mxu0 }
 0x2d2   : > { %v5981_v50 = vpop.f32.mrb[93].mxu0 }
 0x2d3   : > { %v5982_v53 = vadd.f32 %v5981_v50, %v5980_v12  ;;  %v5983_v55 = vpop.f32.mrb[94].mxu0 }
 0x2d4   : > { %v5984_v59 = vpop.f32.mrb[95].mxu0  ;;  %6361 = vmatmul.mubr.bf16.gmra.mrb[44].mxu1 %v6783_v21 }
 0x2d5   : > { %v7842_v10 = vadd.f32 %v5982_v53, %v7764_v28  ;;  %v5985_v31 = vadd.f32 %v5984_v59, %v5983_v55  ;;  %6364 = vmatprep.mubr.bf16.mxu1 %v6784_v47 }
 0x2d7   : > { %v7845_v23 = vadd.f32 %v5985_v31, %v7766_v41 }
 0x2d9   : > { %v5986_v14 = vpop.f32.mrb[96].mxu0 }
 0x2da   : > { %v5987_v33 = vpop.f32.mrb[97].mxu0 }
 0x2db   : > { %v5988_v2 = vadd.f32 %v5987_v33, %v5986_v14  ;;  %v5989_v37 = vpop.f32.mrb[98].mxu0 }
 0x2dc   : > { %v5990_v13 = vpop.f32.mrb[99].mxu0  ;;  %6365 = vmatmul.mubr.bf16.gmra.mrb[48].mxu1 %v6785_v7 }
 0x2dd   : > { %v7848_v16 = vadd.f32 %v5988_v2, %v7772_v57  ;;  %v5991_v28 = vadd.f32 %v5990_v13, %v5989_v37  ;;  %6368 = vmatprep.mubr.bf16.mxu1 %v6786_v38  ;;  %v6794_v38 = vld [vmem:[%s8152_s5 + $0x30] sm:$0xff]  }
 0x2df   : > { %v7851_v63 = vadd.f32 %v5991_v28, %v7774_v39 }
 0x2e1   : > { %v5992_v4 = vpop.f32.mrb[100].mxu0 }
 0x2e2   : > { %v5993_v41 = vpop.f32.mrb[101].mxu0 }
 0x2e3   : > { %v5994_v6 = vadd.f32 %v5993_v41, %v5992_v4  ;;  %v5995_v8 = vpop.f32.mrb[102].mxu0 }
 0x2e4   : > { %v5996_v60 = vpop.f32.mrb[103].mxu0  ;;  %6369 = vmatmul.mubr.bf16.gmra.mrb[52].mxu1 %v6787_v44 }
 0x2e5   : > { %v7857_v0 = vadd.f32 %v5994_v6, %v7780_v24  ;;  %v5997_v57 = vadd.f32 %v5996_v60, %v5995_v8 }
 0x2e7   : > { %v7860_v39 = vadd.f32 %v5997_v57, %v7782_v56 }
 0x2e9   : > { %v5998_v22 = vpop.f32.mrb[104].mxu0 }
 0x2ea   : > { %v5999_v25 = vpop.f32.mrb[105].mxu0 }
 0x2eb   : > { %v6000_v27 = vadd.f32 %v5999_v25, %v5998_v22  ;;  %v6001_v30 = vpop.f32.mrb[106].mxu0 }
 0x2ec   : > { %v6002_v35 = vpop.f32.mrb[107].mxu0 }
 0x2ed   : > { %v7866_v52 = vadd.f32 %v6000_v27, %v7788_v54  ;;  %v6003_v24 = vadd.f32 %v6002_v35, %v6001_v30 }
 0x2ef   : > { %v7869_v40 = vadd.f32 %v6003_v24, %v7790_v29  ;;  %v6793_v29 = vld [vmem:[%s8152_s5 + $0x28] sm:$0xff]  }
 0x2f0   : > { %6382 = vmatprep.subr.bf16.mxu0 %v6793_v29 }
 0x2f1   : > { %v6004_v56 = vpop.f32.mrb[108].mxu0  ;;  %6383 = vmatpush3.bf16.msra.mxu0 %v6793_v29 }
 0x2f2   : > { %v6005_v51 = vpop.f32.mrb[109].mxu0  ;;  %6384 = vmatprep.subr.bf16.mxu0 %v6794_v38 }
 0x2f3   : > { %v6006_v9 = vadd.f32 %v6005_v51, %v6004_v56  ;;  %v6007_v36 = vpop.f32.mrb[110].mxu0 }
 0x2f4   : > { %v6008_v61 = vpop.f32.mrb[111].mxu0 }
 0x2f5   : > { %v7872_v45 = vadd.f32 %v6006_v9, %v7792_v34  ;;  %v6009_v21 = vadd.f32 %v6008_v61, %v6007_v36  ;;  %6385 = vmatpush3.bf16.msra.mxu0 %v6794_v38 }
 0x2f7   : > { %v7875_v12 = vadd.f32 %v6009_v21, %v7794_v5 }
 0x2f9   : > { %v6010_v54 = vpop.f32.mrb[112].mxu0 }
 0x2fa   : > { %v6011_v47 = vpop.f32.mrb[113].mxu0 }
 0x2fb   : > { %v6012_v50 = vadd.f32 %v6011_v47, %v6010_v54  ;;  %v6013_v53 = vpop.f32.mrb[114].mxu0 }
 0x2fc   : > { %v6014_v55 = vpop.f32.mrb[115].mxu0 }
 0x2fd   : > { %v7881_v58 = vadd.f32 %v6012_v50, %v7802_v48  ;;  %v6015_v59 = vadd.f32 %v6014_v55, %v6013_v53 }
 0x2ff   : > { %v7884_v34 = vadd.f32 %v6015_v59, %v7804_v62 }
 0x301   : > { %v6016_v5 = vpop.f32.mrb[116].mxu0 }
 0x302   : > { %v6017_v31 = vpop.f32.mrb[117].mxu0 }
 0x303   : > { %v6018_v7 = vadd.f32 %v6017_v31, %v6016_v5  ;;  %v6019_v14 = vpop.f32.mrb[118].mxu0 }
 0x304   : > { %v6020_v33 = vpop.f32.mrb[119].mxu0 }
 0x305   : > { %v7890_v2 = vadd.f32 %v6018_v7, %v7815_v49  ;;  %v6021_v48 = vadd.f32 %v6020_v33, %v6019_v14  ;;  %v6795_v49 = vld [vmem:[%s8152_s5 + $0x38] sm:$0xff]  }
 0x306   : > { %6386 = vmatprep.subr.bf16.mxu0 %v6795_v49 }
 0x307   : > { %v7893_v37 = vadd.f32 %v6021_v48, %v7817_v11  ;;  %6387 = vmatpush3.bf16.msra.mxu0 %v6795_v49 }
 0x309   : > { %v6022_v62 = vpop.f32.mrb[120].mxu0 }
 0x30a   : > { %v6023_v13 = vpop.f32.mrb[121].mxu0 }
 0x30b   : > { %v6024_v28 = vadd.f32 %v6023_v13, %v6022_v62  ;;  %v6025_v44 = vpop.f32.mrb[122].mxu0 }
 0x30c   : > { %v6026_v4 = vpop.f32.mrb[123].mxu0 }
 0x30d   : > { %v7896_v41 = vadd.f32 %v6024_v28, %v7825_v20  ;;  %v6027_v6 = vadd.f32 %v6026_v4, %v6025_v44 }
 0x30f   : > { %v7899_v8 = vadd.f32 %v6027_v6, %v7827_v15 }
 0x32f   : > { %v6064_v11 = vpop.f32.mrb[56].mxu1 }
 0x330   : > { %v6065_v17 = vpop.f32.mrb[57].mxu1 }
 0x331   : > { %v6066_v60 = vadd.f32 %v6065_v17, %v6064_v11  ;;  %v6067_v57 = vpop.f32.mrb[58].mxu1 }
 0x332   : > { %v6068_v22 = vpop.f32.mrb[59].mxu1 }
 0x333   : > { %v6069_v25 = vadd.f32 %v6068_v22, %v6067_v57  ;;  %v7905_v27 = vadd.f32 %v7797_v1, %v6066_v60 }
 0x335   : > { %v7908_v20 = vadd.f32 %v7800_v46, %v6069_v25 }
 0x337   : > { %v6070_v15 = vpop.f32.mrb[60].mxu1 }
 0x338   : > { %v6071_v30 = vpop.f32.mrb[61].mxu1 }
 0x339   : > { %v6072_v32 = vadd.f32 %v6071_v30, %v6070_v15  ;;  %v6073_v35 = vpop.f32.mrb[62].mxu1 }
 0x33a   : > { %v6074_v24 = vpop.f32.mrb[63].mxu1 }
 0x33b   : > { %v6075_v56 = vadd.f32 %v6074_v24, %v6073_v35  ;;  %v7911_v51 = vadd.f32 %v7810_v26, %v6072_v32 }
 0x33d   : > { %v7914_v9 = vadd.f32 %v7813_v3, %v6075_v56 }
 0x33f   : > { %v6076_v36 = vpop.f32.mrb[64].mxu1 }
 0x340   : > { %v6077_v61 = vpop.f32.mrb[65].mxu1 }
 0x341   : > { %v6078_v21 = vadd.f32 %v6077_v61, %v6076_v36  ;;  %v6079_v1 = vpop.f32.mrb[66].mxu1 }
 0x342   : > { %v6080_v54 = vpop.f32.mrb[67].mxu1 }
 0x343   : > { %v6081_v47 = vadd.f32 %v6080_v54, %v6079_v1  ;;  %v7917_v46 = vadd.f32 %v7820_v19, %v6078_v21 }
 0x345   : > { %v7920_v50 = vadd.f32 %v7823_v18, %v6081_v47 }
 0x347   : > { %v6082_v53 = vpop.f32.mrb[68].mxu1 }
 0x348   : > { %v6083_v29 = vpop.f32.mrb[69].mxu1 }
 0x349   : > { %v6084_v55 = vadd.f32 %v6083_v29, %v6082_v53  ;;  %v6085_v26 = vpop.f32.mrb[70].mxu1 }
 0x34a   : > { %v6086_v59 = vpop.f32.mrb[71].mxu1 }
 0x34b   : > { %v6087_v5 = vadd.f32 %v6086_v59, %v6085_v26  ;;  %v7923_v3 = vadd.f32 %v7833_v42, %v6084_v55 }
 0x34d   : > { %v7926_v31 = vadd.f32 %v7836_v43, %v6087_v5 }
 0x34f   : > { %v6088_v7 = vpop.f32.mrb[72].mxu1 }
 0x350   : > { %v6089_v14 = vpop.f32.mrb[73].mxu1 }
 0x351   : > { %v6090_v38 = vadd.f32 %v6089_v14, %v6088_v7  ;;  %v6091_v19 = vpop.f32.mrb[74].mxu1 }
 0x352   : > { %v6092_v33 = vpop.f32.mrb[75].mxu1 }
 0x353   : > { %v6093_v48 = vadd.f32 %v6092_v33, %v6091_v19  ;;  %v7929_v18 = vadd.f32 %v7842_v10, %v6090_v38 }
 0x355   : > { %v7932_v62 = vadd.f32 %v7845_v23, %v6093_v48 }
 0x357   : > { %v6094_v13 = vpop.f32.mrb[76].mxu1 }
 0x358   : > { %v6095_v28 = vpop.f32.mrb[77].mxu1 }
 0x359   : > { %v6096_v44 = vadd.f32 %v6095_v28, %v6094_v13  ;;  %v6097_v42 = vpop.f32.mrb[78].mxu1 }
 0x35a   : > { %v6098_v4 = vpop.f32.mrb[79].mxu1 }
 0x35b   : > { %v6099_v6 = vadd.f32 %v6098_v4, %v6097_v42  ;;  %v7935_v43 = vadd.f32 %v7848_v16, %v6096_v44 }
 0x35d   : > { %v7938_v49 = vadd.f32 %v7851_v63, %v6099_v6 }
 0x35f   : > { %v6100_v11 = vpop.f32.mrb[80].mxu1 }
 0x360   : > { %v6101_v17 = vpop.f32.mrb[81].mxu1 }
 0x361   : > { %v6102_v60 = vadd.f32 %v6101_v17, %v6100_v11  ;;  %v6103_v10 = vpop.f32.mrb[82].mxu1 }
 0x362   : > { %v6104_v57 = vpop.f32.mrb[83].mxu1 }
 0x363   : > { %v6105_v22 = vadd.f32 %v6104_v57, %v6103_v10  ;;  %v7941_v23 = vadd.f32 %v7857_v0, %v6102_v60  ;;  %v7985_v60 = vld [vmem:[%s8156_s9] ss:$0 sm:$0xff] }
 0x365   : > { %v7944_v25 = vadd.f32 %v7860_v39, %v6105_v22 }
 0x367   : > { %v6106_v15 = vpop.f32.mrb[84].mxu1 }
 0x368   : > { %v6107_v30 = vpop.f32.mrb[85].mxu1 }
 0x369   : > { %v6108_v32 = vadd.f32 %v6107_v30, %v6106_v15  ;;  %v6109_v16 = vpop.f32.mrb[86].mxu1 }
 0x36a   : > { %v6110_v35 = vpop.f32.mrb[87].mxu1 }
 0x36b   : > { %v6111_v24 = vadd.f32 %v6110_v35, %v6109_v16  ;;  %v7947_v63 = vadd.f32 %v7866_v52, %v6108_v32 }
 0x36d   : > { %v7950_v56 = vadd.f32 %v7869_v40, %v6111_v24 }
 0x36f   : > { %v6112_v36 = vpop.f32.mrb[88].mxu1 }
 0x370   : > { %v6113_v61 = vpop.f32.mrb[89].mxu1 }
 0x371   : > { %v6114_v21 = vadd.f32 %v6113_v61, %v6112_v36  ;;  %v6115_v0 = vpop.f32.mrb[90].mxu1 }
 0x372   : > { %v6116_v1 = vpop.f32.mrb[91].mxu1 }
 0x373   : > { %v6117_v54 = vadd.f32 %v6116_v1, %v6115_v0  ;;  %v7953_v39 = vadd.f32 %v7872_v45, %v6114_v21 }
 0x375   : > { %v7956_v47 = vadd.f32 %v7875_v12, %v6117_v54 }
 0x377   : > { %v6118_v53 = vpop.f32.mrb[92].mxu1 }
 0x378   : > { %v6119_v29 = vpop.f32.mrb[93].mxu1 }
 0x379   : > { %v6120_v55 = vadd.f32 %v6119_v29, %v6118_v53  ;;  %v6121_v52 = vpop.f32.mrb[94].mxu1 }
 0x37a   : > { %v6122_v26 = vpop.f32.mrb[95].mxu1 }
 0x37b   : > { %v6123_v59 = vadd.f32 %v6122_v26, %v6121_v52  ;;  %v7959_v40 = vadd.f32 %v7881_v58, %v6120_v55 }
 0x37d   : > { %v7962_v5 = vadd.f32 %v7884_v34, %v6123_v59 }
 0x37f   : > { %v6124_v7 = vpop.f32.mrb[96].mxu1 }
 0x380   : > { %v6125_v14 = vpop.f32.mrb[97].mxu1 }
 0x381   : > { %v6126_v38 = vadd.f32 %v6125_v14, %v6124_v7  ;;  %v6127_v45 = vpop.f32.mrb[98].mxu1 }
 0x382   : > { %v6128_v19 = vpop.f32.mrb[99].mxu1 }
 0x383   : > { %v6129_v33 = vadd.f32 %v6128_v19, %v6127_v45  ;;  %v7965_v12 = vadd.f32 %v7890_v2, %v6126_v38  ;;  %v7979_v2 = vld [vmem:[%s8155_s8] ss:$0 sm:$0xff] }
 0x385   : > { %v7968_v48 = vadd.f32 %v7893_v37, %v6129_v33 }
 0x387   : > { %v6130_v13 = vpop.f32.mrb[100].mxu1 }
 0x388   : > { %v6131_v28 = vpop.f32.mrb[101].mxu1 }
 0x389   : > { %v6132_v44 = vadd.f32 %v6131_v28, %v6130_v13  ;;  %v6133_v58 = vpop.f32.mrb[102].mxu1 }
 0x38a   : > { %v6134_v42 = vpop.f32.mrb[103].mxu1 }
 0x38b   : > { %v6135_v4 = vadd.f32 %v6134_v42, %v6133_v58  ;;  %v7971_v34 = vadd.f32 %v7896_v41, %v6132_v44 }
 0x38d   : > { %v7974_v6 = vadd.f32 %v7899_v8, %v6135_v4 }
 0x38f   : > { %v6350_v11 = vpop.f32.mrb[32].mxu1 }
 0x390   : > { %v6430_v37 = vadd.f32 %v7911_v51, %v6350_v11  ;;  %v4381_v17 = vpop.f32.mrb[33].mxu1 }
 0x391   : > { %v6433_v41 = vadd.f32 %v7905_v27, %v4381_v17  ;;  %v6351_v10 = vpop.f32.mrb[34].mxu1 }
 0x392   : > { %v4509_v8 = vmul.f32 %v6430_v37, %v7979_v2  ;;  %v6436_v57 = vadd.f32 %v7914_v9, %v6351_v10  ;;  %v4384_v22 = vpop.f32.mrb[35].mxu1 }
 0x393   : > { %v4507_v15 = vmul.f32 %v6433_v41, %v7979_v2  ;;  %v6439_v30 = vadd.f32 %v7908_v20, %v4384_v22 }
 0x394   : > { %v4540_v51 = vadd.f32 %v7985_v60, %v4509_v8  ;;  %v4510_v32 = vmul.f32 %v6436_v57, %v7979_v2 }
 0x395   : > { %v4538_v16 = vadd.f32 %v7985_v60, %v4507_v15  ;;  %v4508_v35 = vmul.f32 %v6439_v30, %v7979_v2 }
 0x396   : > { %v4541_v27 = vadd.f32 %v7985_v60, %v4510_v32  ;;  %v4564_v61 = vmax.f32 %v4540_v51, 0.0 }
 0x397   : > { %v4539_v24 = vadd.f32 %v7985_v60, %v4508_v35  ;;  %v6354_v36 = vpop.f32.mrb[36].mxu1  ;;  %v4562_v1 = vmax.f32 %v4538_v16, 0.0 }
 0x398   : > { %v4565_v9 = vmax.f32 %v4541_v27, 0.0  ;;  %v6442_v21 = vadd.f32 %v7923_v3, %v6354_v36  ;;  %v4397_v0 = vpop.f32.mrb[37].mxu1 }
 0x399   : > { %v4563_v20 = vmax.f32 %v4539_v24, 0.0  ;;  %v6445_v54 = vadd.f32 %v7917_v46, %v4397_v0  ;;  %v6355_v53 = vpop.f32.mrb[38].mxu1 }
 0x39a   : > { %v4587_v29 = vpack.c.bf16 %v4565_v9, %v4564_v61  ;;  %v4513_v55 = vmul.f32 %v6442_v21, %v7979_v2  ;;  %v6448_v52 = vadd.f32 %v7926_v31, %v6355_v53  ;;  %v4400_v26 = vpop.f32.mrb[39].mxu1 }
 0x39b   : > { %v4511_v59 = vmul.f32 %v6445_v54, %v7979_v2  ;;  %v6451_v7 = vadd.f32 %v7920_v50, %v4400_v26  ;;  %v4586_v14 = vpack.c.bf16 %v4563_v20, %v4562_v1 }
 0x39c   : > { %v4544_v38 = vadd.f32 %v7985_v60, %v4513_v55  ;;  %v4514_v3 = vmul.f32 %v6448_v52, %v7979_v2 }
 0x39d   : > { %v4542_v45 = vadd.f32 %v7985_v60, %v4511_v59  ;;  %v4512_v46 = vmul.f32 %v6451_v7, %v7979_v2  ;;  %6388 = vmatprep.mubr.bf16.mxu0 %v4586_v14 }
 0x39e   : > { %v4545_v19 = vadd.f32 %v7985_v60, %v4514_v3  ;;  %6389 = vmatmul.mubr.bf16.vlgmr.msra.gmra.mrb[124].mxu0 %v4587_v29  ;;  %v4568_v13 = vmax.f32 %v4544_v38, 0.0 }
 0x39f   : > { %v4543_v31 = vadd.f32 %v7985_v60, %v4512_v46  ;;  %v6358_v33 = vpop.f32.mrb[40].mxu1  ;;  %v4566_v58 = vmax.f32 %v4542_v45, 0.0 }
 0x3a0   : > { %v4569_v28 = vmax.f32 %v4545_v19, 0.0  ;;  %v6454_v50 = vadd.f32 %v7935_v43, %v6358_v33  ;;  %v4413_v44 = vpop.f32.mrb[41].mxu1 }
 0x3a1   : > { %v4567_v42 = vmax.f32 %v4543_v31, 0.0  ;;  %v6457_v4 = vadd.f32 %v7929_v18, %v4413_v44  ;;  %v6359_v11 = vpop.f32.mrb[42].mxu1 }
 0x3a2   : > { %v4517_v37 = vmul.f32 %v6454_v50, %v7979_v2  ;;  %v6460_v17 = vadd.f32 %v7938_v49, %v6359_v11  ;;  %v4416_v41 = vpop.f32.mrb[43].mxu1  ;;  %v4589_v10 = vpack.c.bf16 %v4569_v28, %v4568_v13 }
 0x3a3   : > { %v4515_v8 = vmul.f32 %v6457_v4, %v7979_v2  ;;  %v6463_v57 = vadd.f32 %v7932_v62, %v4416_v41  ;;  %v4588_v22 = vpack.c.bf16 %v4567_v42, %v4566_v58 }
 0x3a4   : > { %v4548_v15 = vadd.f32 %v7985_v60, %v4517_v37  ;;  %v4518_v43 = vmul.f32 %v6460_v17, %v7979_v2 }
 0x3a5   : > { %v4546_v30 = vadd.f32 %v7985_v60, %v4515_v8  ;;  %v4516_v18 = vmul.f32 %v6463_v57, %v7979_v2  ;;  %6392 = vmatprep.mubr.bf16.mxu0 %v4588_v22 }
 0x3a6   : > { %v4549_v51 = vadd.f32 %v7985_v60, %v4518_v43  ;;  %6393 = vmatmul.mubr.bf16.gmra.mrb[128].mxu0 %v4589_v10  ;;  %v4572_v16 = vmax.f32 %v4548_v15, 0.0 }
 0x3a7   : > { %v4547_v49 = vadd.f32 %v7985_v60, %v4516_v18  ;;  %v6362_v32 = vpop.f32.mrb[44].mxu1  ;;  %v4570_v24 = vmax.f32 %v4546_v30, 0.0 }
 0x3a8   : > { %v4573_v35 = vmax.f32 %v4549_v51, 0.0  ;;  %v6466_v62 = vadd.f32 %v7947_v63, %v6362_v32  ;;  %v4429_v27 = vpop.f32.mrb[45].mxu1 }
 0x3a9   : > { %v4571_v36 = vmax.f32 %v4547_v49, 0.0  ;;  %v6469_v61 = vadd.f32 %v7941_v23, %v4429_v27  ;;  %v6363_v9 = vpop.f32.mrb[46].mxu1 }
 0x3aa   : > { %v4521_v21 = vmul.f32 %v6466_v62, %v7979_v2  ;;  %v6472_v0 = vadd.f32 %v7950_v56, %v6363_v9  ;;  %v4432_v1 = vpop.f32.mrb[47].mxu1  ;;  %v4591_v20 = vpack.c.bf16 %v4573_v35, %v4572_v16 }
 0x3ab   : > { %v4519_v54 = vmul.f32 %v6469_v61, %v7979_v2  ;;  %v6475_v53 = vadd.f32 %v7944_v25, %v4432_v1  ;;  %v4590_v29 = vpack.c.bf16 %v4571_v36, %v4570_v24  ;;  %v8063_v1 = vld [vmem:[#allocation2 + $0xc] ss:$92 sps:$4 sm:$0xff]  }
 0x3ac   : > { %v4552_v55 = vadd.f32 %v7985_v60, %v4521_v21  ;;  %v4522_v63 = vmul.f32 %v6472_v0, %v7979_v2  ;;  %v8061_v0 = vld [vmem:[%s8157_s10] ss:$0 sm:$0xff] }
 0x3ad   : > { %v4550_v52 = vadd.f32 %v7985_v60, %v4519_v54  ;;  %v4520_v23 = vmul.f32 %v6475_v53, %v7979_v2  ;;  %6396 = vmatprep.mubr.bf16.mxu0 %v4590_v29  ;;  %v5788_v54 = vld [vmem:[#allocation2 + $0x18] sm:$0xff]  }
 0x3ae   : > { %v4553_v26 = vadd.f32 %v7985_v60, %v4522_v63  ;;  %6397 = vmatmul.mubr.bf16.gmra.mrb[132].mxu0 %v4591_v20  ;;  %v4576_v7 = vmax.f32 %v4552_v55, 0.0 }
 0x3af   : > { %v4551_v56 = vadd.f32 %v7985_v60, %v4520_v23  ;;  %v6366_v59 = vpop.f32.mrb[48].mxu1  ;;  %v4574_v3 = vmax.f32 %v4550_v52, 0.0  ;;  %v4878_v52 = vunpack.c.l.bf16 %v8063_v1 }
 0x3b0   : > { %v4577_v14 = vmax.f32 %v4553_v26, 0.0  ;;  %v6478_v25 = vadd.f32 %v7959_v40, %v6366_v59  ;;  %v4445_v38 = vpop.f32.mrb[49].mxu1  ;;  %v5689_v59 = vunpack.c.l.bf16 %v5788_v54 }
 0x3b1   : > { %v4575_v45 = vmax.f32 %v4551_v56, 0.0  ;;  %v6481_v46 = vadd.f32 %v7953_v39, %v4445_v38  ;;  %v6367_v19 = vpop.f32.mrb[50].mxu1 }
 0x3b2   : > { %v4525_v31 = vmul.f32 %v6478_v25, %v7979_v2  ;;  %v6484_v33 = vadd.f32 %v7962_v5, %v6367_v19  ;;  %v4448_v13 = vpop.f32.mrb[51].mxu1  ;;  %v4593_v28 = vpack.c.bf16 %v4577_v14, %v4576_v7 }
 0x3b3   : > { %v4523_v50 = vmul.f32 %v6481_v46, %v7979_v2  ;;  %v6487_v44 = vadd.f32 %v7956_v47, %v4448_v13  ;;  %v4592_v58 = vpack.c.bf16 %v4575_v45, %v4574_v3 }
 0x3b4   : > { %v4556_v42 = vadd.f32 %v7985_v60, %v4525_v31  ;;  %v4526_v40 = vmul.f32 %v6484_v33, %v7979_v2  ;;  %v5789_v31 = vld [vmem:[#allocation2 + $0x20] sm:$0xff]  }
 0x3b5   : > { %v4554_v4 = vadd.f32 %v7985_v60, %v4523_v50  ;;  %v4524_v39 = vmul.f32 %v6487_v44, %v7979_v2  ;;  %6400 = vmatprep.mubr.bf16.mxu0 %v4592_v58  ;;  %v5790_v50 = vld [vmem:[#allocation2 + $0x28] sm:$0xff]  }
 0x3b6   : > { %v4557_v11 = vadd.f32 %v7985_v60, %v4526_v40  ;;  %6401 = vmatmul.mubr.bf16.gmra.mrb[136].mxu0 %v4593_v28  ;;  %v4580_v17 = vmax.f32 %v4556_v42, 0.0  ;;  %v5694_v40 = vunpack.c.h.bf16 %v5789_v31 }
 0x3b7   : > { %v4555_v5 = vadd.f32 %v7985_v60, %v4524_v39  ;;  %v6370_v37 = vpop.f32.mrb[52].mxu1  ;;  %v4578_v8 = vmax.f32 %v4554_v4, 0.0 }
 0x3b8   : > { %v4581_v41 = vmax.f32 %v4557_v11, 0.0  ;;  %v6490_v47 = vadd.f32 %v7971_v34, %v6370_v37  ;;  %v4461_v10 = vpop.f32.mrb[53].mxu1  ;;  %v5690_v37 = vunpack.c.h.bf16 %v5788_v54 }
 0x3b9   : > { %v4579_v57 = vmax.f32 %v4555_v5, 0.0  ;;  %v6493_v22 = vadd.f32 %v7965_v12, %v4461_v10  ;;  %v6371_v15 = vpop.f32.mrb[54].mxu1 }
 0x3ba   : > { %v4529_v43 = vmul.f32 %v6490_v47, %v7979_v2  ;;  %v6496_v30 = vadd.f32 %v7974_v6, %v6371_v15  ;;  %v4464_v18 = vpop.f32.mrb[55].mxu1  ;;  %v4595_v51 = vpack.c.bf16 %v4581_v41, %v4580_v17 }
 0x3bb   : > { %v4527_v49 = vmul.f32 %v6493_v22, %v7979_v2  ;;  %v6499_v32 = vadd.f32 %v7968_v48, %v4464_v18  ;;  %v4594_v16 = vpack.c.bf16 %v4579_v57, %v4578_v8  ;;  %v5697_v8 = vunpack.c.l.bf16 %v5790_v50 }
 0x3bc   : > { %v4560_v35 = vadd.f32 %v7985_v60, %v4529_v43  ;;  %v4530_v34 = vmul.f32 %v6496_v30, %v7979_v2  ;;  %v5693_v30 = vunpack.c.l.bf16 %v5789_v31 }
 0x3bd   : > { %v4558_v62 = vadd.f32 %v7985_v60, %v4527_v49  ;;  %v4528_v12 = vmul.f32 %v6499_v32, %v7979_v2  ;;  %6404 = vmatprep.mubr.bf16.mxu0 %v4594_v16  ;;  %v5787_v2 = vld [vmem:[#allocation2 + $0x10] sm:$0xff]  }
 0x3be   : > { %v4561_v27 = vadd.f32 %v7985_v60, %v4530_v34  ;;  %6405 = vmatmul.mubr.bf16.gmra.mrb[140].mxu0 %v4595_v51  ;;  %v4584_v24 = vmax.f32 %v4560_v35, 0.0  ;;  %v5686_v29 = vunpack.c.h.bf16 %v5787_v2  ;;  %v5685_v38 = vunpack.c.l.bf16 %v5787_v2  ;;  %v5791_v16 = vld [vmem:[#allocation2 + $0x30] sm:$0xff]  }
 0x3bf   : > { %v4559_v6 = vadd.f32 %v7985_v60, %v4528_v12  ;;  %v4582_v61 = vmax.f32 %v4558_v62, 0.0  ;;  %v8068_v60 = vld [vmem:[%s8158_s11] ss:$0 sm:$0xff]  ;;  %v5792_v12 = vld [vmem:[#allocation2 + $0x38] sm:$0xff]   ;;  %v5698_v2 = vunpack.c.h.bf16 %v5790_v50 }
 0x3c0   : > { %v4585_v36 = vmax.f32 %v4561_v27, 0.0 }
 0x3c1   : > { %v4583_v9 = vmax.f32 %v4559_v6, 0.0 }
 0x3c2   : > { %v4597_v48 = vpack.c.bf16 %v4585_v36, %v4584_v24  ;;  %v5702_v36 = vunpack.c.h.bf16 %v5791_v16 }
 0x3c3   : > { %v4596_v21 = vpack.c.bf16 %v4583_v9, %v4582_v61 }
 0x3c5   : > { %6408 = vmatprep.mubr.bf16.mxu0 %v4596_v21 }
 0x3c6   : > { %6409 = vmatmul.mubr.bf16.gmra.mrb[144].mxu0 %v4597_v48 }
 0x471   : > { %v6390_v20 = vpop.f32.mrb[124].mxu0 }
 0x472   : > { %v4800_v53 = vmul.f32 %v6390_v20, %v8061_v0  ;;  %v4696_v55 = vpop.f32.mrb[125].mxu0 }
 0x473   : > { %v4798_v63 = vmul.f32 %v8061_v0, %v4696_v55  ;;  %v6391_v23 = vpop.f32.mrb[126].mxu0  ;;  %v5705_v55 = vunpack.c.l.bf16 %v5792_v12 }
 0x474   : > { %v4831_v26 = vadd.f32 %v8068_v60, %v4800_v53  ;;  %v4801_v56 = vmul.f32 %v6391_v23, %v8061_v0  ;;  %v4699_v7 = vpop.f32.mrb[127].mxu0 }
 0x475   : > { %v4829_v14 = vadd.f32 %v8068_v60, %v4798_v63  ;;  %v4799_v25 = vmul.f32 %v8061_v0, %v4699_v7 }
 0x476   : > { %v4904_v3 = vadd.f32 %v5686_v29, %v4831_v26  ;;  %v4832_v45 = vadd.f32 %v8068_v60, %v4801_v56  ;;  %v5701_v56 = vunpack.c.l.bf16 %v5791_v16 }
 0x477   : > { %v4902_v46 = vadd.f32 %v4878_v52, %v4829_v14  ;;  %v4830_v19 = vadd.f32 %v8068_v60, %v4799_v25 }
 0x478   : > { %v4905_v33 = vadd.f32 %v5689_v59, %v4832_v45  ;;  %v4928_v44 = vmax.f32 %v4904_v3, 0.0 }
 0x479   : > { %v4903_v13 = vadd.f32 %v5685_v38, %v4830_v19  ;;  %v6394_v28 = vpop.f32.mrb[128].mxu0  ;;  %v4926_v39 = vmax.f32 %v4902_v46, 0.0  ;;  %v5793_v38 = vld [vmem:[#allocation2 + $0x40] sm:$0xff]   ;;  %v5794_v19 = vld [vmem:[#allocation2 + $0x48] sm:$0xff]  }
 0x47a   : > { %v4929_v58 = vmax.f32 %v4905_v33, 0.0  ;;  %v4804_v42 = vmul.f32 %v6394_v28, %v8061_v0  ;;  %v4712_v4 = vpop.f32.mrb[129].mxu0  ;;  %v5710_v28 = vunpack.c.h.bf16 %v5793_v38 }
 0x47b   : > { %v4927_v11 = vmax.f32 %v4903_v13, 0.0  ;;  %v4802_v5 = vmul.f32 %v8061_v0, %v4712_v4  ;;  %v6395_v17 = vpop.f32.mrb[130].mxu0 }
 0x47c   : > { %v5735_v41 = vpack.c.bf16 %v4929_v58, %v4928_v44  ;;  %v4835_v47 = vadd.f32 %v8068_v60, %v4804_v42  ;;  %v4805_v10 = vmul.f32 %v6395_v17, %v8061_v0  ;;  %v4715_v57 = vpop.f32.mrb[131].mxu0 }
 0x47d   : > { %v5730_v22 = vpack.c.bf16 %v4927_v11, %v4926_v39  ;;  %v4833_v15 = vadd.f32 %v8068_v60, %v4802_v5  ;;  %v4803_v43 = vmul.f32 %v8061_v0, %v4715_v57 }
 0x47e   : > { %5798 = vst [vmem:[%s6987_s13 + $0x8] sm:$0xff] %v5735_v41   ;;  %v4908_v18 = vadd.f32 %v5694_v40, %v4835_v47  ;;  %v4836_v51 = vadd.f32 %v8068_v60, %v4805_v10  ;;  %v5706_v40 = vunpack.c.h.bf16 %v5792_v12 }
 0x47f   : > { %5731 = vst [vmem:[%s6987_s13] sm:$0xff] %v5730_v22   ;;  %v4906_v49 = vadd.f32 %v5690_v37, %v4833_v15  ;;  %v4834_v32 = vadd.f32 %v8068_v60, %v4803_v43  ;;  %v5713_v37 = vunpack.c.l.bf16 %v5794_v19 }
 0x480   : > { %v4909_v35 = vadd.f32 %v5697_v8, %v4836_v51  ;;  %v4932_v27 = vmax.f32 %v4908_v18, 0.0  ;;  %v5709_v8 = vunpack.c.l.bf16 %v5793_v38 }
 0x481   : > { %v4907_v34 = vadd.f32 %v5693_v30, %v4834_v32  ;;  %v6398_v62 = vpop.f32.mrb[132].mxu0  ;;  %v4930_v9 = vmax.f32 %v4906_v49, 0.0  ;;  %v5795_v30 = vld [vmem:[#allocation2 + $0x50] sm:$0xff]   ;;  %v5796_v32 = vld [vmem:[#allocation2 + $0x58] sm:$0xff]  }
 0x482   : > { %v4933_v6 = vmax.f32 %v4909_v35, 0.0  ;;  %v4808_v24 = vmul.f32 %v6398_v62, %v8061_v0  ;;  %v4728_v61 = vpop.f32.mrb[133].mxu0  ;;  %v5718_v62 = vunpack.c.h.bf16 %v5795_v30 }
 0x483   : > { %v4931_v48 = vmax.f32 %v4907_v34, 0.0  ;;  %v4806_v21 = vmul.f32 %v8061_v0, %v4728_v61  ;;  %v6399_v20 = vpop.f32.mrb[134].mxu0 }
 0x484   : > { %v5745_v54 = vpack.c.bf16 %v4933_v6, %v4932_v27  ;;  %v4839_v53 = vadd.f32 %v8068_v60, %v4808_v24  ;;  %v4809_v29 = vmul.f32 %v6399_v20, %v8061_v0  ;;  %v4731_v63 = vpop.f32.mrb[135].mxu0 }
 0x485   : > { %v5740_v52 = vpack.c.bf16 %v4931_v48, %v4930_v9  ;;  %v4837_v23 = vadd.f32 %v8068_v60, %v4806_v21  ;;  %v4807_v26 = vmul.f32 %v8061_v0, %v4731_v63 }
 0x486   : > { %5800 = vst [vmem:[%s6987_s13 + $0x18] sm:$0xff] %v5745_v54   ;;  %v4912_v59 = vadd.f32 %v5702_v36, %v4839_v53  ;;  %v4840_v7 = vadd.f32 %v8068_v60, %v4809_v29  ;;  %v5714_v36 = vunpack.c.h.bf16 %v5794_v19 }
 0x487   : > { %5799 = vst [vmem:[%s6987_s13 + $0x10] sm:$0xff] %v5740_v52   ;;  %v4910_v14 = vadd.f32 %v5698_v2, %v4837_v23  ;;  %v4838_v25 = vadd.f32 %v8068_v60, %v4807_v26  ;;  %v5721_v2 = vunpack.c.l.bf16 %v5796_v32 }
 0x488   : > { %v4913_v3 = vadd.f32 %v5705_v55, %v4840_v7  ;;  %v4936_v31 = vmax.f32 %v4912_v59, 0.0  ;;  %v5717_v55 = vunpack.c.l.bf16 %v5795_v30 }
 0x489   : > { %v4911_v45 = vadd.f32 %v5701_v56, %v4838_v25  ;;  %v6402_v46 = vpop.f32.mrb[136].mxu0  ;;  %v4934_v44 = vmax.f32 %v4910_v14, 0.0  ;;  %v5797_v56 = vld [vmem:[#allocation2 + $0x60] sm:$0xff]  }
 0x48a   : > { %v4937_v33 = vmax.f32 %v4913_v3, 0.0  ;;  %v4812_v13 = vmul.f32 %v6402_v46, %v8061_v0  ;;  %v4744_v50 = vpop.f32.mrb[137].mxu0 }
 0x48b   : > { %v4935_v58 = vmax.f32 %v4911_v45, 0.0  ;;  %v4810_v42 = vmul.f32 %v8061_v0, %v4744_v50  ;;  %v6403_v4 = vpop.f32.mrb[138].mxu0  ;;  %v5726_v45 = vunpack.c.h.bf16 %v5797_v56 }
 0x48c   : > { %v5755_v39 = vpack.c.bf16 %v4937_v33, %v4936_v31  ;;  %v4843_v11 = vadd.f32 %v8068_v60, %v4812_v13  ;;  %v4813_v5 = vmul.f32 %v6403_v4, %v8061_v0  ;;  %v4747_v17 = vpop.f32.mrb[139].mxu0  ;;  %v5722_v13 = vunpack.c.h.bf16 %v5796_v32 }
 0x48d   : > { %v5750_v41 = vpack.c.bf16 %v4935_v58, %v4934_v44  ;;  %v4841_v47 = vadd.f32 %v8068_v60, %v4810_v42  ;;  %v4811_v10 = vmul.f32 %v8061_v0, %v4747_v17  ;;  %v4901_v42 = vunpack.c.h.bf16 %v8063_v1 }
 0x48e   : > { %5802 = vst [vmem:[%s6987_s13 + $0x28] sm:$0xff] %v5755_v39   ;;  %v4916_v57 = vadd.f32 %v5710_v28, %v4843_v11  ;;  %v4844_v22 = vadd.f32 %v8068_v60, %v4813_v5  ;;  %v5725_v5 = vunpack.c.l.bf16 %v5797_v56 }
 0x48f   : > { %5801 = vst [vmem:[%s6987_s13 + $0x20] sm:$0xff] %v5750_v41   ;;  %v4914_v15 = vadd.f32 %v5706_v40, %v4841_v47  ;;  %v4842_v43 = vadd.f32 %v8068_v60, %v4811_v10 }
 0x490   : > { %v4917_v18 = vadd.f32 %v5713_v37, %v4844_v22  ;;  %v4940_v16 = vmax.f32 %v4916_v57, 0.0 }
 0x491   : > { %v4915_v51 = vadd.f32 %v5709_v8, %v4842_v43  ;;  %v6406_v49 = vpop.f32.mrb[140].mxu0  ;;  %v4938_v27 = vmax.f32 %v4914_v15, 0.0 }
 0x492   : > { %v4941_v35 = vmax.f32 %v4917_v18, 0.0  ;;  %v4816_v34 = vmul.f32 %v6406_v49, %v8061_v0  ;;  %v4760_v12 = vpop.f32.mrb[141].mxu0 }
 0x493   : > { %v4939_v6 = vmax.f32 %v4915_v51, 0.0  ;;  %v4814_v24 = vmul.f32 %v8061_v0, %v4760_v12  ;;  %v6407_v61 = vpop.f32.mrb[142].mxu0 }
 0x494   : > { %v5765_v9 = vpack.c.bf16 %v4941_v35, %v4940_v16  ;;  %v4847_v48 = vadd.f32 %v8068_v60, %v4816_v34  ;;  %v4817_v21 = vmul.f32 %v6407_v61, %v8061_v0  ;;  %v4763_v20 = vpop.f32.mrb[143].mxu0 }
 0x495   : > { %v5760_v54 = vpack.c.bf16 %v4939_v6, %v4938_v27  ;;  %v4845_v53 = vadd.f32 %v8068_v60, %v4814_v24  ;;  %v4815_v29 = vmul.f32 %v8061_v0, %v4763_v20 }
 0x496   : > { %5804 = vst [vmem:[%s6987_s13 + $0x38] sm:$0xff] %v5765_v9   ;;  %v4920_v63 = vadd.f32 %v5718_v62, %v4847_v48  ;;  %v4848_v52 = vadd.f32 %v8068_v60, %v4817_v21 }
 0x497   : > { %5803 = vst [vmem:[%s6987_s13 + $0x30] sm:$0xff] %v5760_v54   ;;  %v4918_v23 = vadd.f32 %v5714_v36, %v4845_v53  ;;  %v4846_v26 = vadd.f32 %v8068_v60, %v4815_v29 }
 0x498   : > { %v4921_v59 = vadd.f32 %v5721_v2, %v4848_v52  ;;  %v4944_v25 = vmax.f32 %v4920_v63, 0.0 }
 0x499   : > { %v4919_v7 = vadd.f32 %v5717_v55, %v4846_v26  ;;  %v6410_v14 = vpop.f32.mrb[144].mxu0  ;;  %v4942_v19 = vmax.f32 %v4918_v23, 0.0 }
 0x49a   : > { %v4945_v38 = vmax.f32 %v4921_v59, 0.0  ;;  %v4820_v3 = vmul.f32 %v6410_v14, %v8061_v0  ;;  %v4776_v46 = vpop.f32.mrb[145].mxu0 }
 0x49b   : > { %v4943_v31 = vmax.f32 %v4919_v7, 0.0  ;;  %v4818_v33 = vmul.f32 %v8061_v0, %v4776_v46  ;;  %v6411_v28 = vpop.f32.mrb[146].mxu0 }
 0x49c   : > { %v5775_v50 = vpack.c.bf16 %v4945_v38, %v4944_v25  ;;  %v4851_v44 = vadd.f32 %v8068_v60, %v4820_v3  ;;  %v4821_v58 = vmul.f32 %v6411_v28, %v8061_v0  ;;  %v4779_v40 = vpop.f32.mrb[147].mxu0 }
 0x49d   : > { %v5770_v4 = vpack.c.bf16 %v4943_v31, %v4942_v19  ;;  %v4849_v39 = vadd.f32 %v8068_v60, %v4818_v33  ;;  %v4819_v11 = vmul.f32 %v8061_v0, %v4779_v40 }
 0x49e   : > { %5806 = vst [vmem:[%s6987_s13 + $0x48] sm:$0xff] %v5775_v50   ;;  %v4924_v37 = vadd.f32 %v5726_v45, %v4851_v44  ;;  %v4852_v17 = vadd.f32 %v8068_v60, %v4821_v58 }
 0x49f   : > { %5805 = vst [vmem:[%s6987_s13 + $0x40] sm:$0xff] %v5770_v4   ;;  %v4922_v41 = vadd.f32 %v5722_v13, %v4849_v39  ;;  %v4850_v47 = vadd.f32 %v8068_v60, %v4819_v11 }
 0x4a0   : > { %v4925_v10 = vadd.f32 %v4901_v42, %v4852_v17  ;;  %v4948_v1 = vmax.f32 %v4924_v37, 0.0 }
 0x4a1   : > { %v4923_v8 = vadd.f32 %v5725_v5, %v4850_v47  ;;  %v4946_v22 = vmax.f32 %v4922_v41, 0.0 }
 0x4a2   : > { %v4949_v57 = vmax.f32 %v4925_v10, 0.0 }
 0x4a3   : > { %v4947_v15 = vmax.f32 %v4923_v8, 0.0 }
 0x4a4   : > { %v5785_v43 = vpack.c.bf16 %v4949_v57, %v4948_v1 }
 0x4a5   : > { %v5780_v30 = vpack.c.bf16 %v4947_v15, %v4946_v22 }
 0x4a6   : > { %5808 = vst [vmem:[%s6987_s13 + $0x58] sm:$0xff] %v5785_v43  }
 0x4a7   : > { %5807 = vst [vmem:[%s6987_s13 + $0x50] sm:$0xff] %v5780_v30  }
 0x4a8 PF: > { %s22_s25 = sadd.s32 1, %s6835_s25   ;;  %s8178_s22 = sld [smem:[#allocation5_spill]] }
 0x4a9   : > { %p19_p12 = scmp.ge.s32.totalorder %s22_s25, 8   ;;  %s8179_s24 = sld [smem:[#allocation6_spill]] }
 0x4aa   : > { %s8180_s15 = sld [smem:[#allocation7_spill]]  ;;  %s8181_s21 = smov %s6827_s23 }
 0x4ab   :  { %21 = sbr.rel (!%p19_p12) target bundleno = 3 (0x3), region = 120 }
 0x4af   : > { %s8182_s23 = smov %s8179_s24 }
 0x4b0   : > { %s8183_s24 = smov %s8180_s15 }

</bundles_post_ra>
